<compile_context>
chip_gen: v6e
topology: v6e:2x2x1
jax: 0.10.0
libtpu: 0.0.40
codegen_flags: <defaults>
</compile_context>

<pallas_src>
import numpy as np
import jax
import jax.numpy as jnp
from jax import lax
from jax.experimental import pallas as pl
from jax.experimental.pallas import tpu as pltpu

F32 = jnp.float32

# ----------------------------- configuration -------------------------------
DIM = 48          # model dim
DEPTH = 2         # transformer layers
NUM_MEM = 4       # num_memory_tokens
SEQ_LEN = 8       # segment length
DIM_HEAD = 24     # per-head dim (rotary dim)
HEADS = 2
FF_MULT = 4
BATCH = 2

READ_LEN = NUM_MEM                      # fixed layout: [read | tokens | write]
SEG_T = READ_LEN + SEQ_LEN + NUM_MEM    # 16 rows per batch element
FF_INNER = int(DIM * FF_MULT * 2 / 3)   # 128 -> GEGLU split is 128-lane aligned
DIM_INNER = DIM_HEAD * HEADS
ATTN_SCALE = float(DIM_HEAD) ** -0.5
RMS_SCALE = float(DIM) ** 0.5
N_QKV_CHUNKS = 5                        # per head: q*scale, rot(q)*scale, k, rot(k), v

assert SEG_T & (SEG_T - 1) == 0, "packed segment length must be a power of two"

# TODO(synk): FeedForward / Attend internals (RMSNorm -> Linear -> GEGLU ->
# Linear, non-flash softmax attention with sim*scale, masked_fill(-finfo.max))
# follow the lucidrains recurrent-memory-transformer repo; exact GELU(erf) is
# evaluated with an Abramowitz-Stegun polynomial (|err| < 1.5e-7).


# --------------------------- fused wrapper kernel ---------------------------

def _rmt_kernel(x_ref, read_emb_ref, memtok_ref, cos_ref, sin_ref,
                attn_g_ref, wqkv_ref, wo_ref, ff_g_ref, w1_ref, w2_ref,
                logits_g_ref, logits_ref, mem_ref):
    """One grid step = one full segment forward (all layers, both batches)."""
    seg = pl.program_id(0)
    n_seg = pl.num_programs(0)
    B = x_ref.shape[0]
    depth = wqkv_ref.shape[0]
    heads = wo_ref.shape[1]
    T = SEG_T
    R = B * T
    neg_big = jnp.finfo(F32).min          # == masked_fill(-finfo.max) in torch

    # Zero the recurrent memory scratch before the first segment so the masked
    # read slots stay finite (their values never reach tokens/write rows).
    @pl.when(seg == 0)
    def _():
        mem_ref[...] = jnp.zeros(mem_ref.shape, F32)

    # ----- pack [read memories(+emb) | segment tokens | write memories] -----
    read_emb = read_emb_ref[...]          # (1, D)
    memtok = memtok_ref[...]              # (NUM_MEM, D)
    pieces = []
    for b in range(B):                    # B=2: static unroll
        pieces.append(mem_ref[b] + read_emb)
        pieces.append(x_ref[b])
        pieces.append(memtok)
    x = jnp.concatenate(pieces, axis=0).astype(F32)   # (B*T, D)

    # ----- attention mask: batch-block-diagonal + memory-aware causal -------
    r = lax.broadcasted_iota(jnp.int32, (R, R), 0)
    c = lax.broadcasted_iota(jnp.int32, (R, R), 1)
    shift = T.bit_length() - 1
    rb, cb = r >> shift, c >> shift       # batch index of row / col
    rp, cp = r & (T - 1), c & (T - 1)     # position within the packed segment
    tok_lo, tok_hi = READ_LEN, READ_LEN + SEQ_LEN
    allowed_pos = ((cp < tok_lo) | (rp >= tok_hi)
                   | ((rp >= tok_lo) & (rp < tok_hi) & (cp <= rp)))
    # First segment has no read memories: hide the read columns entirely.
    allowed = (rb == cb) & allowed_pos & ((cp >= tok_lo) | (seg > 0))

    cos = cos_ref[...]                    # (B*T, DIM_HEAD)
    sin = sin_ref[...]

    def rmsnorm(z, g_scaled):             # g_scaled = gamma * sqrt(dim)
        ss = jnp.sum(z * z, axis=-1, keepdims=True)
        return z * lax.rsqrt(jnp.maximum(ss, 1e-24)) * g_scaled

    def gelu_erf(z):
        # exact GELU: 0.5*z*(1+erf(z/sqrt(2))), erf via A&S 7.1.26 polynomial.
        u = z * 0.7071067811865476
        au = jnp.abs(u)
        t = 1.0 / (1.0 + 0.3275911 * au)
        poly = ((((1.061405429 * t - 1.453152027) * t + 1.421413741) * t
                 - 0.284496736) * t + 0.254829592) * t
        erf_abs = 1.0 - poly * jnp.exp(-au * au)
        erf = jnp.where(u >= 0.0, erf_abs, -erf_abs)
        return 0.5 * z * (1.0 + erf)

    for l in range(depth):                # DEPTH=2: static unroll
        # ------------------------------ attention ---------------------------
        xn = rmsnorm(x, attn_g_ref[l])
        attn_out = jnp.zeros_like(x)
        for h in range(heads):            # HEADS=2: static unroll
            base = h * N_QKV_CHUNKS
            # rotate_half and the attention scale are pre-folded into the
            # (q, rot(q)) / (k, rot(k)) weight chunks -> RoPE = 2 muls + 1 add.
            q = (jnp.dot(xn, wqkv_ref[l, base + 0], preferred_element_type=F32) * cos
                 + jnp.dot(xn, wqkv_ref[l, base + 1], preferred_element_type=F32) * sin)
            k = (jnp.dot(xn, wqkv_ref[l, base + 2], preferred_element_type=F32) * cos
                 + jnp.dot(xn, wqkv_ref[l, base + 3], preferred_element_type=F32) * sin)
            v = jnp.dot(xn, wqkv_ref[l, base + 4], preferred_element_type=F32)
            s = lax.dot_general(q, k, (((1,), (1,)), ((), ())),
                                preferred_element_type=F32)        # (R, R)
            s = jnp.where(allowed, s, neg_big)
            s = s - jnp.max(s, axis=-1, keepdims=True)
            p = jnp.exp(s)
            p = p * pl.reciprocal(jnp.sum(p, axis=-1, keepdims=True), approx=True)
            o = jnp.dot(p, v, preferred_element_type=F32)          # (R, DIM_HEAD)
            attn_out = attn_out + jnp.dot(o, wo_ref[l, h],
                                          preferred_element_type=F32)
        x = x + attn_out
        # ---------------------------- GEGLU feed-forward --------------------
        xn = rmsnorm(x, ff_g_ref[l])
        hpre = jnp.dot(xn, w1_ref[l], preferred_element_type=F32)  # (R, 2*FF_INNER)
        act = hpre[:, :FF_INNER] * gelu_erf(hpre[:, FF_INNER:])    # 128-aligned split
        x = x + jnp.dot(act, w2_ref[l], preferred_element_type=F32)

    # ----- recurrence: final write-memory rows feed the next segment --------
    for b in range(B):
        base = b * T
        mem_ref[b] = x[base + tok_hi:base + T]

    # ----- to_logits RMSNorm only needed on the final segment ----------------
    @pl.when(seg == n_seg - 1)
    def _():
        g = logits_g_ref[...]
        for b in range(B):
            base = b * T
            toks = x[base + tok_lo:base + tok_hi]                  # (SEQ_LEN, D)
            logits_ref[b] = rmsnorm(toks, g).astype(logits_ref.dtype)


# ------------------------------- JAX glue -----------------------------------

def _rotary_tables(batch, theta=10000.0):
    # tokens get positions arange(n)+10000, read/write memory tokens get 0.
    pos = jnp.concatenate([
        jnp.zeros((READ_LEN,), F32),
        jnp.arange(SEQ_LEN, dtype=F32) + 10000.0,
        jnp.zeros((NUM_MEM,), F32),
    ])
    inv = 1.0 / (theta ** (jnp.arange(0, DIM_HEAD, 2, dtype=F32) / DIM_HEAD))
    f = pos[:, None] * inv[None, :]
    freqs = jnp.concatenate([f, f], axis=-1)            # (SEG_T, DIM_HEAD)
    cos = jnp.tile(jnp.cos(freqs), (batch, 1))          # (batch*SEG_T, DIM_HEAD)
    sin = jnp.tile(jnp.sin(freqs), (batch, 1))
    return cos, sin


def _wrapper_forward_impl(params, x):
    """CompatibleRecurrentMemoryTransformerWrapper.forward (labels forced None)."""
    b, total, dim = x.shape
    # TODO(synk): ragged final segment (total % seq_len != 0) not supported.
    assert total % SEQ_LEN == 0
    num_segments = total // SEQ_LEN
    cos, sin = _rotary_tables(b)

    def resident(arr):                    # whole array, constant block index
        nd = arr.ndim
        return pl.BlockSpec(arr.shape, lambda s, nd=nd: (0,) * nd)

    in_specs = [
        pl.BlockSpec((b, SEQ_LEN, dim), lambda s: (0, s, 0)),  # per-segment tokens
        resident(params['read_memory_emb']),
        resident(params['memory_tokens']),
        resident(cos),
        resident(sin),
        resident(params['attn_gamma']),
        resident(params['wqkv']),
        resident(params['wo']),
        resident(params['ff_gamma']),
        resident(params['w1']),
        resident(params['w2']),
        resident(params['to_logits_gamma']),
    ]
    out_spec = pl.BlockSpec((b, SEQ_LEN, dim), lambda s: (0, 0, 0))

    out = pl.pallas_call(
        _rmt_kernel,
        grid=(num_segments,),
        in_specs=in_specs,
        out_specs=out_spec,
        out_shape=jax.ShapeDtypeStruct((b, SEQ_LEN, dim), x.dtype),
        scratch_shapes=[pltpu.VMEM((b, NUM_MEM, dim), F32)],   # carried memories
        compiler_params=pltpu.CompilerParams(
            dimension_semantics=("arbitrary",)),
    )(x, params['read_memory_emb'], params['memory_tokens'], cos, sin,
      params['attn_gamma'], params['wqkv'], params['wo'],
      params['ff_gamma'], params['w1'], params['w2'],
      params['to_logits_gamma'])
    return out


wrapper_forward = jax.jit(_wrapper_forward_impl)


# ------------------------------ parameters ----------------------------------

def init_raw_params(key):
    """Raw lucidrains-layout parameters (to_q/to_kv/to_out, GEGLU FF, RMSNorms)."""
    ks = jax.random.split(key, 8)

    def lin(k, fan_in, shape):
        return jax.random.normal(k, shape, F32) / float(fan_in) ** 0.5

    return {
        'read_memory_emb': 0.02 * jax.random.normal(ks[0], (DIM,), F32),
        'memory_tokens': 0.02 * jax.random.normal(ks[1], (NUM_MEM, DIM), F32),
        'attn_gamma': jnp.ones((DEPTH, 1, DIM), F32),
        'ff_gamma': jnp.ones((DEPTH, 1, DIM), F32),
        'to_logits_gamma': jnp.ones((1, DIM), F32),
        'wq': lin(ks[2], DIM, (DEPTH, DIM, DIM_INNER)),
        'wk': lin(ks[3], DIM, (DEPTH, DIM, DIM_INNER)),
        'wv': lin(ks[4], DIM, (DEPTH, DIM, DIM_INNER)),
        'wo': lin(ks[5], DIM_INNER, (DEPTH, DIM_INNER, DIM)),
        'w1': lin(ks[6], DIM, (DEPTH, DIM, 2 * FF_INNER)),
        'w2': lin(ks[7], FF_INNER, (DEPTH, FF_INNER, DIM)),
    }


def prepare_params(raw):
    """Repack raw weights into the kernel layout (one-time, host side):
       - per-(layer, chunk) leading-indexed QKV weights with rotate_half and the
         attention scale folded in -> no lane slicing / roll / negate in-kernel
       - RMSNorm sqrt(dim) scale folded into the gamma vectors."""
    half = DIM_HEAD // 2
    rot = np.zeros((DIM_HEAD, DIM_HEAD), np.float32)
    for j in range(half):
        rot[j, j + half] = 1.0      # rotate_half(q)[:, j+half] =  q[:, j]
        rot[j + half, j] = -1.0     # rotate_half(q)[:, j]      = -q[:, j+half]

    wqkv = np.zeros((DEPTH, HEADS * N_QKV_CHUNKS, DIM, DIM_HEAD), np.float32)
    wo = np.zeros((DEPTH, HEADS, DIM_HEAD, DIM), np.float32)
    for l in range(DEPTH):
        wq = np.asarray(raw['wq'][l])
        wk = np.asarray(raw['wk'][l])
        wv = np.asarray(raw['wv'][l])
        wol = np.asarray(raw['wo'][l])
        for h in range(HEADS):
            cols = slice(h * DIM_HEAD, (h + 1) * DIM_HEAD)
            base = h * N_QKV_CHUNKS
            wqkv[l, base + 0] = wq[:, cols] * ATTN_SCALE
            wqkv[l, base + 1] = (wq[:, cols] @ rot) * ATTN_SCALE
            wqkv[l, base + 2] = wk[:, cols]
            wqkv[l, base + 3] = wk[:, cols] @ rot
            wqkv[l, base + 4] = wv[:, cols]
            wo[l, h] = wol[cols, :]

    return {
        'read_memory_emb': jnp.asarray(raw['read_memory_emb']).reshape(1, DIM),
        'memory_tokens': jnp.asarray(raw['memory_tokens']),
        'attn_gamma': jnp.asarray(raw['attn_gamma']) * RMS_SCALE,
        'ff_gamma': jnp.asarray(raw['ff_gamma']) * RMS_SCALE,
        'to_logits_gamma': jnp.asarray(raw['to_logits_gamma']) * RMS_SCALE,
        'wqkv': jnp.asarray(wqkv),
        'wo': jnp.asarray(wo),
        'w1': jnp.asarray(raw['w1']),
        'w2': jnp.asarray(raw['w2']),
    }


if __name__ == "__main__":
    key = jax.random.PRNGKey(0)
    pkey, xkey = jax.random.split(key)
    params = prepare_params(init_raw_params(pkey))
    # x is already an embedded sequence (B, total, D); total = 2 segments.
    x = jax.random.normal(xkey, (BATCH, 2 * SEQ_LEN, DIM), F32)
    out = wrapper_forward(params, x)
    out = jax.block_until_ready(out)
    assert out.shape == (BATCH, SEQ_LEN, DIM)
    assert bool(jnp.all(jnp.isfinite(out)))
    print("KERNEL_OK")
</pallas_src>

<mosaic_0001>
module attributes {stable_mosaic.version = 11 : i64} {
  func.func @_rmt_kernel(%arg0: i32, %arg1: memref<2x8x48xf32, #tpu.memory_space<vmem>>, %arg2: memref<1x48xf32, #tpu.memory_space<vmem>>, %arg3: memref<4x48xf32, #tpu.memory_space<vmem>>, %arg4: memref<32x24xf32, #tpu.memory_space<vmem>>, %arg5: memref<32x24xf32, #tpu.memory_space<vmem>>, %arg6: memref<2x1x48xf32, #tpu.memory_space<vmem>>, %arg7: memref<2x10x48x24xf32, #tpu.memory_space<vmem>>, %arg8: memref<2x2x24x48xf32, #tpu.memory_space<vmem>>, %arg9: memref<2x1x48xf32, #tpu.memory_space<vmem>>, %arg10: memref<2x48x256xf32, #tpu.memory_space<vmem>>, %arg11: memref<2x128x48xf32, #tpu.memory_space<vmem>>, %arg12: memref<1x48xf32, #tpu.memory_space<vmem>>, %arg13: memref<2x8x48xf32, #tpu.memory_space<vmem>>, %arg14: memref<2x4x48xf32, #tpu.memory_space<vmem>>) attributes {dimension_semantics = [#tpu.dimension_semantics<arbitrary>], iteration_bounds = array<i64: 2>, scalar_prefetch = 0 : i64, scratch_operands = 1 : i64, tpu.core_type = #tpu.core_type<tc>, window_params = [{transform_indices = @transform_0, window_bounds = array<i64: 2, 8, 48>}, {pipeline_mode = #tpu.pipeline_mode<synchronous>, transform_indices = @transform_1, window_bounds = array<i64: 1, 48>}, {pipeline_mode = #tpu.pipeline_mode<synchronous>, transform_indices = @transform_2, window_bounds = array<i64: 4, 48>}, {pipeline_mode = #tpu.pipeline_mode<synchronous>, transform_indices = @transform_3, window_bounds = array<i64: 32, 24>}, {pipeline_mode = #tpu.pipeline_mode<synchronous>, transform_indices = @transform_4, window_bounds = array<i64: 32, 24>}, {pipeline_mode = #tpu.pipeline_mode<synchronous>, transform_indices = @transform_5, window_bounds = array<i64: 2, 1, 48>}, {pipeline_mode = #tpu.pipeline_mode<synchronous>, transform_indices = @transform_6, window_bounds = array<i64: 2, 10, 48, 24>}, {pipeline_mode = #tpu.pipeline_mode<synchronous>, transform_indices = @transform_7, window_bounds = array<i64: 2, 2, 24, 48>}, {pipeline_mode = #tpu.pipeline_mode<synchronous>, transform_indices = @transform_8, window_bounds = array<i64: 2, 1, 48>}, {pipeline_mode = #tpu.pipeline_mode<synchronous>, transform_indices = @transform_9, window_bounds = array<i64: 2, 48, 256>}, {pipeline_mode = #tpu.pipeline_mode<synchronous>, transform_indices = @transform_10, window_bounds = array<i64: 2, 128, 48>}, {pipeline_mode = #tpu.pipeline_mode<synchronous>, transform_indices = @transform_11, window_bounds = array<i64: 1, 48>}, {pipeline_mode = #tpu.pipeline_mode<synchronous>, transform_indices = @transform_12, window_bounds = array<i64: 2, 8, 48>}]} {
    %c0_i32 = arith.constant 0 : i32
    %0 = arith.cmpi eq, %arg0, %c0_i32 : i32
    %1 = arith.extui %0 : i1 to i32
    %c0_i32_0 = arith.constant 0 : i32
    %2 = arith.cmpi ne, %1, %c0_i32_0 : i32
    scf.if %2 {
      %cst_232 = arith.constant 0.000000e+00 : f32
      %370 = vector.broadcast %cst_232 : f32 to vector<2x4x48xf32>
      %c0_233 = arith.constant 0 : index
      %c0_234 = arith.constant 0 : index
      %c0_235 = arith.constant 0 : index
      %371 = vector.load %arg14[%c0_233, %c0_234, %c0_235] : memref<2x4x48xf32, #tpu.memory_space<vmem>>, vector<2x4x48xf32>
      tpu.vector_store %arg14[%c0_233, %c0_234, %c0_235], %370 {strides = array<i32>} : memref<2x4x48xf32, #tpu.memory_space<vmem>>, vector<2x4x48xf32>,
    } else {
    }
    %c0 = arith.constant 0 : index
    %c0_1 = arith.constant 0 : index
    %3 = vector.load %arg2[%c0, %c0_1] : memref<1x48xf32, #tpu.memory_space<vmem>>, vector<1x48xf32>
    %c0_2 = arith.constant 0 : index
    %c0_3 = arith.constant 0 : index
    %4 = vector.load %arg3[%c0_2, %c0_3] : memref<4x48xf32, #tpu.memory_space<vmem>>, vector<4x48xf32>
    %c0_4 = arith.constant 0 : index
    %c0_5 = arith.constant 0 : index
    %c0_6 = arith.constant 0 : index
    %5 = vector.load %arg14[%c0_4, %c0_5, %c0_6] : memref<2x4x48xf32, #tpu.memory_space<vmem>>, vector<1x4x48xf32>
    %6 = vector.shape_cast %5 : vector<1x4x48xf32> to vector<4x48xf32>
    %7 = vector.broadcast %3 : vector<1x48xf32> to vector<4x48xf32>
    %8 = arith.addf %6, %7 : vector<4x48xf32>
    %c0_7 = arith.constant 0 : index
    %c0_8 = arith.constant 0 : index
    %c0_9 = arith.constant 0 : index
    %9 = vector.load %arg1[%c0_7, %c0_8, %c0_9] : memref<2x8x48xf32, #tpu.memory_space<vmem>>, vector<1x8x48xf32>
    %10 = vector.shape_cast %9 : vector<1x8x48xf32> to vector<8x48xf32>
    %c1 = arith.constant 1 : index
    %c0_10 = arith.constant 0 : index
    %c0_11 = arith.constant 0 : index
    %11 = vector.load %arg14[%c1, %c0_10, %c0_11] : memref<2x4x48xf32, #tpu.memory_space<vmem>>, vector<1x4x48xf32>
    %12 = vector.shape_cast %11 : vector<1x4x48xf32> to vector<4x48xf32>
    %13 = vector.broadcast %3 : vector<1x48xf32> to vector<4x48xf32>
    %14 = arith.addf %12, %13 : vector<4x48xf32>
    %c1_12 = arith.constant 1 : index
    %c0_13 = arith.constant 0 : index
    %c0_14 = arith.constant 0 : index
    %15 = vector.load %arg1[%c1_12, %c0_13, %c0_14] : memref<2x8x48xf32, #tpu.memory_space<vmem>>, vector<1x8x48xf32>
    %16 = vector.shape_cast %15 : vector<1x8x48xf32> to vector<8x48xf32>
    %17 = tpu.concatenate %8, %10, %4, %14, %16, %4 in 0 : vector<4x48xf32>, vector<8x48xf32>, vector<4x48xf32>, vector<4x48xf32>, vector<8x48xf32>, vector<4x48xf32> -> vector<32x48xf32>
    %18 = tpu.iota {dimensions = array<i32: 0>} : vector<32x32xi32>
    %19 = tpu.iota {dimensions = array<i32: 1>} : vector<32x32xi32>
    %c4_i32 = arith.constant 4 : i32
    %20 = vector.broadcast %c4_i32 : i32 to vector<32x32xi32>
    %21 = arith.shrsi %18, %20 : vector<32x32xi32>
    %c4_i32_15 = arith.constant 4 : i32
    %22 = vector.broadcast %c4_i32_15 : i32 to vector<32x32xi32>
    %23 = arith.shrsi %19, %22 : vector<32x32xi32>
    %c15_i32 = arith.constant 15 : i32
    %24 = vector.broadcast %c15_i32 : i32 to vector<32x32xi32>
    %25 = arith.andi %18, %24 : vector<32x32xi32>
    %c15_i32_16 = arith.constant 15 : i32
    %26 = vector.broadcast %c15_i32_16 : i32 to vector<32x32xi32>
    %27 = arith.andi %19, %26 : vector<32x32xi32>
    %c4_i32_17 = arith.constant 4 : i32
    %28 = vector.broadcast %c4_i32_17 : i32 to vector<32x32xi32>
    %29 = arith.cmpi slt, %27, %28 : vector<32x32xi32>
    %c12_i32 = arith.constant 12 : i32
    %30 = vector.broadcast %c12_i32 : i32 to vector<32x32xi32>
    %31 = arith.cmpi sge, %25, %30 : vector<32x32xi32>
    %32 = arith.ori %29, %31 : vector<32x32xi1>
    %c4_i32_18 = arith.constant 4 : i32
    %33 = vector.broadcast %c4_i32_18 : i32 to vector<32x32xi32>
    %34 = arith.cmpi sge, %25, %33 : vector<32x32xi32>
    %c12_i32_19 = arith.constant 12 : i32
    %35 = vector.broadcast %c12_i32_19 : i32 to vector<32x32xi32>
    %36 = arith.cmpi slt, %25, %35 : vector<32x32xi32>
    %37 = arith.andi %34, %36 : vector<32x32xi1>
    %38 = arith.cmpi sle, %27, %25 : vector<32x32xi32>
    %39 = arith.andi %37, %38 : vector<32x32xi1>
    %40 = arith.ori %32, %39 : vector<32x32xi1>
    %41 = arith.cmpi eq, %21, %23 : vector<32x32xi32>
    %42 = arith.andi %41, %40 : vector<32x32xi1>
    %c4_i32_20 = arith.constant 4 : i32
    %43 = vector.broadcast %c4_i32_20 : i32 to vector<32x32xi32>
    %44 = arith.cmpi sge, %27, %43 : vector<32x32xi32>
    %c0_i32_21 = arith.constant 0 : i32
    %45 = arith.cmpi sgt, %arg0, %c0_i32_21 : i32
    %46 = vector.broadcast %45 : i1 to vector<32x32xi1>
    %47 = arith.ori %44, %46 : vector<32x32xi1>
    %48 = arith.andi %42, %47 : vector<32x32xi1>
    %c0_22 = arith.constant 0 : index
    %c0_23 = arith.constant 0 : index
    %49 = vector.load %arg4[%c0_22, %c0_23] : memref<32x24xf32, #tpu.memory_space<vmem>>, vector<32x24xf32>
    %c0_24 = arith.constant 0 : index
    %c0_25 = arith.constant 0 : index
    %50 = vector.load %arg5[%c0_24, %c0_25] : memref<32x24xf32, #tpu.memory_space<vmem>>, vector<32x24xf32>
    %c0_26 = arith.constant 0 : index
    %c0_27 = arith.constant 0 : index
    %c0_28 = arith.constant 0 : index
    %51 = vector.load %arg6[%c0_26, %c0_27, %c0_28] : memref<2x1x48xf32, #tpu.memory_space<vmem>>, vector<1x1x48xf32>
    %52 = vector.shape_cast %51 : vector<1x1x48xf32> to vector<1x48xf32>
    %53 = arith.mulf %17, %17 : vector<32x48xf32>
    %cst = arith.constant dense<0.000000e+00> : vector<32xf32>
    %54 = vector.multi_reduction <add>, %53, %cst [1] : vector<32x48xf32> to vector<32xf32>
    %55 = vector.shape_cast %54 : vector<32xf32> to vector<32x1xf32>
    %cst_29 = arith.constant 1.000000e-24 : f32
    %56 = vector.broadcast %cst_29 : f32 to vector<32x1xf32>
    %57 = arith.maximumf %55, %56 : vector<32x1xf32>
    %58 = math.rsqrt %57 : vector<32x1xf32>
    %59 = vector.broadcast %58 : vector<32x1xf32> to vector<32x48xf32>
    %60 = arith.mulf %17, %59 : vector<32x48xf32>
    %61 = vector.broadcast %52 : vector<1x48xf32> to vector<32x48xf32>
    %62 = arith.mulf %60, %61 : vector<32x48xf32>
    %cst_30 = arith.constant 0.000000e+00 : f32
    %63 = vector.broadcast %cst_30 : f32 to vector<32x48xf32>
    %c0_31 = arith.constant 0 : index
    %c0_32 = arith.constant 0 : index
    %c0_33 = arith.constant 0 : index
    %c0_34 = arith.constant 0 : index
    %64 = vector.load %arg7[%c0_31, %c0_32, %c0_33, %c0_34] : memref<2x10x48x24xf32, #tpu.memory_space<vmem>>, vector<1x1x48x24xf32>
    %65 = vector.shape_cast %64 : vector<1x1x48x24xf32> to vector<48x24xf32>
    %cst_35 = arith.constant dense<0.000000e+00> : vector<32x24xf32>
    %66 = tpu.matmul %62, %65, %cst_35 {dimension_numbers = #tpu.dot_dimension_numbers<[1], [0], [0], [1], [0, 0, 1, 1], [], []>} : vector<32x48xf32>, vector<48x24xf32>, vector<32x24xf32> -> vector<32x24xf32>
    %67 = arith.mulf %66, %49 : vector<32x24xf32>
    %c0_36 = arith.constant 0 : index
    %c1_37 = arith.constant 1 : index
    %c0_38 = arith.constant 0 : index
    %c0_39 = arith.constant 0 : index
    %68 = vector.load %arg7[%c0_36, %c1_37, %c0_38, %c0_39] : memref<2x10x48x24xf32, #tpu.memory_space<vmem>>, vector<1x1x48x24xf32>
    %69 = vector.shape_cast %68 : vector<1x1x48x24xf32> to vector<48x24xf32>
    %cst_40 = arith.constant dense<0.000000e+00> : vector<32x24xf32>
    %70 = tpu.matmul %62, %69, %cst_40 {dimension_numbers = #tpu.dot_dimension_numbers<[1], [0], [0], [1], [0, 0, 1, 1], [], []>} : vector<32x48xf32>, vector<48x24xf32>, vector<32x24xf32> -> vector<32x24xf32>
    %71 = arith.mulf %70, %50 : vector<32x24xf32>
    %72 = arith.addf %67, %71 : vector<32x24xf32>
    %c0_41 = arith.constant 0 : index
    %c2 = arith.constant 2 : index
    %c0_42 = arith.constant 0 : index
    %c0_43 = arith.constant 0 : index
    %73 = vector.load %arg7[%c0_41, %c2, %c0_42, %c0_43] : memref<2x10x48x24xf32, #tpu.memory_space<vmem>>, vector<1x1x48x24xf32>
    %74 = vector.shape_cast %73 : vector<1x1x48x24xf32> to vector<48x24xf32>
    %cst_44 = arith.constant dense<0.000000e+00> : vector<32x24xf32>
    %75 = tpu.matmul %62, %74, %cst_44 {dimension_numbers = #tpu.dot_dimension_numbers<[1], [0], [0], [1], [0, 0, 1, 1], [], []>} : vector<32x48xf32>, vector<48x24xf32>, vector<32x24xf32> -> vector<32x24xf32>
    %76 = arith.mulf %75, %49 : vector<32x24xf32>
    %c0_45 = arith.constant 0 : index
    %c3 = arith.constant 3 : index
    %c0_46 = arith.constant 0 : index
    %c0_47 = arith.constant 0 : index
    %77 = vector.load %arg7[%c0_45, %c3, %c0_46, %c0_47] : memref<2x10x48x24xf32, #tpu.memory_space<vmem>>, vector<1x1x48x24xf32>
    %78 = vector.shape_cast %77 : vector<1x1x48x24xf32> to vector<48x24xf32>
    %cst_48 = arith.constant dense<0.000000e+00> : vector<32x24xf32>
    %79 = tpu.matmul %62, %78, %cst_48 {dimension_numbers = #tpu.dot_dimension_numbers<[1], [0], [0], [1], [0, 0, 1, 1], [], []>} : vector<32x48xf32>, vector<48x24xf32>, vector<32x24xf32> -> vector<32x24xf32>
    %80 = arith.mulf %79, %50 : vector<32x24xf32>
    %81 = arith.addf %76, %80 : vector<32x24xf32>
    %c0_49 = arith.constant 0 : index
    %c4 = arith.constant 4 : index
    %c0_50 = arith.constant 0 : index
    %c0_51 = arith.constant 0 : index
    %82 = vector.load %arg7[%c0_49, %c4, %c0_50, %c0_51] : memref<2x10x48x24xf32, #tpu.memory_space<vmem>>, vector<1x1x48x24xf32>
    %83 = vector.shape_cast %82 : vector<1x1x48x24xf32> to vector<48x24xf32>
    %cst_52 = arith.constant dense<0.000000e+00> : vector<32x24xf32>
    %84 = tpu.matmul %62, %83, %cst_52 {dimension_numbers = #tpu.dot_dimension_numbers<[1], [0], [0], [1], [0, 0, 1, 1], [], []>} : vector<32x48xf32>, vector<48x24xf32>, vector<32x24xf32> -> vector<32x24xf32>
    %cst_53 = arith.constant dense<0.000000e+00> : vector<32x32xf32>
    %85 = tpu.matmul %72, %81, %cst_53 {dimension_numbers = #tpu.dot_dimension_numbers<[1], [1], [0], [0], [0, 0, 1, 0], [], []>} : vector<32x24xf32>, vector<32x24xf32>, vector<32x32xf32> -> vector<32x32xf32>
    %cst_54 = arith.constant -3.40282347E+38 : f32
    %86 = vector.broadcast %cst_54 : f32 to vector<32x32xf32>
    %87 = arith.select %48, %85, %86 : vector<32x32xi1>, vector<32x32xf32>
    %cst_55 = arith.constant dense<0xFF800000> : vector<32xf32>
    %88 = vector.multi_reduction <maximumf>, %87, %cst_55 [1] : vector<32x32xf32> to vector<32xf32>
    %89 = vector.shape_cast %88 : vector<32xf32> to vector<32x1xf32>
    %90 = vector.broadcast %89 : vector<32x1xf32> to vector<32x32xf32>
    %91 = arith.subf %87, %90 : vector<32x32xf32>
    %92 = math.exp %91 : vector<32x32xf32>
    %cst_56 = arith.constant dense<0.000000e+00> : vector<32xf32>
    %93 = vector.multi_reduction <add>, %92, %cst_56 [1] : vector<32x32xf32> to vector<32xf32>
    %94 = vector.shape_cast %93 : vector<32xf32> to vector<32x1xf32>
    %95 = tpu.reciprocal %94 {approx = true} : vector<32x1xf32> -> vector<32x1xf32>
    %96 = vector.broadcast %95 : vector<32x1xf32> to vector<32x32xf32>
    %97 = arith.mulf %92, %96 : vector<32x32xf32>
    %cst_57 = arith.constant dense<0.000000e+00> : vector<32x24xf32>
    %98 = tpu.matmul %97, %84, %cst_57 {dimension_numbers = #tpu.dot_dimension_numbers<[1], [0], [0], [1], [0, 0, 1, 1], [], []>} : vector<32x32xf32>, vector<32x24xf32>, vector<32x24xf32> -> vector<32x24xf32>
    %c0_58 = arith.constant 0 : index
    %c0_59 = arith.constant 0 : index
    %c0_60 = arith.constant 0 : index
    %c0_61 = arith.constant 0 : index
    %99 = vector.load %arg8[%c0_58, %c0_59, %c0_60, %c0_61] : memref<2x2x24x48xf32, #tpu.memory_space<vmem>>, vector<1x1x24x48xf32>
    %100 = vector.shape_cast %99 : vector<1x1x24x48xf32> to vector<24x48xf32>
    %cst_62 = arith.constant dense<0.000000e+00> : vector<32x48xf32>
    %101 = tpu.matmul %98, %100, %cst_62 {dimension_numbers = #tpu.dot_dimension_numbers<[1], [0], [0], [1], [0, 0, 1, 1], [], []>} : vector<32x24xf32>, vector<24x48xf32>, vector<32x48xf32> -> vector<32x48xf32>
    %102 = arith.addf %63, %101 : vector<32x48xf32>
    %c0_63 = arith.constant 0 : index
    %c5 = arith.constant 5 : index
    %c0_64 = arith.constant 0 : index
    %c0_65 = arith.constant 0 : index
    %103 = vector.load %arg7[%c0_63, %c5, %c0_64, %c0_65] : memref<2x10x48x24xf32, #tpu.memory_space<vmem>>, vector<1x1x48x24xf32>
    %104 = vector.shape_cast %103 : vector<1x1x48x24xf32> to vector<48x24xf32>
    %cst_66 = arith.constant dense<0.000000e+00> : vector<32x24xf32>
    %105 = tpu.matmul %62, %104, %cst_66 {dimension_numbers = #tpu.dot_dimension_numbers<[1], [0], [0], [1], [0, 0, 1, 1], [], []>} : vector<32x48xf32>, vector<48x24xf32>, vector<32x24xf32> -> vector<32x24xf32>
    %106 = arith.mulf %105, %49 : vector<32x24xf32>
    %c0_67 = arith.constant 0 : index
    %c6 = arith.constant 6 : index
    %c0_68 = arith.constant 0 : index
    %c0_69 = arith.constant 0 : index
    %107 = vector.load %arg7[%c0_67, %c6, %c0_68, %c0_69] : memref<2x10x48x24xf32, #tpu.memory_space<vmem>>, vector<1x1x48x24xf32>
    %108 = vector.shape_cast %107 : vector<1x1x48x24xf32> to vector<48x24xf32>
    %cst_70 = arith.constant dense<0.000000e+00> : vector<32x24xf32>
    %109 = tpu.matmul %62, %108, %cst_70 {dimension_numbers = #tpu.dot_dimension_numbers<[1], [0], [0], [1], [0, 0, 1, 1], [], []>} : vector<32x48xf32>, vector<48x24xf32>, vector<32x24xf32> -> vector<32x24xf32>
    %110 = arith.mulf %109, %50 : vector<32x24xf32>
    %111 = arith.addf %106, %110 : vector<32x24xf32>
    %c0_71 = arith.constant 0 : index
    %c7 = arith.constant 7 : index
    %c0_72 = arith.constant 0 : index
    %c0_73 = arith.constant 0 : index
    %112 = vector.load %arg7[%c0_71, %c7, %c0_72, %c0_73] : memref<2x10x48x24xf32, #tpu.memory_space<vmem>>, vector<1x1x48x24xf32>
    %113 = vector.shape_cast %112 : vector<1x1x48x24xf32> to vector<48x24xf32>
    %cst_74 = arith.constant dense<0.000000e+00> : vector<32x24xf32>
    %114 = tpu.matmul %62, %113, %cst_74 {dimension_numbers = #tpu.dot_dimension_numbers<[1], [0], [0], [1], [0, 0, 1, 1], [], []>} : vector<32x48xf32>, vector<48x24xf32>, vector<32x24xf32> -> vector<32x24xf32>
    %115 = arith.mulf %114, %49 : vector<32x24xf32>
    %c0_75 = arith.constant 0 : index
    %c8 = arith.constant 8 : index
    %c0_76 = arith.constant 0 : index
    %c0_77 = arith.constant 0 : index
    %116 = vector.load %arg7[%c0_75, %c8, %c0_76, %c0_77] : memref<2x10x48x24xf32, #tpu.memory_space<vmem>>, vector<1x1x48x24xf32>
    %117 = vector.shape_cast %116 : vector<1x1x48x24xf32> to vector<48x24xf32>
    %cst_78 = arith.constant dense<0.000000e+00> : vector<32x24xf32>
    %118 = tpu.matmul %62, %117, %cst_78 {dimension_numbers = #tpu.dot_dimension_numbers<[1], [0], [0], [1], [0, 0, 1, 1], [], []>} : vector<32x48xf32>, vector<48x24xf32>, vector<32x24xf32> -> vector<32x24xf32>
    %119 = arith.mulf %118, %50 : vector<32x24xf32>
    %120 = arith.addf %115, %119 : vector<32x24xf32>
    %c0_79 = arith.constant 0 : index
    %c9 = arith.constant 9 : index
    %c0_80 = arith.constant 0 : index
    %c0_81 = arith.constant 0 : index
    %121 = vector.load %arg7[%c0_79, %c9, %c0_80, %c0_81] : memref<2x10x48x24xf32, #tpu.memory_space<vmem>>, vector<1x1x48x24xf32>
    %122 = vector.shape_cast %121 : vector<1x1x48x24xf32> to vector<48x24xf32>
    %cst_82 = arith.constant dense<0.000000e+00> : vector<32x24xf32>
    %123 = tpu.matmul %62, %122, %cst_82 {dimension_numbers = #tpu.dot_dimension_numbers<[1], [0], [0], [1], [0, 0, 1, 1], [], []>} : vector<32x48xf32>, vector<48x24xf32>, vector<32x24xf32> -> vector<32x24xf32>
    %cst_83 = arith.constant dense<0.000000e+00> : vector<32x32xf32>
    %124 = tpu.matmul %111, %120, %cst_83 {dimension_numbers = #tpu.dot_dimension_numbers<[1], [1], [0], [0], [0, 0, 1, 0], [], []>} : vector<32x24xf32>, vector<32x24xf32>, vector<32x32xf32> -> vector<32x32xf32>
    %cst_84 = arith.constant -3.40282347E+38 : f32
    %125 = vector.broadcast %cst_84 : f32 to vector<32x32xf32>
    %126 = arith.select %48, %124, %125 : vector<32x32xi1>, vector<32x32xf32>
    %cst_85 = arith.constant dense<0xFF800000> : vector<32xf32>
    %127 = vector.multi_reduction <maximumf>, %126, %cst_85 [1] : vector<32x32xf32> to vector<32xf32>
    %128 = vector.shape_cast %127 : vector<32xf32> to vector<32x1xf32>
    %129 = vector.broadcast %128 : vector<32x1xf32> to vector<32x32xf32>
    %130 = arith.subf %126, %129 : vector<32x32xf32>
    %131 = math.exp %130 : vector<32x32xf32>
    %cst_86 = arith.constant dense<0.000000e+00> : vector<32xf32>
    %132 = vector.multi_reduction <add>, %131, %cst_86 [1] : vector<32x32xf32> to vector<32xf32>
    %133 = vector.shape_cast %132 : vector<32xf32> to vector<32x1xf32>
    %134 = tpu.reciprocal %133 {approx = true} : vector<32x1xf32> -> vector<32x1xf32>
    %135 = vector.broadcast %134 : vector<32x1xf32> to vector<32x32xf32>
    %136 = arith.mulf %131, %135 : vector<32x32xf32>
    %cst_87 = arith.constant dense<0.000000e+00> : vector<32x24xf32>
    %137 = tpu.matmul %136, %123, %cst_87 {dimension_numbers = #tpu.dot_dimension_numbers<[1], [0], [0], [1], [0, 0, 1, 1], [], []>} : vector<32x32xf32>, vector<32x24xf32>, vector<32x24xf32> -> vector<32x24xf32>
    %c0_88 = arith.constant 0 : index
    %c1_89 = arith.constant 1 : index
    %c0_90 = arith.constant 0 : index
    %c0_91 = arith.constant 0 : index
    %138 = vector.load %arg8[%c0_88, %c1_89, %c0_90, %c0_91] : memref<2x2x24x48xf32, #tpu.memory_space<vmem>>, vector<1x1x24x48xf32>
    %139 = vector.shape_cast %138 : vector<1x1x24x48xf32> to vector<24x48xf32>
    %cst_92 = arith.constant dense<0.000000e+00> : vector<32x48xf32>
    %140 = tpu.matmul %137, %139, %cst_92 {dimension_numbers = #tpu.dot_dimension_numbers<[1], [0], [0], [1], [0, 0, 1, 1], [], []>} : vector<32x24xf32>, vector<24x48xf32>, vector<32x48xf32> -> vector<32x48xf32>
    %141 = arith.addf %102, %140 : vector<32x48xf32>
    %142 = arith.addf %17, %141 : vector<32x48xf32>
    %c0_93 = arith.constant 0 : index
    %c0_94 = arith.constant 0 : index
    %c0_95 = arith.constant 0 : index
    %143 = vector.load %arg9[%c0_93, %c0_94, %c0_95] : memref<2x1x48xf32, #tpu.memory_space<vmem>>, vector<1x1x48xf32>
    %144 = vector.shape_cast %143 : vector<1x1x48xf32> to vector<1x48xf32>
    %145 = arith.mulf %142, %142 : vector<32x48xf32>
    %cst_96 = arith.constant dense<0.000000e+00> : vector<32xf32>
    %146 = vector.multi_reduction <add>, %145, %cst_96 [1] : vector<32x48xf32> to vector<32xf32>
    %147 = vector.shape_cast %146 : vector<32xf32> to vector<32x1xf32>
    %cst_97 = arith.constant 1.000000e-24 : f32
    %148 = vector.broadcast %cst_97 : f32 to vector<32x1xf32>
    %149 = arith.maximumf %147, %148 : vector<32x1xf32>
    %150 = math.rsqrt %149 : vector<32x1xf32>
    %151 = vector.broadcast %150 : vector<32x1xf32> to vector<32x48xf32>
    %152 = arith.mulf %142, %151 : vector<32x48xf32>
    %153 = vector.broadcast %144 : vector<1x48xf32> to vector<32x48xf32>
    %154 = arith.mulf %152, %153 : vector<32x48xf32>
    %c0_98 = arith.constant 0 : index
    %c0_99 = arith.constant 0 : index
    %c0_100 = arith.constant 0 : index
    %155 = vector.load %arg10[%c0_98, %c0_99, %c0_100] : memref<2x48x256xf32, #tpu.memory_space<vmem>>, vector<1x48x256xf32>
    %156 = vector.shape_cast %155 : vector<1x48x256xf32> to vector<48x256xf32>
    %cst_101 = arith.constant dense<0.000000e+00> : vector<32x256xf32>
    %157 = tpu.matmul %154, %156, %cst_101 {dimension_numbers = #tpu.dot_dimension_numbers<[1], [0], [0], [1], [0, 0, 1, 1], [], []>} : vector<32x48xf32>, vector<48x256xf32>, vector<32x256xf32> -> vector<32x256xf32>
    %158 = vector.extract_strided_slice %157 {offsets = [0, 0], sizes = [32, 128], strides = [1, 1]} : vector<32x256xf32> to vector<32x128xf32>
    %159 = vector.extract_strided_slice %157 {offsets = [0, 128], sizes = [32, 128], strides = [1, 1]} : vector<32x256xf32> to vector<32x128xf32>
    %cst_102 = arith.constant 0.707106769 : f32
    %160 = vector.broadcast %cst_102 : f32 to vector<32x128xf32>
    %161 = arith.mulf %159, %160 : vector<32x128xf32>
    %162 = math.absf %161 : vector<32x128xf32>
    %cst_103 = arith.constant 0.327591091 : f32
    %163 = vector.broadcast %cst_103 : f32 to vector<32x128xf32>
    %164 = arith.mulf %163, %162 : vector<32x128xf32>
    %cst_104 = arith.constant 1.000000e+00 : f32
    %165 = vector.broadcast %cst_104 : f32 to vector<32x128xf32>
    %166 = arith.addf %165, %164 : vector<32x128xf32>
    %cst_105 = arith.constant 1.000000e+00 : f32
    %167 = vector.broadcast %cst_105 : f32 to vector<32x128xf32>
    %168 = arith.divf %167, %166 : vector<32x128xf32>
    %cst_106 = arith.constant 1.06140542 : f32
    %169 = vector.broadcast %cst_106 : f32 to vector<32x128xf32>
    %170 = arith.mulf %169, %168 : vector<32x128xf32>
    %cst_107 = arith.constant 1.45315206 : f32
    %171 = vector.broadcast %cst_107 : f32 to vector<32x128xf32>
    %172 = arith.subf %170, %171 : vector<32x128xf32>
    %173 = arith.mulf %172, %168 : vector<32x128xf32>
    %cst_108 = arith.constant 1.42141378 : f32
    %174 = vector.broadcast %cst_108 : f32 to vector<32x128xf32>
    %175 = arith.addf %173, %174 : vector<32x128xf32>
    %176 = arith.mulf %175, %168 : vector<32x128xf32>
    %cst_109 = arith.constant 0.284496725 : f32
    %177 = vector.broadcast %cst_109 : f32 to vector<32x128xf32>
    %178 = arith.subf %176, %177 : vector<32x128xf32>
    %179 = arith.mulf %178, %168 : vector<32x128xf32>
    %cst_110 = arith.constant 0.254829586 : f32
    %180 = vector.broadcast %cst_110 : f32 to vector<32x128xf32>
    %181 = arith.addf %179, %180 : vector<32x128xf32>
    %182 = arith.mulf %181, %168 : vector<32x128xf32>
    %cst_111 = arith.constant 0.000000e+00 : f32
    %183 = vector.broadcast %cst_111 : f32 to vector<32x128xf32>
    %184 = arith.subf %183, %162 : vector<32x128xf32>
    %185 = arith.mulf %184, %162 : vector<32x128xf32>
    %186 = math.exp %185 : vector<32x128xf32>
    %187 = arith.mulf %182, %186 : vector<32x128xf32>
    %cst_112 = arith.constant 1.000000e+00 : f32
    %188 = vector.broadcast %cst_112 : f32 to vector<32x128xf32>
    %189 = arith.subf %188, %187 : vector<32x128xf32>
    %cst_113 = arith.constant 0.000000e+00 : f32
    %190 = vector.broadcast %cst_113 : f32 to vector<32x128xf32>
    %191 = arith.cmpf oge, %161, %190 : vector<32x128xf32>
    %cst_114 = arith.constant 0.000000e+00 : f32
    %192 = vector.broadcast %cst_114 : f32 to vector<32x128xf32>
    %193 = arith.subf %192, %189 : vector<32x128xf32>
    %194 = arith.select %191, %189, %193 : vector<32x128xi1>, vector<32x128xf32>
    %cst_115 = arith.constant 5.000000e-01 : f32
    %195 = vector.broadcast %cst_115 : f32 to vector<32x128xf32>
    %196 = arith.mulf %195, %159 : vector<32x128xf32>
    %cst_116 = arith.constant 1.000000e+00 : f32
    %197 = vector.broadcast %cst_116 : f32 to vector<32x128xf32>
    %198 = arith.addf %197, %194 : vector<32x128xf32>
    %199 = arith.mulf %196, %198 : vector<32x128xf32>
    %200 = arith.mulf %158, %199 : vector<32x128xf32>
    %c0_117 = arith.constant 0 : index
    %c0_118 = arith.constant 0 : index
    %c0_119 = arith.constant 0 : index
    %201 = vector.load %arg11[%c0_117, %c0_118, %c0_119] : memref<2x128x48xf32, #tpu.memory_space<vmem>>, vector<1x128x48xf32>
    %202 = vector.shape_cast %201 : vector<1x128x48xf32> to vector<128x48xf32>
    %cst_120 = arith.constant dense<0.000000e+00> : vector<32x48xf32>
    %203 = tpu.matmul %200, %202, %cst_120 {dimension_numbers = #tpu.dot_dimension_numbers<[1], [0], [0], [1], [0, 0, 1, 1], [], []>} : vector<32x128xf32>, vector<128x48xf32>, vector<32x48xf32> -> vector<32x48xf32>
    %204 = arith.addf %142, %203 : vector<32x48xf32>
    %c1_121 = arith.constant 1 : index
    %c0_122 = arith.constant 0 : index
    %c0_123 = arith.constant 0 : index
    %205 = vector.load %arg6[%c1_121, %c0_122, %c0_123] : memref<2x1x48xf32, #tpu.memory_space<vmem>>, vector<1x1x48xf32>
    %206 = vector.shape_cast %205 : vector<1x1x48xf32> to vector<1x48xf32>
    %207 = arith.mulf %204, %204 : vector<32x48xf32>
    %cst_124 = arith.constant dense<0.000000e+00> : vector<32xf32>
    %208 = vector.multi_reduction <add>, %207, %cst_124 [1] : vector<32x48xf32> to vector<32xf32>
    %209 = vector.shape_cast %208 : vector<32xf32> to vector<32x1xf32>
    %cst_125 = arith.constant 1.000000e-24 : f32
    %210 = vector.broadcast %cst_125 : f32 to vector<32x1xf32>
    %211 = arith.maximumf %209, %210 : vector<32x1xf32>
    %212 = math.rsqrt %211 : vector<32x1xf32>
    %213 = vector.broadcast %212 : vector<32x1xf32> to vector<32x48xf32>
    %214 = arith.mulf %204, %213 : vector<32x48xf32>
    %215 = vector.broadcast %206 : vector<1x48xf32> to vector<32x48xf32>
    %216 = arith.mulf %214, %215 : vector<32x48xf32>
    %cst_126 = arith.constant 0.000000e+00 : f32
    %217 = vector.broadcast %cst_126 : f32 to vector<32x48xf32>
    %c1_127 = arith.constant 1 : index
    %c0_128 = arith.constant 0 : index
    %c0_129 = arith.constant 0 : index
    %c0_130 = arith.constant 0 : index
    %218 = vector.load %arg7[%c1_127, %c0_128, %c0_129, %c0_130] : memref<2x10x48x24xf32, #tpu.memory_space<vmem>>, vector<1x1x48x24xf32>
    %219 = vector.shape_cast %218 : vector<1x1x48x24xf32> to vector<48x24xf32>
    %cst_131 = arith.constant dense<0.000000e+00> : vector<32x24xf32>
    %220 = tpu.matmul %216, %219, %cst_131 {dimension_numbers = #tpu.dot_dimension_numbers<[1], [0], [0], [1], [0, 0, 1, 1], [], []>} : vector<32x48xf32>, vector<48x24xf32>, vector<32x24xf32> -> vector<32x24xf32>
    %221 = arith.mulf %220, %49 : vector<32x24xf32>
    %c1_132 = arith.constant 1 : index
    %c1_133 = arith.constant 1 : index
    %c0_134 = arith.constant 0 : index
    %c0_135 = arith.constant 0 : index
    %222 = vector.load %arg7[%c1_132, %c1_133, %c0_134, %c0_135] : memref<2x10x48x24xf32, #tpu.memory_space<vmem>>, vector<1x1x48x24xf32>
    %223 = vector.shape_cast %222 : vector<1x1x48x24xf32> to vector<48x24xf32>
    %cst_136 = arith.constant dense<0.000000e+00> : vector<32x24xf32>
    %224 = tpu.matmul %216, %223, %cst_136 {dimension_numbers = #tpu.dot_dimension_numbers<[1], [0], [0], [1], [0, 0, 1, 1], [], []>} : vector<32x48xf32>, vector<48x24xf32>, vector<32x24xf32> -> vector<32x24xf32>
    %225 = arith.mulf %224, %50 : vector<32x24xf32>
    %226 = arith.addf %221, %225 : vector<32x24xf32>
    %c1_137 = arith.constant 1 : index
    %c2_138 = arith.constant 2 : index
    %c0_139 = arith.constant 0 : index
    %c0_140 = arith.constant 0 : index
    %227 = vector.load %arg7[%c1_137, %c2_138, %c0_139, %c0_140] : memref<2x10x48x24xf32, #tpu.memory_space<vmem>>, vector<1x1x48x24xf32>
    %228 = vector.shape_cast %227 : vector<1x1x48x24xf32> to vector<48x24xf32>
    %cst_141 = arith.constant dense<0.000000e+00> : vector<32x24xf32>
    %229 = tpu.matmul %216, %228, %cst_141 {dimension_numbers = #tpu.dot_dimension_numbers<[1], [0], [0], [1], [0, 0, 1, 1], [], []>} : vector<32x48xf32>, vector<48x24xf32>, vector<32x24xf32> -> vector<32x24xf32>
    %230 = arith.mulf %229, %49 : vector<32x24xf32>
    %c1_142 = arith.constant 1 : index
    %c3_143 = arith.constant 3 : index
    %c0_144 = arith.constant 0 : index
    %c0_145 = arith.constant 0 : index
    %231 = vector.load %arg7[%c1_142, %c3_143, %c0_144, %c0_145] : memref<2x10x48x24xf32, #tpu.memory_space<vmem>>, vector<1x1x48x24xf32>
    %232 = vector.shape_cast %231 : vector<1x1x48x24xf32> to vector<48x24xf32>
    %cst_146 = arith.constant dense<0.000000e+00> : vector<32x24xf32>
    %233 = tpu.matmul %216, %232, %cst_146 {dimension_numbers = #tpu.dot_dimension_numbers<[1], [0], [0], [1], [0, 0, 1, 1], [], []>} : vector<32x48xf32>, vector<48x24xf32>, vector<32x24xf32> -> vector<32x24xf32>
    %234 = arith.mulf %233, %50 : vector<32x24xf32>
    %235 = arith.addf %230, %234 : vector<32x24xf32>
    %c1_147 = arith.constant 1 : index
    %c4_148 = arith.constant 4 : index
    %c0_149 = arith.constant 0 : index
    %c0_150 = arith.constant 0 : index
    %236 = vector.load %arg7[%c1_147, %c4_148, %c0_149, %c0_150] : memref<2x10x48x24xf32, #tpu.memory_space<vmem>>, vector<1x1x48x24xf32>
    %237 = vector.shape_cast %236 : vector<1x1x48x24xf32> to vector<48x24xf32>
    %cst_151 = arith.constant dense<0.000000e+00> : vector<32x24xf32>
    %238 = tpu.matmul %216, %237, %cst_151 {dimension_numbers = #tpu.dot_dimension_numbers<[1], [0], [0], [1], [0, 0, 1, 1], [], []>} : vector<32x48xf32>, vector<48x24xf32>, vector<32x24xf32> -> vector<32x24xf32>
    %cst_152 = arith.constant dense<0.000000e+00> : vector<32x32xf32>
    %239 = tpu.matmul %226, %235, %cst_152 {dimension_numbers = #tpu.dot_dimension_numbers<[1], [1], [0], [0], [0, 0, 1, 0], [], []>} : vector<32x24xf32>, vector<32x24xf32>, vector<32x32xf32> -> vector<32x32xf32>
    %cst_153 = arith.constant -3.40282347E+38 : f32
    %240 = vector.broadcast %cst_153 : f32 to vector<32x32xf32>
    %241 = arith.select %48, %239, %240 : vector<32x32xi1>, vector<32x32xf32>
    %cst_154 = arith.constant dense<0xFF800000> : vector<32xf32>
    %242 = vector.multi_reduction <maximumf>, %241, %cst_154 [1] : vector<32x32xf32> to vector<32xf32>
    %243 = vector.shape_cast %242 : vector<32xf32> to vector<32x1xf32>
    %244 = vector.broadcast %243 : vector<32x1xf32> to vector<32x32xf32>
    %245 = arith.subf %241, %244 : vector<32x32xf32>
    %246 = math.exp %245 : vector<32x32xf32>
    %cst_155 = arith.constant dense<0.000000e+00> : vector<32xf32>
    %247 = vector.multi_reduction <add>, %246, %cst_155 [1] : vector<32x32xf32> to vector<32xf32>
    %248 = vector.shape_cast %247 : vector<32xf32> to vector<32x1xf32>
    %249 = tpu.reciprocal %248 {approx = true} : vector<32x1xf32> -> vector<32x1xf32>
    %250 = vector.broadcast %249 : vector<32x1xf32> to vector<32x32xf32>
    %251 = arith.mulf %246, %250 : vector<32x32xf32>
    %cst_156 = arith.constant dense<0.000000e+00> : vector<32x24xf32>
    %252 = tpu.matmul %251, %238, %cst_156 {dimension_numbers = #tpu.dot_dimension_numbers<[1], [0], [0], [1], [0, 0, 1, 1], [], []>} : vector<32x32xf32>, vector<32x24xf32>, vector<32x24xf32> -> vector<32x24xf32>
    %c1_157 = arith.constant 1 : index
    %c0_158 = arith.constant 0 : index
    %c0_159 = arith.constant 0 : index
    %c0_160 = arith.constant 0 : index
    %253 = vector.load %arg8[%c1_157, %c0_158, %c0_159, %c0_160] : memref<2x2x24x48xf32, #tpu.memory_space<vmem>>, vector<1x1x24x48xf32>
    %254 = vector.shape_cast %253 : vector<1x1x24x48xf32> to vector<24x48xf32>
    %cst_161 = arith.constant dense<0.000000e+00> : vector<32x48xf32>
    %255 = tpu.matmul %252, %254, %cst_161 {dimension_numbers = #tpu.dot_dimension_numbers<[1], [0], [0], [1], [0, 0, 1, 1], [], []>} : vector<32x24xf32>, vector<24x48xf32>, vector<32x48xf32> -> vector<32x48xf32>
    %256 = arith.addf %217, %255 : vector<32x48xf32>
    %c1_162 = arith.constant 1 : index
    %c5_163 = arith.constant 5 : index
    %c0_164 = arith.constant 0 : index
    %c0_165 = arith.constant 0 : index
    %257 = vector.load %arg7[%c1_162, %c5_163, %c0_164, %c0_165] : memref<2x10x48x24xf32, #tpu.memory_space<vmem>>, vector<1x1x48x24xf32>
    %258 = vector.shape_cast %257 : vector<1x1x48x24xf32> to vector<48x24xf32>
    %cst_166 = arith.constant dense<0.000000e+00> : vector<32x24xf32>
    %259 = tpu.matmul %216, %258, %cst_166 {dimension_numbers = #tpu.dot_dimension_numbers<[1], [0], [0], [1], [0, 0, 1, 1], [], []>} : vector<32x48xf32>, vector<48x24xf32>, vector<32x24xf32> -> vector<32x24xf32>
    %260 = arith.mulf %259, %49 : vector<32x24xf32>
    %c1_167 = arith.constant 1 : index
    %c6_168 = arith.constant 6 : index
    %c0_169 = arith.constant 0 : index
    %c0_170 = arith.constant 0 : index
    %261 = vector.load %arg7[%c1_167, %c6_168, %c0_169, %c0_170] : memref<2x10x48x24xf32, #tpu.memory_space<vmem>>, vector<1x1x48x24xf32>
    %262 = vector.shape_cast %261 : vector<1x1x48x24xf32> to vector<48x24xf32>
    %cst_171 = arith.constant dense<0.000000e+00> : vector<32x24xf32>
    %263 = tpu.matmul %216, %262, %cst_171 {dimension_numbers = #tpu.dot_dimension_numbers<[1], [0], [0], [1], [0, 0, 1, 1], [], []>} : vector<32x48xf32>, vector<48x24xf32>, vector<32x24xf32> -> vector<32x24xf32>
    %264 = arith.mulf %263, %50 : vector<32x24xf32>
    %265 = arith.addf %260, %264 : vector<32x24xf32>
    %c1_172 = arith.constant 1 : index
    %c7_173 = arith.constant 7 : index
    %c0_174 = arith.constant 0 : index
    %c0_175 = arith.constant 0 : index
    %266 = vector.load %arg7[%c1_172, %c7_173, %c0_174, %c0_175] : memref<2x10x48x24xf32, #tpu.memory_space<vmem>>, vector<1x1x48x24xf32>
    %267 = vector.shape_cast %266 : vector<1x1x48x24xf32> to vector<48x24xf32>
    %cst_176 = arith.constant dense<0.000000e+00> : vector<32x24xf32>
    %268 = tpu.matmul %216, %267, %cst_176 {dimension_numbers = #tpu.dot_dimension_numbers<[1], [0], [0], [1], [0, 0, 1, 1], [], []>} : vector<32x48xf32>, vector<48x24xf32>, vector<32x24xf32> -> vector<32x24xf32>
    %269 = arith.mulf %268, %49 : vector<32x24xf32>
    %c1_177 = arith.constant 1 : index
    %c8_178 = arith.constant 8 : index
    %c0_179 = arith.constant 0 : index
    %c0_180 = arith.constant 0 : index
    %270 = vector.load %arg7[%c1_177, %c8_178, %c0_179, %c0_180] : memref<2x10x48x24xf32, #tpu.memory_space<vmem>>, vector<1x1x48x24xf32>
    %271 = vector.shape_cast %270 : vector<1x1x48x24xf32> to vector<48x24xf32>
    %cst_181 = arith.constant dense<0.000000e+00> : vector<32x24xf32>
    %272 = tpu.matmul %216, %271, %cst_181 {dimension_numbers = #tpu.dot_dimension_numbers<[1], [0], [0], [1], [0, 0, 1, 1], [], []>} : vector<32x48xf32>, vector<48x24xf32>, vector<32x24xf32> -> vector<32x24xf32>
    %273 = arith.mulf %272, %50 : vector<32x24xf32>
    %274 = arith.addf %269, %273 : vector<32x24xf32>
    %c1_182 = arith.constant 1 : index
    %c9_183 = arith.constant 9 : index
    %c0_184 = arith.constant 0 : index
    %c0_185 = arith.constant 0 : index
    %275 = vector.load %arg7[%c1_182, %c9_183, %c0_184, %c0_185] : memref<2x10x48x24xf32, #tpu.memory_space<vmem>>, vector<1x1x48x24xf32>
    %276 = vector.shape_cast %275 : vector<1x1x48x24xf32> to vector<48x24xf32>
    %cst_186 = arith.constant dense<0.000000e+00> : vector<32x24xf32>
    %277 = tpu.matmul %216, %276, %cst_186 {dimension_numbers = #tpu.dot_dimension_numbers<[1], [0], [0], [1], [0, 0, 1, 1], [], []>} : vector<32x48xf32>, vector<48x24xf32>, vector<32x24xf32> -> vector<32x24xf32>
    %cst_187 = arith.constant dense<0.000000e+00> : vector<32x32xf32>
    %278 = tpu.matmul %265, %274, %cst_187 {dimension_numbers = #tpu.dot_dimension_numbers<[1], [1], [0], [0], [0, 0, 1, 0], [], []>} : vector<32x24xf32>, vector<32x24xf32>, vector<32x32xf32> -> vector<32x32xf32>
    %cst_188 = arith.constant -3.40282347E+38 : f32
    %279 = vector.broadcast %cst_188 : f32 to vector<32x32xf32>
    %280 = arith.select %48, %278, %279 : vector<32x32xi1>, vector<32x32xf32>
    %cst_189 = arith.constant dense<0xFF800000> : vector<32xf32>
    %281 = vector.multi_reduction <maximumf>, %280, %cst_189 [1] : vector<32x32xf32> to vector<32xf32>
    %282 = vector.shape_cast %281 : vector<32xf32> to vector<32x1xf32>
    %283 = vector.broadcast %282 : vector<32x1xf32> to vector<32x32xf32>
    %284 = arith.subf %280, %283 : vector<32x32xf32>
    %285 = math.exp %284 : vector<32x32xf32>
    %cst_190 = arith.constant dense<0.000000e+00> : vector<32xf32>
    %286 = vector.multi_reduction <add>, %285, %cst_190 [1] : vector<32x32xf32> to vector<32xf32>
    %287 = vector.shape_cast %286 : vector<32xf32> to vector<32x1xf32>
    %288 = tpu.reciprocal %287 {approx = true} : vector<32x1xf32> -> vector<32x1xf32>
    %289 = vector.broadcast %288 : vector<32x1xf32> to vector<32x32xf32>
    %290 = arith.mulf %285, %289 : vector<32x32xf32>
    %cst_191 = arith.constant dense<0.000000e+00> : vector<32x24xf32>
    %291 = tpu.matmul %290, %277, %cst_191 {dimension_numbers = #tpu.dot_dimension_numbers<[1], [0], [0], [1], [0, 0, 1, 1], [], []>} : vector<32x32xf32>, vector<32x24xf32>, vector<32x24xf32> -> vector<32x24xf32>
    %c1_192 = arith.constant 1 : index
    %c1_193 = arith.constant 1 : index
    %c0_194 = arith.constant 0 : index
    %c0_195 = arith.constant 0 : index
    %292 = vector.load %arg8[%c1_192, %c1_193, %c0_194, %c0_195] : memref<2x2x24x48xf32, #tpu.memory_space<vmem>>, vector<1x1x24x48xf32>
    %293 = vector.shape_cast %292 : vector<1x1x24x48xf32> to vector<24x48xf32>
    %cst_196 = arith.constant dense<0.000000e+00> : vector<32x48xf32>
    %294 = tpu.matmul %291, %293, %cst_196 {dimension_numbers = #tpu.dot_dimension_numbers<[1], [0], [0], [1], [0, 0, 1, 1], [], []>} : vector<32x24xf32>, vector<24x48xf32>, vector<32x48xf32> -> vector<32x48xf32>
    %295 = arith.addf %256, %294 : vector<32x48xf32>
    %296 = arith.addf %204, %295 : vector<32x48xf32>
    %c1_197 = arith.constant 1 : index
    %c0_198 = arith.constant 0 : index
    %c0_199 = arith.constant 0 : index
    %297 = vector.load %arg9[%c1_197, %c0_198, %c0_199] : memref<2x1x48xf32, #tpu.memory_space<vmem>>, vector<1x1x48xf32>
    %298 = vector.shape_cast %297 : vector<1x1x48xf32> to vector<1x48xf32>
    %299 = arith.mulf %296, %296 : vector<32x48xf32>
    %cst_200 = arith.constant dense<0.000000e+00> : vector<32xf32>
    %300 = vector.multi_reduction <add>, %299, %cst_200 [1] : vector<32x48xf32> to vector<32xf32>
    %301 = vector.shape_cast %300 : vector<32xf32> to vector<32x1xf32>
    %cst_201 = arith.constant 1.000000e-24 : f32
    %302 = vector.broadcast %cst_201 : f32 to vector<32x1xf32>
    %303 = arith.maximumf %301, %302 : vector<32x1xf32>
    %304 = math.rsqrt %303 : vector<32x1xf32>
    %305 = vector.broadcast %304 : vector<32x1xf32> to vector<32x48xf32>
    %306 = arith.mulf %296, %305 : vector<32x48xf32>
    %307 = vector.broadcast %298 : vector<1x48xf32> to vector<32x48xf32>
    %308 = arith.mulf %306, %307 : vector<32x48xf32>
    %c1_202 = arith.constant 1 : index
    %c0_203 = arith.constant 0 : index
    %c0_204 = arith.constant 0 : index
    %309 = vector.load %arg10[%c1_202, %c0_203, %c0_204] : memref<2x48x256xf32, #tpu.memory_space<vmem>>, vector<1x48x256xf32>
    %310 = vector.shape_cast %309 : vector<1x48x256xf32> to vector<48x256xf32>
    %cst_205 = arith.constant dense<0.000000e+00> : vector<32x256xf32>
    %311 = tpu.matmul %308, %310, %cst_205 {dimension_numbers = #tpu.dot_dimension_numbers<[1], [0], [0], [1], [0, 0, 1, 1], [], []>} : vector<32x48xf32>, vector<48x256xf32>, vector<32x256xf32> -> vector<32x256xf32>
    %312 = vector.extract_strided_slice %311 {offsets = [0, 0], sizes = [32, 128], strides = [1, 1]} : vector<32x256xf32> to vector<32x128xf32>
    %313 = vector.extract_strided_slice %311 {offsets = [0, 128], sizes = [32, 128], strides = [1, 1]} : vector<32x256xf32> to vector<32x128xf32>
    %cst_206 = arith.constant 0.707106769 : f32
    %314 = vector.broadcast %cst_206 : f32 to vector<32x128xf32>
    %315 = arith.mulf %313, %314 : vector<32x128xf32>
    %316 = math.absf %315 : vector<32x128xf32>
    %cst_207 = arith.constant 0.327591091 : f32
    %317 = vector.broadcast %cst_207 : f32 to vector<32x128xf32>
    %318 = arith.mulf %317, %316 : vector<32x128xf32>
    %cst_208 = arith.constant 1.000000e+00 : f32
    %319 = vector.broadcast %cst_208 : f32 to vector<32x128xf32>
    %320 = arith.addf %319, %318 : vector<32x128xf32>
    %cst_209 = arith.constant 1.000000e+00 : f32
    %321 = vector.broadcast %cst_209 : f32 to vector<32x128xf32>
    %322 = arith.divf %321, %320 : vector<32x128xf32>
    %cst_210 = arith.constant 1.06140542 : f32
    %323 = vector.broadcast %cst_210 : f32 to vector<32x128xf32>
    %324 = arith.mulf %323, %322 : vector<32x128xf32>
    %cst_211 = arith.constant 1.45315206 : f32
    %325 = vector.broadcast %cst_211 : f32 to vector<32x128xf32>
    %326 = arith.subf %324, %325 : vector<32x128xf32>
    %327 = arith.mulf %326, %322 : vector<32x128xf32>
    %cst_212 = arith.constant 1.42141378 : f32
    %328 = vector.broadcast %cst_212 : f32 to vector<32x128xf32>
    %329 = arith.addf %327, %328 : vector<32x128xf32>
    %330 = arith.mulf %329, %322 : vector<32x128xf32>
    %cst_213 = arith.constant 0.284496725 : f32
    %331 = vector.broadcast %cst_213 : f32 to vector<32x128xf32>
    %332 = arith.subf %330, %331 : vector<32x128xf32>
    %333 = arith.mulf %332, %322 : vector<32x128xf32>
    %cst_214 = arith.constant 0.254829586 : f32
    %334 = vector.broadcast %cst_214 : f32 to vector<32x128xf32>
    %335 = arith.addf %333, %334 : vector<32x128xf32>
    %336 = arith.mulf %335, %322 : vector<32x128xf32>
    %cst_215 = arith.constant 0.000000e+00 : f32
    %337 = vector.broadcast %cst_215 : f32 to vector<32x128xf32>
    %338 = arith.subf %337, %316 : vector<32x128xf32>
    %339 = arith.mulf %338, %316 : vector<32x128xf32>
    %340 = math.exp %339 : vector<32x128xf32>
    %341 = arith.mulf %336, %340 : vector<32x128xf32>
    %cst_216 = arith.constant 1.000000e+00 : f32
    %342 = vector.broadcast %cst_216 : f32 to vector<32x128xf32>
    %343 = arith.subf %342, %341 : vector<32x128xf32>
    %cst_217 = arith.constant 0.000000e+00 : f32
    %344 = vector.broadcast %cst_217 : f32 to vector<32x128xf32>
    %345 = arith.cmpf oge, %315, %344 : vector<32x128xf32>
    %cst_218 = arith.constant 0.000000e+00 : f32
    %346 = vector.broadcast %cst_218 : f32 to vector<32x128xf32>
    %347 = arith.subf %346, %343 : vector<32x128xf32>
    %348 = arith.select %345, %343, %347 : vector<32x128xi1>, vector<32x128xf32>
    %cst_219 = arith.constant 5.000000e-01 : f32
    %349 = vector.broadcast %cst_219 : f32 to vector<32x128xf32>
    %350 = arith.mulf %349, %313 : vector<32x128xf32>
    %cst_220 = arith.constant 1.000000e+00 : f32
    %351 = vector.broadcast %cst_220 : f32 to vector<32x128xf32>
    %352 = arith.addf %351, %348 : vector<32x128xf32>
    %353 = arith.mulf %350, %352 : vector<32x128xf32>
    %354 = arith.mulf %312, %353 : vector<32x128xf32>
    %c1_221 = arith.constant 1 : index
    %c0_222 = arith.constant 0 : index
    %c0_223 = arith.constant 0 : index
    %355 = vector.load %arg11[%c1_221, %c0_222, %c0_223] : memref<2x128x48xf32, #tpu.memory_space<vmem>>, vector<1x128x48xf32>
    %356 = vector.shape_cast %355 : vector<1x128x48xf32> to vector<128x48xf32>
    %cst_224 = arith.constant dense<0.000000e+00> : vector<32x48xf32>
    %357 = tpu.matmul %354, %356, %cst_224 {dimension_numbers = #tpu.dot_dimension_numbers<[1], [0], [0], [1], [0, 0, 1, 1], [], []>} : vector<32x128xf32>, vector<128x48xf32>, vector<32x48xf32> -> vector<32x48xf32>
    %358 = arith.addf %296, %357 : vector<32x48xf32>
    %359 = vector.extract_strided_slice %358 {offsets = [12, 0], sizes = [4, 48], strides = [1, 1]} : vector<32x48xf32> to vector<4x48xf32>
    %c0_225 = arith.constant 0 : index
    %c0_226 = arith.constant 0 : index
    %c0_227 = arith.constant 0 : index
    %360 = vector.load %arg14[%c0_225, %c0_226, %c0_227] : memref<2x4x48xf32, #tpu.memory_space<vmem>>, vector<1x4x48xf32>
    %361 = vector.shape_cast %360 : vector<1x4x48xf32> to vector<4x48xf32>
    %362 = vector.shape_cast %359 : vector<4x48xf32> to vector<1x4x48xf32>
    tpu.vector_store %arg14[%c0_225, %c0_226, %c0_227], %362 {strides = array<i32>} : memref<2x4x48xf32, #tpu.memory_space<vmem>>, vector<1x4x48xf32>,
    %363 = vector.extract_strided_slice %358 {offsets = [28, 0], sizes = [4, 48], strides = [1, 1]} : vector<32x48xf32> to vector<4x48xf32>
    %c1_228 = arith.constant 1 : index
    %c0_229 = arith.constant 0 : index
    %c0_230 = arith.constant 0 : index
    %364 = vector.load %arg14[%c1_228, %c0_229, %c0_230] : memref<2x4x48xf32, #tpu.memory_space<vmem>>, vector<1x4x48xf32>
    %365 = vector.shape_cast %364 : vector<1x4x48xf32> to vector<4x48xf32>
    %366 = vector.shape_cast %363 : vector<4x48xf32> to vector<1x4x48xf32>
    tpu.vector_store %arg14[%c1_228, %c0_229, %c0_230], %366 {strides = array<i32>} : memref<2x4x48xf32, #tpu.memory_space<vmem>>, vector<1x4x48xf32>,
    %c1_i32 = arith.constant 1 : i32
    %367 = arith.cmpi eq, %arg0, %c1_i32 : i32
    %368 = arith.extui %367 : i1 to i32
    %c0_i32_231 = arith.constant 0 : i32
    %369 = arith.cmpi ne, %368, %c0_i32_231 : i32
    scf.if %369 {
      %c0_232 = arith.constant 0 : index
      %c0_233 = arith.constant 0 : index
      %370 = vector.load %arg12[%c0_232, %c0_233] : memref<1x48xf32, #tpu.memory_space<vmem>>, vector<1x48xf32>
      %371 = vector.extract_strided_slice %358 {offsets = [4, 0], sizes = [8, 48], strides = [1, 1]} : vector<32x48xf32> to vector<8x48xf32>
      %372 = arith.mulf %371, %371 : vector<8x48xf32>
      %cst_234 = arith.constant dense<0.000000e+00> : vector<8xf32>
      %373 = vector.multi_reduction <add>, %372, %cst_234 [1] : vector<8x48xf32> to vector<8xf32>
      %374 = vector.shape_cast %373 : vector<8xf32> to vector<8x1xf32>
      %cst_235 = arith.constant 1.000000e-24 : f32
      %375 = vector.broadcast %cst_235 : f32 to vector<8x1xf32>
      %376 = arith.maximumf %374, %375 : vector<8x1xf32>
      %377 = math.rsqrt %376 : vector<8x1xf32>
      %378 = vector.broadcast %377 : vector<8x1xf32> to vector<8x48xf32>
      %379 = arith.mulf %371, %378 : vector<8x48xf32>
      %380 = vector.broadcast %370 : vector<1x48xf32> to vector<8x48xf32>
      %381 = arith.mulf %379, %380 : vector<8x48xf32>
      %c0_236 = arith.constant 0 : index
      %c0_237 = arith.constant 0 : index
      %c0_238 = arith.constant 0 : index
      %382 = vector.load %arg13[%c0_236, %c0_237, %c0_238] : memref<2x8x48xf32, #tpu.memory_space<vmem>>, vector<1x8x48xf32>
      %383 = vector.shape_cast %382 : vector<1x8x48xf32> to vector<8x48xf32>
      %384 = vector.shape_cast %381 : vector<8x48xf32> to vector<1x8x48xf32>
      tpu.vector_store %arg13[%c0_236, %c0_237, %c0_238], %384 {strides = array<i32>} : memref<2x8x48xf32, #tpu.memory_space<vmem>>, vector<1x8x48xf32>,
      %385 = vector.extract_strided_slice %358 {offsets = [20, 0], sizes = [8, 48], strides = [1, 1]} : vector<32x48xf32> to vector<8x48xf32>
      %386 = arith.mulf %385, %385 : vector<8x48xf32>
      %cst_239 = arith.constant dense<0.000000e+00> : vector<8xf32>
      %387 = vector.multi_reduction <add>, %386, %cst_239 [1] : vector<8x48xf32> to vector<8xf32>
      %388 = vector.shape_cast %387 : vector<8xf32> to vector<8x1xf32>
      %cst_240 = arith.constant 1.000000e-24 : f32
      %389 = vector.broadcast %cst_240 : f32 to vector<8x1xf32>
      %390 = arith.maximumf %388, %389 : vector<8x1xf32>
      %391 = math.rsqrt %390 : vector<8x1xf32>
      %392 = vector.broadcast %391 : vector<8x1xf32> to vector<8x48xf32>
      %393 = arith.mulf %385, %392 : vector<8x48xf32>
      %394 = vector.broadcast %370 : vector<1x48xf32> to vector<8x48xf32>
      %395 = arith.mulf %393, %394 : vector<8x48xf32>
      %c1_241 = arith.constant 1 : index
      %c0_242 = arith.constant 0 : index
      %c0_243 = arith.constant 0 : index
      %396 = vector.load %arg13[%c1_241, %c0_242, %c0_243] : memref<2x8x48xf32, #tpu.memory_space<vmem>>, vector<1x8x48xf32>
      %397 = vector.shape_cast %396 : vector<1x8x48xf32> to vector<8x48xf32>
      %398 = vector.shape_cast %395 : vector<8x48xf32> to vector<1x8x48xf32>
      tpu.vector_store %arg13[%c1_241, %c0_242, %c0_243], %398 {strides = array<i32>} : memref<2x8x48xf32, #tpu.memory_space<vmem>>, vector<1x8x48xf32>,
    } else {
    }
    return
  }
  func.func @transform_0(%arg0: i32) -> (i32, i32, i32) {
    %c0_i32 = arith.constant 0 : i32
    %c0_i32_0 = arith.constant 0 : i32
    %c0_i32_1 = arith.constant 0 : i32
    return %c0_i32, %arg0, %c0_i32_0 : i32, i32, i32
  }
  func.func @transform_1(%arg0: i32) -> (i32, i32) {
    %c0_i32 = arith.constant 0 : i32
    %c0_i32_0 = arith.constant 0 : i32
    %c0_i32_1 = arith.constant 0 : i32
    return %c0_i32, %c0_i32_0 : i32, i32
  }
  func.func @transform_2(%arg0: i32) -> (i32, i32) {
    %c0_i32 = arith.constant 0 : i32
    %c0_i32_0 = arith.constant 0 : i32
    %c0_i32_1 = arith.constant 0 : i32
    return %c0_i32, %c0_i32_0 : i32, i32
  }
  func.func @transform_3(%arg0: i32) -> (i32, i32) {
    %c0_i32 = arith.constant 0 : i32
    %c0_i32_0 = arith.constant 0 : i32
    %c0_i32_1 = arith.constant 0 : i32
    return %c0_i32, %c0_i32_0 : i32, i32
  }
  func.func @transform_4(%arg0: i32) -> (i32, i32) {
    %c0_i32 = arith.constant 0 : i32
    %c0_i32_0 = arith.constant 0 : i32
    %c0_i32_1 = arith.constant 0 : i32
    return %c0_i32, %c0_i32_0 : i32, i32
  }
  func.func @transform_5(%arg0: i32) -> (i32, i32, i32) {
    %c0_i32 = arith.constant 0 : i32
    %c0_i32_0 = arith.constant 0 : i32
    %c0_i32_1 = arith.constant 0 : i32
    %c0_i32_2 = arith.constant 0 : i32
    return %c0_i32, %c0_i32_0, %c0_i32_1 : i32, i32, i32
  }
  func.func @transform_6(%arg0: i32) -> (i32, i32, i32, i32) {
    %c0_i32 = arith.constant 0 : i32
    %c0_i32_0 = arith.constant 0 : i32
    %c0_i32_1 = arith.constant 0 : i32
    %c0_i32_2 = arith.constant 0 : i32
    %c0_i32_3 = arith.constant 0 : i32
    return %c0_i32, %c0_i32_0, %c0_i32_1, %c0_i32_2 : i32, i32, i32, i32
  }
  func.func @transform_7(%arg0: i32) -> (i32, i32, i32, i32) {
    %c0_i32 = arith.constant 0 : i32
    %c0_i32_0 = arith.constant 0 : i32
    %c0_i32_1 = arith.constant 0 : i32
    %c0_i32_2 = arith.constant 0 : i32
    %c0_i32_3 = arith.constant 0 : i32
    return %c0_i32, %c0_i32_0, %c0_i32_1, %c0_i32_2 : i32, i32, i32, i32
  }
  func.func @transform_8(%arg0: i32) -> (i32, i32, i32) {
    %c0_i32 = arith.constant 0 : i32
    %c0_i32_0 = arith.constant 0 : i32
    %c0_i32_1 = arith.constant 0 : i32
    %c0_i32_2 = arith.constant 0 : i32
    return %c0_i32, %c0_i32_0, %c0_i32_1 : i32, i32, i32
  }
  func.func @transform_9(%arg0: i32) -> (i32, i32, i32) {
    %c0_i32 = arith.constant 0 : i32
    %c0_i32_0 = arith.constant 0 : i32
    %c0_i32_1 = arith.constant 0 : i32
    %c0_i32_2 = arith.constant 0 : i32
    return %c0_i32, %c0_i32_0, %c0_i32_1 : i32, i32, i32
  }
  func.func @transform_10(%arg0: i32) -> (i32, i32, i32) {
    %c0_i32 = arith.constant 0 : i32
    %c0_i32_0 = arith.constant 0 : i32
    %c0_i32_1 = arith.constant 0 : i32
    %c0_i32_2 = arith.constant 0 : i32
    return %c0_i32, %c0_i32_0, %c0_i32_1 : i32, i32, i32
  }
  func.func @transform_11(%arg0: i32) -> (i32, i32) {
    %c0_i32 = arith.constant 0 : i32
    %c0_i32_0 = arith.constant 0 : i32
    %c0_i32_1 = arith.constant 0 : i32
    return %c0_i32, %c0_i32_0 : i32, i32
  }
  func.func @transform_12(%arg0: i32) -> (i32, i32, i32) {
    %c0_i32 = arith.constant 0 : i32
    %c0_i32_0 = arith.constant 0 : i32
    %c0_i32_1 = arith.constant 0 : i32
    %c0_i32_2 = arith.constant 0 : i32
    return %c0_i32, %c0_i32_0, %c0_i32_1 : i32, i32, i32
  }
}

</mosaic_0001>

<bundles_post_ra>
// kernel: _wrapper_forward_impl.1
= control target key start
LH: loop header
LB: loop body
LE: loop exit
PB: predicated region body
PF: predicated region fallthrough
CT: control target
= control target key end

     0   :  { %17 = vsyncpa [#allocation5], 0  ;;  %s6437_s21 = smov 0   ;;  %s6439_s22 = smov 0   ;;  %s7837_s0 = inlined_call_operand.vmem [shape: f32[2,16,48], index: 0, kind: input, shape index: {}]   ;;  %s7838_s1 = inlined_call_operand.vmem [shape: f32[1,48], index: 1, kind: input, shape index: {}]   ;;  %s7839_s2 = inlined_call_operand.vmem [shape: f32[4,48], index: 2, kind: input, shape index: {}]   ;;  %s7840_s3 = inlined_call_operand.vmem [shape: f32[32,24], index: 3, kind: input, shape index: {}]   ;;  %s7841_s4 = inlined_call_operand.vmem [shape: f32[32,24], index: 4, kind: input, shape index: {}]   ;;  %s7842_s5 = inlined_call_operand.vmem [shape: f32[2,1,48], index: 5, kind: input, shape index: {}]   ;;  %s7843_s6 = inlined_call_operand.vmem [shape: f32[2,10,48,24], index: 6, kind: input, shape index: {}]   ;;  %s7844_s7 = inlined_call_operand.vmem [shape: f32[2,2,24,48], index: 7, kind: input, shape index: {}]   ;;  %s7845_s8 = inlined_call_operand.vmem [shape: f32[2,1,48], index: 8, kind: input, shape index: {}]   ;;  %s7846_s9 = inlined_call_operand.vmem [shape: f32[2,48,256], index: 9, kind: input, shape index: {}]   ;;  %s7847_s10 = inlined_call_operand.vmem [shape: f32[2,128,48], index: 10, kind: input, shape index: {}]   ;;  %s7848_s11 = inlined_call_operand.vmem [shape: f32[1,48], index: 11, kind: input, shape index: {}]   ;;  %s7849_s12 = inlined_call_operand.hbm [shape: f32[2,8,48], index: 12, kind: output, shape index: {}]  }
   0x1   :  { %s6441_s23 = smov 0  }
   0x2 LB: > { %s6450_s24 = sadd.s32 4294967295, %s6365_s23   ;;  %s6452_s25 = sadd.s32 1, %s6365_s23   ;;  %s6365_s23 = sphi %s6441_s23, %s7993_s23   ;;  %s6361_s22 = sphi %s6439_s22, %s7992_s22   ;;  %s6357_s21 = sphi %s6437_s21, %s7991_s21  }
   0x3   : > { %s27_s26 = ssub.s32 %s6365_s23, %s6452_s25  ;;  %s30_s27 = sadd.s32 1, %s6361_s22 }
   0x4   : > { %p28_p0 = scmp.eq.s32.totalorder %s27_s26, 0  ;;  %p37_p1 = scmp.ne.s32.totalorder %s6361_s22, %s6357_s21 }
   0x5   : > { %p38_p2 = scmp.eq.s32.totalorder %s6365_s23, 0  ;;  %p4869_p4 = scmp.ge.s32.totalorder %s6365_s23, 2 }
   0x6   : > { %s6459_s28 = scalar_select %p28_p0, %s6361_s22, %s30_s27  }
   0x7   : > { %p39_p3 = por %p38_p2, %p37_p1  ;;  %348 = sbr.rel (%p4869_p4) target bundleno = 17 (0x11), region = 60 }
   0xc   : > { %351 = sbr.rel (!%p39_p3) target bundleno = 17 (0x11), region = 64  ;;  %s353_s29 = sand.u32 (%p39_p3), 1, %s6361_s22  }
   0xd   : > { %s4871_s30 = sshll.u32 (%p39_p3), %s6365_s23, 3  ;;  %s4870_s13 = sshll.u32 (%p39_p3), %s353_s29, 4 }
   0xe   : > { %s357_s16 = scalar_lea.vmem (%p39_p3), %s7837_s0, %s4871_s30  ;;  %s355_s17 = scalar_lea.vmem (%p39_p3), [#allocation3], %s4870_s13 }
   0xf   : > { %v388_v0 = vld [vmem:[%s357_s16] sm:$0xff] (%p39_p3)  ;;  %v390_v1 = vld [vmem:[%s357_s16 + $0x10] sm:$0xff] (%p39_p3) }
  0x10   : > { %389 = vst [vmem:[%s355_s17] sm:$0xff] (%p39_p3), %v388_v0  ;;  %391 = vst [vmem:[%s355_s17 + $0x8] sm:$0xff] (%p39_p3), %v390_v1 }
  0x11 PF: > { %p4872_p5 = scmp.ge.s32.totalorder %s6365_s23, 1  ;;  %p396_p6 = scmp.lt.s32.totalorder %s6365_s23, 3 }
  0x13   : > { %p397_p7 = pnand %p4872_p5, %p396_p6 }
  0x14   : > { %s403_s18 = sand.u32 (!%p397_p7), 1, %s6357_s21   ;;  %p4874_p8 = scmp.ne.s32.totalorder (!%p397_p7), %s6450_s24, 0 }
  0x15   : > { %400 = sbr.rel (%p397_p7) target bundleno = 5566 (0x15be), region = 102  ;;  %s4873_s19 = sshll.u32 (!%p397_p7), %s403_s18, 4 }
  0x16   : > { %s405_s20 = scalar_lea.vmem (!%p397_p7), [#allocation3], %s4873_s19 }
  0x1a   : > { %442 = sbr.rel (%p4874_p8) target bundleno = 33 (0x21), region = 110 }
  0x1f   : > { %vm443_vm0 = vcmask 388096   ;;  %v6367_v2 = vmov 0.0  }
  0x20   : > { %444 = vst.msk [vmem:[#allocation2] sm:$0xf] %vm443_vm0, %v6367_v2  ;;  %445 = vst.msk [vmem:[#allocation2 + $0x4] sm:$0xf] %vm443_vm0, %v6367_v2 }
  0x21 PF: > { %v4875_v3 = vld [vmem:[%s7838_s1] ss:$0 sm:$0xff]  ;;  %v456_v5 = vld [vmem:[%s405_s20] sm:$0xff]  ;;  %vm471_vm1 = vcmask 1043456   ;;  %vm7851_vm2 = vcmask 392192   ;;  %v4886_v29 = vld [vmem:[%s7843_s6 + $0x50] sm:$0xff] }
  0x22   : > { %v463_v7 = vrot.slane %v456_v5, 4  ;;  %v4876_v9 = vld [vmem:[%s405_s20 + $0x8] sm:$0xff]  ;;  %v597_v26 = vld [vmem:[%s7843_s6 + $0x28] sm:$0xff]  ;;  %v4887_v27 = vld [vmem:[%s7843_s6 + $0x58] sm:$0xff]  ;;  %vm7850_vm3 = vcmask 195584   ;;  %p535_p9 = scmp.gt.s32.totalorder %s6450_s24, 0 }
  0x23   : > { %v469_v11 = vrot.slane %v4876_v9, 4  ;;  %v447_v12 = vld [vmem:[%s7839_s2] sm:$0xf]  ;;  %5540 = vmatprep.subr.mxu0 %v597_v26  ;;  %5558 = vmatprep.subr.mxu1 %v4887_v27  ;;  %v595_v30 = vld [vmem:[%s7843_s6 + $0x18] sm:$0xff]  ;;  %v4885_v31 = vld [vmem:[%s7843_s6 + $0x48] sm:$0xff]  ;;  %p5202_p10 = scmp.ne.s32.totalorder %s6450_s24, 1 }
  0x24   : > { %v466_v14 = vrot.slane %v447_v12, 4  ;;  %5541 = vmatpush3.msra.mxu0 %v597_v26  ;;  %5559 = vmatpush3.msra.mxu1 %v4887_v27  ;;  %v596_v28 = vld [vmem:[%s7843_s6 + $0x20] sm:$0xff]  ;;  %v594_v32 = vld [vmem:[%s7843_s6 + $0x10] sm:$0xff]  ;;  %v593_v34 = vld [vmem:[%s7843_s6 + $0x8] sm:$0xff]  ;;  %s536_s13 = scalar_select %p535_p9, 1, 0 }
  0x25   : > { %5542 = vmatprep.subr.mxu0 %v596_v28  ;;  %5560 = vmatprep.subr.mxu1 %v4886_v29  ;;  %v4884_v33 = vld [vmem:[%s7843_s6 + $0x40] sm:$0xff]  ;;  %v4883_v35 = vld [vmem:[%s7843_s6 + $0x38] sm:$0xff]  ;;  %v4882_v37 = vld [vmem:[%s7843_s6 + $0x30] sm:$0xff] }
  0x26   : > { %v6481_v18 = vsel %vm471_vm1, %v463_v7, %v466_v14  ;;  %v6483_v19 = vsel %vm471_vm1, %v469_v11, %v466_v14  ;;  %5543 = vmatpush3.msra.mxu0 %v596_v28  ;;  %5561 = vmatpush3.msra.mxu1 %v4886_v29  ;;  %v592_v36 = vld [vmem:[%s7843_s6] sm:$0xff]  ;;  %v4897_v38 = vld [vmem:[%s7843_s6 + $0x88] sm:$0xff]  ;;  %v4907_v39 = vld [vmem:[%s7843_s6 + $0xb8] sm:$0xff] }
  0x27   : > { %v448_v4 = vld [vmem:[#allocation2] sm:$0xf]  ;;  %v458_v8 = vld [vmem:[#allocation2 + $0x4] sm:$0xf]  ;;  %v554_v21 = vmul.f32 %v6481_v18, %v6481_v18  ;;  %v556_v22 = vmul.f32 %v6483_v19, %v6483_v19  ;;  %5544 = vmatprep.subr.mxu0 %v595_v30  ;;  %5562 = vmatprep.subr.mxu1 %v4885_v31  ;;  %v4906_v60 = vld [vmem:[%s7843_s6 + $0xb0] sm:$0xff] }
  0x28   : > { %v455_v6 = vadd.f32 %v4875_v3, %v448_v4  ;;  %v459_v10 = vadd.f32 %v4875_v3, %v458_v8  ;;  %5545 = vmatpush3.msra.mxu0 %v595_v30  ;;  %5563 = vmatpush3.msra.mxu1 %v4885_v31  ;;  %v4877_v49 = vld [vmem:[%s7842_s5] ss:$0 sm:$0xff]  ;;  %v4895_v63 = vld [vmem:[%s7843_s6 + $0x78] sm:$0xff]  ;;  %v4905_v0 = vld [vmem:[%s7843_s6 + $0xa8] sm:$0xff] }
  0x29   : > { %v561_v24 = vsel %vm7851_vm2, %v554_v21, 0.0  ;;  %v567_v25 = vsel %vm7851_vm2, %v556_v22, 0.0  ;;  %5546 = vmatprep.subr.mxu0 %v594_v32  ;;  %5564 = vmatprep.subr.mxu1 %v4884_v33  ;;  %v4896_v59 = vld [vmem:[%s7843_s6 + $0x80] sm:$0xff]  ;;  %v4894_v1 = vld [vmem:[%s7843_s6 + $0x70] sm:$0xff]  ;;  %v4893_v3 = vld [vmem:[%s7843_s6 + $0x68] sm:$0xff] }
  0x2a   : > { %v6473_v13 = vsel %vm471_vm1, %v455_v6, %v463_v7  ;;  %v6477_v16 = vsel %vm471_vm1, %v459_v10, %v469_v11  ;;  %5547 = vmatpush3.msra.mxu0 %v594_v32  ;;  %5565 = vmatpush3.msra.mxu1 %v4884_v33  ;;  %v4904_v2 = vld [vmem:[%s7843_s6 + $0xa0] sm:$0xff]  ;;  %v4903_v4 = vld [vmem:[%s7843_s6 + $0x98] sm:$0xff]  ;;  %v4902_v6 = vld [vmem:[%s7843_s6 + $0x90] sm:$0xff] }
  0x2b   : > { %v553_v15 = vmul.f32 %v6473_v13, %v6473_v13  ;;  %v555_v17 = vmul.f32 %v6477_v16, %v6477_v16  ;;  %5548 = vmatprep.subr.mxu0 %v593_v34  ;;  %5566 = vmatprep.subr.mxu1 %v4883_v35  ;;  %v4892_v5 = vld [vmem:[%s7843_s6 + $0x60] sm:$0xff]  ;;  %v4917_v7 = vld [vmem:[%s7843_s6 + $0xe8] sm:$0xff]  ;;  %v4915_v9 = vld [vmem:[%s7843_s6 + $0xd8] sm:$0xff] }
  0x2c   : > { %5549 = vmatpush3.msra.mxu0 %v593_v34  ;;  %5567 = vmatpush3.msra.mxu1 %v4883_v35  ;;  %v4916_v8 = vld [vmem:[%s7843_s6 + $0xe0] sm:$0xff]  ;;  %v4914_v10 = vld [vmem:[%s7843_s6 + $0xd0] sm:$0xff]  ;;  %v4913_v11 = vld [vmem:[%s7843_s6 + $0xc8] sm:$0xff] }
  0x2d   : > { %v558_v20 = vsel %vm7851_vm2, %v553_v15, 0.0  ;;  %v564_v23 = vsel %vm7851_vm2, %v555_v17, 0.0  ;;  %5550 = vmatprep.subr.mxu0 %v592_v36  ;;  %5568 = vmatprep.subr.mxu1 %v4882_v37  ;;  %v4912_v12 = vld [vmem:[%s7843_s6 + $0xc0] sm:$0xff]  ;;  %v6654_v34 = vld [vmem:[%s7841_s4 + $0x18] sm:$0xff] }
  0x2e   : > { %559 = vadd.xlane.f32.xlu0 %v558_v20  ;;  %565 = vadd.xlane.f32.xlu1 %v564_v23  ;;  %v6641_v17 = vld [vmem:[%s7840_s3] sm:$0xff] }
  0x2f   : > { %5551 = vmatpush3.msra.mxu0 %v592_v36  ;;  %5569 = vmatpush3.msra.mxu1 %v4882_v37  ;;  %v6646_v20 = vld [vmem:[%s7841_s4] sm:$0xff]  ;;  %v6659_v36 = vld [vmem:[%s7840_s3 + $0x18] sm:$0xff] }
  0x30   : > { %5576 = vmatprep.subr.mxu0 %v4897_v38  ;;  %5594 = vmatprep.subr.mxu1 %v4907_v39 }
  0x32   : > { %562 = vadd.xlane.f32.xlu0 %v561_v24  ;;  %568 = vadd.xlane.f32.xlu1 %v567_v25 }
  0xb7   : > { %v560_v40 = vpop.xlane.xlu0 %559  ;;  %v566_v42 = vpop.xlane.xlu1 %565 }
  0xb8   : > { %v570_v41 = vmax.f32 %v560_v40, 1e-24  ;;  %v572_v43 = vmax.f32 %v566_v42, 1e-24  ;;  %v6671_v42 = vld [vmem:[%s7840_s3 + $0x10] sm:$0xff] }
  0xba   : > { %6171 = vrsqrt.f32 %v570_v41 }
  0xbb   : > { %v563_v44 = vpop.xlane.xlu0 %562  ;;  %6173 = vrsqrt.f32 %v572_v43  ;;  %v569_v46 = vpop.xlane.xlu1 %568 }
  0xbc   : > { %v571_v45 = vmax.f32 %v563_v44, 1e-24  ;;  %v573_v47 = vmax.f32 %v569_v46, 1e-24 }
  0xbe   : > { %6175 = vrsqrt.f32 %v571_v45 }
  0xbf   : > { %6177 = vrsqrt.f32 %v573_v47  ;;  %v6678_v47 = vld [vmem:[%s7840_s3 + $0x8] sm:$0xff] }
  0xc7   : > { %v6172_v48 = vpop.eup %6171 }
  0xc8   : > { %v578_v50 = vmul.f32 %v6172_v48, %v6473_v13  ;;  %v6174_v51 = vpop.eup %6173  ;;  %v6683_v48 = vld [vmem:[%s7841_s4 + $0x8] sm:$0xff] }
  0xc9   : > { %v580_v55 = vmul.f32 %v6174_v51, %v6477_v16 }
  0xca   : > { %v6539_v52 = vmul.f32 %v4877_v49, %v578_v50 }
  0xcb   : > { %v6176_v53 = vpop.eup %6175  ;;  %v6556_v61 = vmul.f32 %v4877_v49, %v580_v55 }
  0xcc   : > { %v6178_v54 = vpop.eup %6177  ;;  %v579_v56 = vmul.f32 %v6176_v53, %v6481_v18  ;;  %5552 = vmatprep.mubr.msk.f32.mxu0 %vm7851_vm2, %v6539_v52  ;;  %5570 = vmatprep.mubr.msk.f32.mxu1 %vm7851_vm2, %v6539_v52 }
  0xcd   : > { %v581_v58 = vmul.f32 %v6178_v54, %v6483_v19 }
  0xce   : > { %v6547_v57 = vmul.f32 %v4877_v49, %v579_v56 }
  0xcf   : > { %v6562_v62 = vmul.f32 %v4877_v49, %v581_v58 }
  0xd0   : > { %5553 = vmatmul.mubr.msk.f32.vlgmr.msra.gmra.mxu0 %vm7851_vm2, %v6547_v57  ;;  %5571 = vmatmul.mubr.msk.f32.vlgmr.msra.gmra.mxu1 %vm7851_vm2, %v6547_v57 }
  0xd1   : > { %5577 = vmatpush3.msra.mxu0 %v4897_v38  ;;  %5595 = vmatpush3.msra.mxu1 %v4907_v39  ;;  %v6665_v39 = vld [vmem:[%s7841_s4 + $0x10] sm:$0xff] }
  0xd2   : > { %5578 = vmatprep.subr.mxu0 %v4896_v59  ;;  %5596 = vmatprep.subr.mxu1 %v4906_v60 }
  0xd3   : > { %5579 = vmatpush3.msra.mxu0 %v4896_v59  ;;  %5597 = vmatpush3.msra.mxu1 %v4906_v60 }
  0xd4   : > { %5555 = vmatprep.mubr.msk.f32.mxu0 %vm7851_vm2, %v6556_v61  ;;  %5573 = vmatprep.mubr.msk.f32.mxu1 %vm7851_vm2, %v6556_v61 }
  0xd5   : > { %5580 = vmatprep.subr.mxu0 %v4895_v63  ;;  %5598 = vmatprep.subr.mxu1 %v4905_v0 }
  0xd6   : > { %5556 = vmatmul.mubr.msk.f32.gmra.mxu0 %vm7851_vm2, %v6562_v62  ;;  %5574 = vmatmul.mubr.msk.f32.gmra.mxu1 %vm7851_vm2, %v6562_v62 }
  0xd7   : > { %5581 = vmatpush3.msra.mxu0 %v4895_v63  ;;  %5599 = vmatpush3.msra.mxu1 %v4905_v0 }
  0xd8   : > { %5582 = vmatprep.subr.mxu0 %v4894_v1  ;;  %5588 = vmatprep.mubr.msk.f32.mxu0 %vm7851_vm2, %v6539_v52 }
  0xd9   : > { %5600 = vmatprep.subr.mxu1 %v4904_v2  ;;  %5606 = vmatprep.mubr.msk.f32.mxu1 %vm7851_vm2, %v6539_v52 }
  0xda   : > { %5583 = vmatpush3.msra.mxu0 %v4894_v1  ;;  %5601 = vmatpush3.msra.mxu1 %v4904_v2 }
  0xdb   : > { %5584 = vmatprep.subr.mxu0 %v4893_v3  ;;  %5602 = vmatprep.subr.mxu1 %v4903_v4 }
  0xdc   : > { %5585 = vmatpush3.msra.mxu0 %v4893_v3  ;;  %5603 = vmatpush3.msra.mxu1 %v4903_v4  ;;  %v4939_v4 = vld [vmem:[%s7843_s6 + $0x118] sm:$0xff] }
  0xdd   : > { %5586 = vmatprep.subr.mxu0 %v4892_v5  ;;  %5604 = vmatprep.subr.mxu1 %v4902_v6 }
  0xde   : > { %5587 = vmatpush3.msra.mxu0 %v4892_v5  ;;  %5605 = vmatpush3.msra.mxu1 %v4902_v6 }
  0xdf   : > { %5589 = vmatmul.mubr.msk.f32.vlgmr.msra.gmra.mxu0 %vm7851_vm2, %v6547_v57  ;;  %5607 = vmatmul.mubr.msk.f32.vlgmr.msra.gmra.mxu1 %vm7851_vm2, %v6547_v57 }
  0xe0   : > { %5612 = vmatprep.subr.mxu0 %v4917_v7  ;;  %5591 = vmatprep.mubr.msk.f32.mxu0 %vm7851_vm2, %v6556_v61 }
  0xe1   : > { %5609 = vmatprep.mubr.msk.f32.mxu1 %vm7851_vm2, %v6556_v61  ;;  %5613 = vmatpush3.msra.mxu0 %v4917_v7 }
  0xe2   : > { %5614 = vmatprep.subr.mxu0 %v4916_v8 }
  0xe3   : > { %5615 = vmatpush3.msra.mxu0 %v4916_v8  ;;  %5610 = vmatmul.mubr.msk.f32.gmra.mxu1 %vm7851_vm2, %v6562_v62 }
  0xe4   : > { %5592 = vmatmul.mubr.msk.f32.gmra.mxu0 %vm7851_vm2, %v6562_v62  ;;  %5616 = vmatprep.subr.mxu0 %v4915_v9 }
  0xe5   : > { %5617 = vmatpush3.msra.mxu0 %v4915_v9  ;;  %5624 = vmatprep.mubr.msk.f32.mxu0 %vm7851_vm2, %v6539_v52  ;;  %v4938_v9 = vld [vmem:[%s7843_s6 + $0x110] sm:$0xff] }
  0xe6   : > { %5618 = vmatprep.subr.mxu0 %v4914_v10 }
  0xe7   : > { %5619 = vmatpush3.msra.mxu0 %v4914_v10  ;;  %v4937_v10 = vld [vmem:[%s7843_s6 + $0x108] sm:$0xff] }
  0xe8   : > { %5620 = vmatprep.subr.mxu0 %v4913_v11 }
  0xe9   : > { %5621 = vmatpush3.msra.mxu0 %v4913_v11 }
  0xea   : > { %5622 = vmatprep.subr.mxu0 %v4912_v12 }
  0xeb   : > { %5623 = vmatpush3.msra.mxu0 %v4912_v12  ;;  %v4936_v12 = vld [vmem:[%s7843_s6 + $0x100] sm:$0xff] }
  0xec   : > { %5625 = vmatmul.mubr.msk.f32.vlgmr.msra.gmra.mxu0 %vm7851_vm2, %v6547_v57 }
  0xed   : > { %5627 = vmatprep.mubr.msk.f32.mxu0 %vm7851_vm2, %v6556_v61 }
  0xf0   : > { %5628 = vmatmul.mubr.msk.f32.gmra.mxu0 %vm7851_vm2, %v6562_v62 }
 0x190   : > { %v5554_v14 = vpop.f32.mrf.mxu0  ;;  %v5572_v15 = vpop.f32.mrf.mxu1 }
 0x191   : > { %v696_v0 = vmul.f32 %v5554_v14, %v6678_v47  ;;  %v792_v1 = vmul.f32 %v5572_v15, %v6683_v48  ;;  %v4935_v14 = vld [vmem:[%s7843_s6 + $0xf8] sm:$0xff]  ;;  %v4934_v15 = vld [vmem:[%s7843_s6 + $0xf0] sm:$0xff] }
 0x192   : > { %v676_v21 = vpop.f32.mrf.mxu0  ;;  %v772_v22 = vpop.f32.mrf.mxu1 }
 0x193   : > { %v695_v23 = vmul.f32 %v676_v21, %v6641_v17  ;;  %v791_v24 = vmul.f32 %v772_v22, %v6646_v20  ;;  %v796_v5 = vadd.f32 %v792_v1, %v696_v0  ;;  %v4959_v21 = vld [vmem:[%s7843_s6 + $0x178] sm:$0xff]  ;;  %v4958_v22 = vld [vmem:[%s7843_s6 + $0x170] sm:$0xff]  ;;  %v4948_v1 = vld [vmem:[%s7843_s6 + $0x140] sm:$0xff] }
 0x195   : > { %v795_v25 = vadd.f32 %v791_v24, %v695_v23  ;;  %v4957_v23 = vld [vmem:[%s7843_s6 + $0x168] sm:$0xff]  ;;  %v4956_v24 = vld [vmem:[%s7843_s6 + $0x160] sm:$0xff] }
 0x196   : > { %v5557_v26 = vpop.f32.mrf.mxu0  ;;  %v5575_v27 = vpop.f32.mrf.mxu1 }
 0x197   : > { %5638 = vmatprep.mubr.msk.f32.mxu1 %vm7850_vm3, %v795_v25  ;;  %v698_v6 = vmul.f32 %v5557_v26, %v6659_v36  ;;  %v794_v7 = vmul.f32 %v5575_v27, %v6654_v34  ;;  %v4955_v25 = vld [vmem:[%s7843_s6 + $0x158] sm:$0xff]  ;;  %v4954_v26 = vld [vmem:[%s7843_s6 + $0x150] sm:$0xff] }
 0x198   : > { %v686_v28 = vpop.f32.mrf.mxu0  ;;  %v782_v29 = vpop.f32.mrf.mxu1  ;;  %v4979_v27 = vld [vmem:[%s7843_s6 + $0x1d8] sm:$0xff] }
 0x199   : > { %v697_v2 = vmul.f32 %v686_v28, %v6671_v42  ;;  %v793_v3 = vmul.f32 %v782_v29, %v6665_v39  ;;  %v798_v11 = vadd.f32 %v794_v7, %v698_v6  ;;  %v4978_v28 = vld [vmem:[%s7843_s6 + $0x1d0] sm:$0xff]  ;;  %v4977_v29 = vld [vmem:[%s7843_s6 + $0x1c8] sm:$0xff] }
 0x19b   : > { %v797_v8 = vadd.f32 %v793_v3, %v697_v2 }
 0x19f   : > { %v5590_v30 = vpop.f32.mrf.mxu0  ;;  %v5608_v31 = vpop.f32.mrf.mxu1 }
 0x1a0   : > { %v892_v49 = vmul.f32 %v5590_v30, %v6678_v47  ;;  %v988_v50 = vmul.f32 %v5608_v31, %v6683_v48  ;;  %v4976_v30 = vld [vmem:[%s7843_s6 + $0x1c0] sm:$0xff]  ;;  %v4975_v31 = vld [vmem:[%s7843_s6 + $0x1b8] sm:$0xff] }
 0x1a1   : > { %v872_v32 = vpop.f32.mrf.mxu0  ;;  %v968_v33 = vpop.f32.mrf.mxu1 }
 0x1a2   : > { %v992_v54 = vadd.f32 %v988_v50, %v892_v49  ;;  %v891_v55 = vmul.f32 %v872_v32, %v6641_v17  ;;  %v987_v56 = vmul.f32 %v968_v33, %v6646_v20  ;;  %v4974_v32 = vld [vmem:[%s7843_s6 + $0x1b0] sm:$0xff]  ;;  %v476_v33 = vlaneseq }
 0x1a3   : > { %v5611_v35 = vpop.f32.mrf.mxu1 }
 0x1a4   : > { %v5593_v37 = vpop.f32.mrf.mxu0  ;;  %v990_v38 = vmul.f32 %v5611_v35, %v6654_v34  ;;  %v991_v60 = vadd.f32 %v987_v56, %v891_v55  ;;  %v477_v35 = vshrl.u32 %v476_v33, 7  ;;  %v7859_v56 = vmov 0 }
 0x1a5   : > { %v894_v40 = vmul.f32 %v5593_v37, %v6659_v36  ;;  %v978_v41 = vpop.f32.mrf.mxu1 }
 0x1a6   : > { %v882_v43 = vpop.f32.mrf.mxu0  ;;  %v989_v44 = vmul.f32 %v978_v41, %v6665_v39  ;;  %v478_v37 = vadd.s32 8, %v477_v35  ;;  %v488_v49 = vand.u32 15, %v477_v35  ;;  %v479_v50 = vadd.s32 16, %v477_v35 }
 0x1a7   : > { %v994_v45 = vadd.f32 %v990_v38, %v894_v40  ;;  %v893_v46 = vmul.f32 %v882_v43, %v6671_v42  ;;  %v482_v38 = vand.u32 127, %v476_v33 }
 0x1a8   : > { %v489_v40 = vand.u32 15, %v478_v37  ;;  %v484_v43 = vshra.s32 %v478_v37, 4  ;;  %vm6790_vm0 = vcmp.ge.s32.totalorder %v488_v49, 4  ;;  %v490_v55 = vand.u32 15, %v479_v50 }
 0x1a9   : > { %v993_v51 = vadd.f32 %v989_v44, %v893_v46  ;;  %5630 = vmatprep.subr.msk.mxu1 %vm7850_vm3, %v994_v45  ;;  %v492_v41 = vand.u32 15, %v482_v38  ;;  %v487_v44 = vshra.s32 %v482_v38, 4  ;;  %v480_v46 = vadd.s32 24, %v477_v35 }
 0x1aa   : > { %5631 = vmatpush3.xpose.msk.msra.mxu1 %vm7850_vm3, %v994_v45  ;;  %vm495_vm5 = vcmp.ge.s32.totalorder %v489_v40, 12  ;;  %vm507_vm6 = vcmp.lt.s32.totalorder %v489_v40, 12  ;;  %v537_v45 = vstv %s536_s13 }
 0x1ab   : > { %5632 = vmatprep.subr.msk.mxu1 %vm7850_vm3, %v993_v51  ;;  %vm493_vm4 = vcmp.lt.s32.totalorder %v492_v41, 4  ;;  %vm515_vm7 = vcmp.le.s32.totalorder %v492_v41, %v489_v40  ;;  %vm534_vm10 = vcmp.ge.s32.totalorder %v492_v41, 4  ;;  %vm538_vm11 = vcmp.eq.s32.totalorder %v537_v45, 1 }
 0x1ac   : > { %v5626_v53 = vpop.f32.mrf.mxu0  ;;  %vm499_vm8 = vmor %vm493_vm4, %vm495_vm5  ;;  %vm527_vm13 = vcmp.eq.s32.totalorder %v484_v43, %v487_v44  ;;  %vm514_vm1 = vcmp.le.s32.totalorder %v492_v41, %v488_v49  ;;  %v4949_v49 = vld [vmem:[%s7843_s6 + $0x148] sm:$0xff] }
 0x1ad   : > { %vm519_vm9 = vmand %vm507_vm6, %vm515_vm7 }
 0x1ae   : > { %v1068_v58 = vpop.f32.mrf.mxu0  ;;  %5633 = vmatpush3.xpose.msk.msra.mxu1 %vm7850_vm3, %v993_v51  ;;  %vm523_vm12 = vmor %vm499_vm8, %vm519_vm9  ;;  %v491_v51 = vand.u32 15, %v480_v46 }
 0x1af   : > { %5634 = vmatprep.subr.msk.mxu1 %vm7850_vm3, %v992_v54  ;;  %vm6786_vm14 = vmor %vm534_vm10, %vm538_vm11  ;;  %vm504_vm11 = vcmp.ge.s32.totalorder %v490_v55, 4 }
 0x1b0   : > { %v5629_v59 = vpop.f32.mrf.mxu0  ;;  %vm531_vm15 = vmand %vm527_vm13, %vm523_vm12  ;;  %vm497_vm5 = vcmp.ge.s32.totalorder %v491_v51, 12  ;;  %vm509_vm7 = vcmp.lt.s32.totalorder %v491_v51, 12  ;;  %vm517_vm8 = vcmp.le.s32.totalorder %v492_v41, %v491_v51  ;;  %vm516_vm12 = vcmp.le.s32.totalorder %v492_v41, %v490_v55 }
 0x1b1   : > { %5644 = vmatprep.subr.mxu0 %v5629_v59  ;;  %vm6796_vm6 = vmand %vm531_vm15, %vm6786_vm14 }
 0x1b2   : > { %v1078_v63 = vpop.f32.mrf.mxu0  ;;  %5635 = vmatpush3.xpose.msk.msra.mxu1 %vm7850_vm3, %v992_v54  ;;  %5645 = vmatpush3.msra.mxu0 %v5629_v59  ;;  %v7860_v56 = vsel %vm6796_vm6, 4294967295, %v7859_v56  ;;  %vm518_vm9 = vmand %vm6790_vm0, %vm514_vm1  ;;  %v486_v59 = vshra.s32 %v480_v46, 4 }
 0x1b3   : > { %5636 = vmatprep.subr.msk.mxu1 %vm7850_vm3, %v991_v60  ;;  %5646 = vmatprep.subr.mxu0 %v1078_v63  ;;  %vm6803_vm10 = vmor %vm493_vm4, %vm497_vm5 }
 0x1b4   : > { %5647 = vmatpush3.msra.mxu0 %v1078_v63  ;;  %vm521_vm13 = vmand %vm509_vm7, %vm517_vm8  ;;  %v485_v63 = vshra.s32 %v479_v50, 4  ;;  %vm1201_vm7 = vcmask 261120   ;;  %v1345_v50 = vld [vmem:[%s7844_s7 + $0x10] sm:$0xff] }
 0x1b5   : > { %5648 = vmatprep.subr.mxu0 %v5626_v53  ;;  %vm522_vm15 = vmor %vm493_vm4, %vm518_vm9 }
 0x1b6   : > { %5637 = vmatpush3.xpose.msk.msra.mxu1 %vm7850_vm3, %v991_v60  ;;  %5649 = vmatpush3.msra.mxu0 %v5626_v53  ;;  %v7855_v53 = vmov 0  ;;  %vm525_vm6 = vmor %vm6803_vm10, %vm521_vm13  ;;  %vm6815_vm5 = vcmp.eq.s32.totalorder %v485_v63, %v487_v44 }
 0x1b7   : > { %5650 = vmatprep.subr.mxu0 %v1068_v58  ;;  %5658 = vmatprep.subr.mxu1 %v4939_v4  ;;  %v7856_v53 = vsel %vm6786_vm14, 4294967295, %v7855_v53  ;;  %vm529_vm14 = vcmp.eq.s32.totalorder %v486_v59, %v487_v44 }
 0x1b8   : > { %5651 = vmatpush3.msra.mxu0 %v1068_v58  ;;  %v483_v58 = vshra.s32 %v477_v35, 4  ;;  %vm533_vm8 = vmand %vm529_vm14, %vm525_vm6  ;;  %vm7867_vm9 = vnez %v7856_v53  ;;  %vm7875_vm6 = vcmask 392192  }
 0x1b9   : > { %5639 = vmatmul.mubr.msk.f32.vlgmr.msra.gmra.mxu1 %vm7850_vm3, %v796_v5  ;;  %5676 = vmatprep.subr.mxu0 %v4949_v49  ;;  %vm7876_vm10 = vmmov %vm7875_vm6 }
 0x1ba   : > { %5641 = vmatprep.mubr.msk.f32.mxu1 %vm7850_vm3, %v797_v8  ;;  %5659 = vmatpush3.msra.mxu1 %v4939_v4  ;;  %vm7878_vm13 = vmmov %vm7875_vm6 }
 0x1bb   : > { %5660 = vmatprep.subr.mxu1 %v4938_v9 }
 0x1bc   : > { %5661 = vmatpush3.msra.mxu1 %v4938_v9 }
 0x1bd   : > { %5642 = vmatmul.mubr.msk.f32.gmra.mxu1 %vm7850_vm3, %v798_v11  ;;  %5662 = vmatprep.subr.mxu1 %v4937_v10  ;;  %vm526_vm3 = vcmp.eq.s32.totalorder %v483_v58, %v487_v44 }
 0x1be   : > { %5663 = vmatpush3.msra.mxu1 %v4937_v10  ;;  %5670 = vmatprep.mubr.msk.f32.mxu1 %vm7851_vm2, %v6539_v52  ;;  %vm530_vm0 = vmand %vm526_vm3, %vm522_vm15  ;;  %vm7870_vm3 = vnez %v7860_v56 }
 0x1bf   : > { %5664 = vmatprep.subr.mxu1 %v4936_v12  ;;  %vm7879_vm15 = vmmov %vm7875_vm6 }
 0x1c0   : > { %5665 = vmatpush3.msra.mxu1 %v4936_v12 }
 0x1c1   : > { %5666 = vmatprep.subr.mxu1 %v4935_v14 }
 0x1c2   : > { %5667 = vmatpush3.msra.mxu1 %v4935_v14 }
 0x1c3   : > { %5668 = vmatprep.subr.mxu1 %v4934_v15 }
 0x1c4   : > { %5669 = vmatpush3.msra.mxu1 %v4934_v15 }
 0x1c5   : > { %5671 = vmatmul.mubr.msk.f32.vlgmr.msra.gmra.mxu1 %vm7851_vm2, %v6547_v57  ;;  %5694 = vmatprep.subr.mxu1 %v4959_v21 }
 0x1c6   : > { %5673 = vmatprep.mubr.msk.f32.mxu1 %vm7851_vm2, %v6556_v61  ;;  %5695 = vmatpush3.msra.mxu1 %v4959_v21 }
 0x1c7   : > { %5696 = vmatprep.subr.mxu1 %v4958_v22 }
 0x1c8   : > { %5697 = vmatpush3.msra.mxu1 %v4958_v22 }
 0x1c9   : > { %5674 = vmatmul.mubr.msk.f32.gmra.mxu1 %vm7851_vm2, %v6562_v62  ;;  %5698 = vmatprep.subr.mxu1 %v4957_v23 }
 0x1ca   : > { %5699 = vmatpush3.msra.mxu1 %v4957_v23  ;;  %5706 = vmatprep.mubr.msk.f32.mxu1 %vm7851_vm2, %v6539_v52 }
 0x1cb   : > { %5700 = vmatprep.subr.mxu1 %v4956_v24 }
 0x1cc   : > { %5701 = vmatpush3.msra.mxu1 %v4956_v24 }
 0x1cd   : > { %5702 = vmatprep.subr.mxu1 %v4955_v25 }
 0x1ce   : > { %5703 = vmatpush3.msra.mxu1 %v4955_v25 }
 0x1cf   : > { %5704 = vmatprep.subr.mxu1 %v4954_v26 }
 0x1d0   : > { %5705 = vmatpush3.msra.mxu1 %v4954_v26 }
 0x1d1   : > { %5707 = vmatmul.mubr.msk.f32.vlgmr.msra.gmra.mxu1 %vm7851_vm2, %v6547_v57  ;;  %5730 = vmatprep.subr.mxu1 %v4979_v27 }
 0x1d2   : > { %5709 = vmatprep.mubr.msk.f32.mxu1 %vm7851_vm2, %v6556_v61  ;;  %5731 = vmatpush3.msra.mxu1 %v4979_v27 }
 0x1d3   : > { %5732 = vmatprep.subr.mxu1 %v4978_v28 }
 0x1d4   : > { %5733 = vmatpush3.msra.mxu1 %v4978_v28 }
 0x1d5   : > { %5710 = vmatmul.mubr.msk.f32.gmra.mxu1 %vm7851_vm2, %v6562_v62  ;;  %5734 = vmatprep.subr.mxu1 %v4977_v29 }
 0x1d6   : > { %5735 = vmatpush3.msra.mxu1 %v4977_v29  ;;  %5742 = vmatprep.mubr.msk.f32.mxu1 %vm7851_vm2, %v6539_v52 }
 0x1d7   : > { %5736 = vmatprep.subr.mxu1 %v4976_v30 }
 0x1d8   : > { %5737 = vmatpush3.msra.mxu1 %v4976_v30 }
 0x1d9   : > { %5738 = vmatprep.subr.mxu1 %v4975_v31 }
 0x1da   : > { %5739 = vmatpush3.msra.mxu1 %v4975_v31 }
 0x1db   : > { %5740 = vmatprep.subr.mxu1 %v4974_v32 }
 0x1dc   : > { %5741 = vmatpush3.msra.mxu1 %v4974_v32 }
 0x1dd   : > { %5743 = vmatmul.mubr.msk.f32.vlgmr.msra.gmra.mxu1 %vm7851_vm2, %v6547_v57  ;;  %5788 = vmatprep.subr.mxu1 %v1345_v50 }
 0x1de   : > { %5745 = vmatprep.mubr.msk.f32.mxu1 %vm7851_vm2, %v6556_v61  ;;  %5789 = vmatpush3.msra.mxu1 %v1345_v50 }
 0x1e1   : > { %5746 = vmatmul.mubr.msk.f32.gmra.mxu1 %vm7851_vm2, %v6562_v62  ;;  %vm520_vm2 = vmand %vm504_vm11, %vm516_vm12 }
 0x1e2   : > { %vm6811_vm1 = vmor %vm493_vm4, %vm520_vm2 }
 0x1e3   : > { %vm6821_vm11 = vmand %vm530_vm0, %vm7867_vm9 }
 0x1e4   : > { %vm532_vm2 = vmand %vm6815_vm5, %vm6811_vm1 }
 0x1e5   : > { %vm6834_vm4 = vmand %vm533_vm8, %vm7867_vm9  ;;  %vm7883_vm8 = vcmask 195584  }
 0x1e6   : > { %vm6843_vm14 = vmand %vm532_vm2, %vm7867_vm9 }
 0x1e7   : > { %vm7877_vm12 = vmmov %vm7875_vm6 }
 0x1e8   : > { %vm7880_vm0 = vmmov %vm7875_vm6 }
 0x1e9   : > { %vm7881_vm1 = vmmov %vm7880_vm0 }
 0x1ea   : > { %vm7882_vm5 = vmmov %vm7880_vm0 }
 0x1eb   : > { %vm7884_vm9 = vmmov %vm7883_vm8 }
 0x1ec   : > { %vm7885_vm2 = vmmov %vm7883_vm8 }
 0x279   : > { %v5640_v2 = vpop.f32.mrf.mxu1 }
 0x27a   : > { %v1198_v4 = vsel %vm7870_vm3, %v5640_v2, -3.4028235e+38 }
 0x27b   : > { %v1178_v5 = vpop.f32.mrf.mxu1  ;;  %v1205_v6 = vsel %vm1201_vm7, %v1198_v4, -inf }
 0x27c   : > { %v1197_v8 = vsel %vm6821_vm11, %v1178_v5, -3.4028235e+38  ;;  %1206 = vmax.xlane.f32.xlu1 %v1205_v6  ;;  %v4947_v5 = vld [vmem:[%s7843_s6 + $0x138] sm:$0xff] }
 0x27d   : > { %v5643_v9 = vpop.f32.mrf.mxu1  ;;  %v1202_v10 = vsel %vm1201_vm7, %v1197_v8, -inf }
 0x27e   : > { %v1200_v12 = vsel %vm6834_vm4, %v5643_v9, -3.4028235e+38  ;;  %1203 = vmax.xlane.f32.xlu0 %v1202_v10  ;;  %v4945_v9 = vld [vmem:[%s7843_s6 + $0x128] sm:$0xff]  ;;  %v4944_v10 = vld [vmem:[%s7843_s6 + $0x120] sm:$0xff] }
 0x27f   : > { %v1188_v14 = vpop.f32.mrf.mxu1  ;;  %v1211_v15 = vsel %vm1201_vm7, %v1200_v12, -inf }
 0x280   : > { %v1199_v21 = vsel %vm6843_vm14, %v1188_v14, -3.4028235e+38  ;;  %1212 = vmax.xlane.f32.xlu1 %v1211_v15  ;;  %v4968_v14 = vld [vmem:[%s7843_s6 + $0x1a0] sm:$0xff]  ;;  %v4967_v15 = vld [vmem:[%s7843_s6 + $0x198] sm:$0xff] }
 0x281   : > { %v1208_v22 = vsel %vm1201_vm7, %v1199_v21, -inf }
 0x282   : > { %1209 = vmax.xlane.f32.xlu0 %v1208_v22  ;;  %v4965_v22 = vld [vmem:[%s7843_s6 + $0x188] sm:$0xff] }
 0x305   : > { %v1207_v23 = vpop.xlane.xlu1 %1206 }
 0x306   : > { %v1215_v24 = vsub.f32 %v1198_v4, %v1207_v23  ;;  %v4964_v23 = vld [vmem:[%s7843_s6 + $0x180] sm:$0xff] }
 0x307   : > { %v1204_v25 = vpop.xlane.xlu0 %1203 }
 0x308   : > { %v1220_v26 = vmul.f32 1.442695, %v1215_v24  ;;  %v1214_v27 = vsub.f32 %v1197_v8, %v1204_v25  ;;  %v4946_v8 = vld [vmem:[%s7843_s6 + $0x130] sm:$0xff]  ;;  %v1343_v24 = vld [vmem:[%s7844_s7] sm:$0xff] }
 0x309   : > { %v1213_v28 = vpop.xlane.xlu1 %1212 }
 0x30a   : > { %6179 = vpow2.f32 %v1220_v26  ;;  %v1218_v29 = vmul.f32 1.442695, %v1214_v27  ;;  %v1217_v30 = vsub.f32 %v1200_v12, %v1213_v28  ;;  %v4969_v12 = vld [vmem:[%s7843_s6 + $0x1a8] sm:$0xff] }
 0x30b   : > { %v1210_v31 = vpop.xlane.xlu0 %1209 }
 0x30c   : > { %6181 = vpow2.f32 %v1218_v29  ;;  %v1224_v32 = vmul.f32 1.442695, %v1217_v30  ;;  %v1216_v33 = vsub.f32 %v1199_v21, %v1210_v31  ;;  %v4966_v21 = vld [vmem:[%s7843_s6 + $0x190] sm:$0xff] }
 0x30e   : > { %6183 = vpow2.f32 %v1224_v32  ;;  %v1222_v35 = vmul.f32 1.442695, %v1216_v33 }
 0x310   : > { %6185 = vpow2.f32 %v1222_v35 }
 0x317   : > { %v6180_v37 = vpop.eup %6179 }
 0x318   : > { %v1229_v38 = vsel %vm1201_vm7, %v6180_v37, 0.0 }
 0x319   : > { %v6182_v40 = vpop.eup %6181  ;;  %1230 = vadd.xlane.f32.xlu1 %v1229_v38 }
 0x31a   : > { %v1226_v41 = vsel %vm1201_vm7, %v6182_v40, 0.0 }
 0x31b   : > { %v6184_v43 = vpop.eup %6183  ;;  %1227 = vadd.xlane.f32.xlu0 %v1226_v41 }
 0x31c   : > { %v1235_v44 = vsel %vm1201_vm7, %v6184_v43, 0.0 }
 0x31d   : > { %v6186_v45 = vpop.eup %6185  ;;  %1236 = vadd.xlane.f32.xlu1 %v1235_v44 }
 0x31e   : > { %v1232_v46 = vsel %vm1201_vm7, %v6186_v45, 0.0 }
 0x31f   : > { %1233 = vadd.xlane.f32.xlu0 %v1232_v46 }
 0x3a2   : > { %v1231_v51 = vpop.xlane.xlu1 %1230 }
 0x3a3   : > { %6187 = vrcp.f32 %v1231_v51 }
 0x3a4   : > { %v1228_v53 = vpop.xlane.xlu0 %1227 }
 0x3a5   : > { %6189 = vrcp.f32 %v1228_v53 }
 0x3a6   : > { %v1237_v54 = vpop.xlane.xlu1 %1236 }
 0x3a7   : > { %6191 = vrcp.f32 %v1237_v54 }
 0x3a8   : > { %v1234_v55 = vpop.xlane.xlu0 %1233 }
 0x3a9   : > { %6193 = vrcp.f32 %v1234_v55 }
 0x3b0   : > { %v6188_v58 = vpop.eup %6187 }
 0x3b1   : > { %v1243_v63 = vmul.f32 %v6188_v58, %v6180_v37 }
 0x3b2   : > { %v6190_v59 = vpop.eup %6189 }
 0x3b3   : > { %v1242_v60 = vmul.f32 %v6190_v59, %v6182_v40 }
 0x3b4   : > { %v6192_v0 = vpop.eup %6191 }
 0x3b5   : > { %5652 = vmatprep.mubr.msk.f32.mxu0 %vm1201_vm7, %v1242_v60  ;;  %v1245_v6 = vmul.f32 %v6192_v0, %v6184_v43 }
 0x3b6   : > { %v6194_v2 = vpop.eup %6193  ;;  %5653 = vmatmul.mubr.msk.f32.vlgmr.msra.gmra.mxu0 %vm1201_vm7, %v1243_v63 }
 0x3b7   : > { %5677 = vmatpush3.msra.mxu0 %v4949_v49  ;;  %v1244_v4 = vmul.f32 %v6194_v2, %v6186_v45 }
 0x3b8   : > { %5678 = vmatprep.subr.mxu0 %v4948_v1 }
 0x3b9   : > { %5679 = vmatpush3.msra.mxu0 %v4948_v1  ;;  %5655 = vmatprep.mubr.msk.f32.mxu0 %vm1201_vm7, %v1244_v4 }
 0x3ba   : > { %5680 = vmatprep.subr.mxu0 %v4947_v5  ;;  %5656 = vmatmul.mubr.msk.f32.gmra.mxu0 %vm1201_vm7, %v1245_v6 }
 0x3bb   : > { %5681 = vmatpush3.msra.mxu0 %v4947_v5  ;;  %5688 = vmatprep.mubr.msk.f32.mxu0 %vm7875_vm6, %v6539_v52  ;;  %vm7886_vm6 = vmmov %vm7885_vm2 }
 0x3bc   : > { %5682 = vmatprep.subr.mxu0 %v4946_v8 }
 0x3bd   : > { %5683 = vmatpush3.msra.mxu0 %v4946_v8 }
 0x3be   : > { %5684 = vmatprep.subr.mxu0 %v4945_v9 }
 0x3bf   : > { %5685 = vmatpush3.msra.mxu0 %v4945_v9 }
 0x3c0   : > { %5686 = vmatprep.subr.mxu0 %v4944_v10 }
 0x3c1   : > { %5687 = vmatpush3.msra.mxu0 %v4944_v10 }
 0x3c2   : > { %5689 = vmatmul.mubr.msk.f32.vlgmr.msra.gmra.mxu0 %vm7876_vm10, %v6547_v57  ;;  %5712 = vmatprep.subr.mxu0 %v4969_v12  ;;  %vm7887_vm10 = vmmov %vm7885_vm2 }
 0x3c3   : > { %5691 = vmatprep.mubr.msk.f32.mxu0 %vm7877_vm12, %v6556_v61  ;;  %5713 = vmatpush3.msra.mxu0 %v4969_v12  ;;  %vm7888_vm12 = vmmov %vm7885_vm2 }
 0x3c4   : > { %5714 = vmatprep.subr.mxu0 %v4968_v14 }
 0x3c5   : > { %5715 = vmatpush3.msra.mxu0 %v4968_v14 }
 0x3c6   : > { %5692 = vmatmul.mubr.msk.f32.gmra.mxu0 %vm7878_vm13, %v6562_v62  ;;  %5716 = vmatprep.subr.mxu0 %v4967_v15  ;;  %vm7889_vm13 = vmmov %vm7885_vm2 }
 0x3c7   : > { %5717 = vmatpush3.msra.mxu0 %v4967_v15  ;;  %5724 = vmatprep.mubr.msk.f32.mxu0 %vm7879_vm15, %v6539_v52  ;;  %v1344_v52 = vld [vmem:[%s7844_s7 + $0x8] sm:$0xff]  ;;  %vm7890_vm15 = vmmov %vm7885_vm2 }
 0x3c8   : > { %5718 = vmatprep.subr.mxu0 %v4966_v21  ;;  %5790 = vmatprep.subr.mxu1 %v1344_v52 }
 0x3c9   : > { %5719 = vmatpush3.msra.mxu0 %v4966_v21  ;;  %5791 = vmatpush3.msra.mxu1 %v1344_v52 }
 0x3ca   : > { %5720 = vmatprep.subr.mxu0 %v4965_v22  ;;  %5792 = vmatprep.subr.mxu1 %v1343_v24 }
 0x3cb   : > { %5721 = vmatpush3.msra.mxu0 %v4965_v22  ;;  %5793 = vmatpush3.msra.mxu1 %v1343_v24 }
 0x3cc   : > { %5722 = vmatprep.subr.mxu0 %v4964_v23 }
 0x3cd   : > { %5723 = vmatpush3.msra.mxu0 %v4964_v23 }
 0x3ce   : > { %5725 = vmatmul.mubr.msk.f32.vlgmr.msra.gmra.mxu0 %vm7880_vm0, %v6547_v57  ;;  %v5672_v57 = vpop.f32.mrf.mxu1  ;;  %vm7891_vm0 = vmmov %vm7885_vm2 }
 0x3cf   : > { %5727 = vmatprep.mubr.msk.f32.mxu0 %vm7881_vm1, %v6556_v61  ;;  %vm7892_vm1 = vmmov %vm7891_vm0  ;;  %v1439_v10 = vmul.f32 %v5672_v57, %v6678_v47 }
 0x3d2   : > { %5728 = vmatmul.mubr.msk.f32.gmra.mxu0 %vm7882_vm5, %v6562_v62  ;;  %v1419_v62 = vpop.f32.mrf.mxu1  ;;  %vm7893_vm5 = vmmov %vm7891_vm0 }
 0x3d3   : > { %v1438_v32 = vmul.f32 %v1419_v62, %v6641_v17 }
 0x3d4   : > { %v5675_v28 = vpop.f32.mrf.mxu1 }
 0x3d5   : > { %v1441_v21 = vmul.f32 %v5675_v28, %v6659_v36 }
 0x3d6   : > { %v1429_v30 = vpop.f32.mrf.mxu1 }
 0x3d8   : > { %v5708_v35 = vpop.f32.mrf.mxu1 }
 0x3d9   : > { %v1635_v63 = vmul.f32 %v5708_v35, %v6678_v47 }
 0x3da   : > { %v1615_v40 = vpop.f32.mrf.mxu1 }
 0x3db   : > { %v1634_v4 = vmul.f32 %v1615_v40, %v6641_v17 }
 0x3dc   : > { %v5711_v43 = vpop.f32.mrf.mxu1 }
 0x3dd   : > { %v1637_v50 = vmul.f32 %v5711_v43, %v6659_v36 }
 0x3de   : > { %v1625_v46 = vpop.f32.mrf.mxu1 }
 0x3df   : > { %v1636_v54 = vmul.f32 %v1625_v46, %v6671_v42 }
 0x3e0   : > { %v5744_v2 = vpop.f32.mrf.mxu1 }
 0x3e2   : > { %v1811_v6 = vpop.f32.mrf.mxu1 }
 0x3e4   : > { %v5747_v12 = vpop.f32.mrf.mxu1 }
 0x476   : > { %v5654_v25 = vpop.f32.mrf.mxu0 }
 0x478   : > { %v1324_v26 = vpop.f32.mrf.mxu0 }
 0x479   : > { %5794 = vmatprep.mubr.msk.f32.mxu1 %vm7883_vm8, %v1324_v26  ;;  %vm7894_vm8 = vmmov %vm7891_vm0 }
 0x47a   : > { %v5657_v61 = vpop.f32.mrf.mxu0  ;;  %5795 = vmatmul.mubr.msk.f32.vlgmr.msra.gmra.mxu1 %vm7884_vm9, %v5654_v25  ;;  %vm7895_vm9 = vmmov %vm7891_vm0 }
 0x47c   : > { %v1334_v27 = vpop.f32.mrf.mxu0 }
 0x47d   : > { %5797 = vmatprep.mubr.msk.f32.mxu1 %vm7885_vm2, %v1334_v27  ;;  %vm7896_vm2 = vmmov %vm7891_vm0 }
 0x47e   : > { %5798 = vmatmul.mubr.msk.f32.gmra.mxu1 %vm7886_vm6, %v5657_v61  ;;  %vm7897_vm6 = vmmov %vm7891_vm0 }
 0x482   : > { %v5690_v29 = vpop.f32.mrf.mxu0 }
 0x483   : > { %v1535_v8 = vmul.f32 %v5690_v29, %v6683_v48 }
 0x484   : > { %v1515_v31 = vpop.f32.mrf.mxu0 }
 0x485   : > { %v1534_v33 = vmul.f32 %v1515_v31, %v6646_v20  ;;  %v1539_v17 = vadd.f32 %v1535_v8, %v1439_v10 }
 0x486   : > { %v5693_v38 = vpop.f32.mrf.mxu0 }
 0x487   : > { %v1538_v37 = vadd.f32 %v1534_v33, %v1438_v32  ;;  %v1537_v14 = vmul.f32 %v5693_v38, %v6654_v34 }
 0x488   : > { %v1525_v41 = vpop.f32.mrf.mxu0 }
 0x489   : > { %5756 = vmatprep.mubr.msk.f32.mxu0 %vm7887_vm10, %v1538_v37  ;;  %v1536_v9 = vmul.f32 %v1525_v41, %v6665_v39  ;;  %vm7898_vm10 = vmmov %vm7891_vm0 }
 0x48e   : > { %v5726_v44 = vpop.f32.mrf.mxu0 }
 0x48f   : > { %v1731_v59 = vmul.f32 %v5726_v44, %v6683_v48  ;;  %v1821_v48 = vpop.f32.mrf.mxu1 }
 0x490   : > { %v1711_v45 = vpop.f32.mrf.mxu0 }
 0x491   : > { %v1735_v0 = vadd.f32 %v1731_v59, %v1635_v63  ;;  %v1730_v1 = vmul.f32 %v1711_v45, %v6646_v20  ;;  %v1440_v20 = vmul.f32 %v1429_v30, %v6671_v42 }
 0x492   : > { %v5729_v49 = vpop.f32.mrf.mxu0 }
 0x493   : > { %v1733_v51 = vmul.f32 %v5729_v49, %v6654_v34  ;;  %v1734_v5 = vadd.f32 %v1730_v1, %v1634_v4  ;;  %v1540_v15 = vadd.f32 %v1536_v9, %v1440_v20  ;;  %v4997_v4 = vld [vmem:[%s7844_s7 + $0x20] sm:$0xff]  ;;  %v4996_v9 = vld [vmem:[%s7844_s7 + $0x18] sm:$0xff] }
 0x494   : > { %v1721_v53 = vpop.f32.mrf.mxu0 }
 0x495   : > { %v1737_v55 = vadd.f32 %v1733_v51, %v1637_v50  ;;  %v1732_v58 = vmul.f32 %v1721_v53, %v6665_v39  ;;  %v1541_v39 = vadd.f32 %v1537_v14, %v1441_v21  ;;  %v4998_v53 = vld [vmem:[%s7844_s7 + $0x28] sm:$0xff] }
 0x497   : > { %v1736_v60 = vadd.f32 %v1732_v58, %v1636_v54  ;;  %5748 = vmatprep.subr.msk.mxu0 %vm7888_vm12, %v1737_v55  ;;  %vm7899_vm12 = vmmov %vm7891_vm0 }
 0x498   : > { %5749 = vmatpush3.xpose.msk.msra.mxu0 %vm7889_vm13, %v1737_v55  ;;  %vm7900_vm13 = vmmov %vm7891_vm0 }
 0x499   : > { %5750 = vmatprep.subr.msk.mxu0 %vm7890_vm15, %v1736_v60  ;;  %vm7901_vm15 = vmmov %vm7891_vm0 }
 0x49c   : > { %5751 = vmatpush3.xpose.msk.msra.mxu0 %vm7891_vm0, %v1736_v60 }
 0x49d   : > { %5752 = vmatprep.subr.msk.mxu0 %vm7892_vm1, %v1735_v0  ;;  %vm7902_vm1 = vcmask 392192  }
 0x4a0   : > { %5753 = vmatpush3.xpose.msk.msra.mxu0 %vm7893_vm5, %v1735_v0  ;;  %vm7903_vm5 = vmmov %vm7902_vm1 }
 0x4a1   : > { %5754 = vmatprep.subr.msk.mxu0 %vm7894_vm8, %v1734_v5  ;;  %vm7904_vm8 = vmmov %vm7902_vm1 }
 0x4a4   : > { %5755 = vmatpush3.xpose.msk.msra.mxu0 %vm7895_vm9, %v1734_v5  ;;  %vm7905_vm9 = vmmov %vm7902_vm1 }
 0x4a5   : > { %5762 = vmatprep.subr.mxu0 %v5747_v12 }
 0x4a7   : > { %5757 = vmatmul.mubr.msk.f32.vlgmr.msra.gmra.mxu0 %vm7896_vm2, %v1539_v17  ;;  %vm7906_vm2 = vmmov %vm7902_vm1 }
 0x4a8   : > { %5759 = vmatprep.mubr.msk.f32.mxu0 %vm7897_vm6, %v1540_v15  ;;  %5763 = vmatpush3.msra.mxu0 %v5747_v12  ;;  %vm7907_vm6 = vmmov %vm7902_vm1 }
 0x4a9   : > { %5764 = vmatprep.subr.mxu0 %v1821_v48 }
 0x4aa   : > { %5765 = vmatpush3.msra.mxu0 %v1821_v48 }
 0x4ab   : > { %5760 = vmatmul.mubr.msk.f32.gmra.mxu0 %vm7898_vm10, %v1541_v39  ;;  %5766 = vmatprep.subr.mxu0 %v5744_v2  ;;  %vm7908_vm10 = vmmov %vm7902_vm1 }
 0x4ac   : > { %5767 = vmatpush3.msra.mxu0 %v5744_v2 }
 0x4ad   : > { %5768 = vmatprep.subr.mxu0 %v1811_v6 }
 0x4ae   : > { %5769 = vmatpush3.msra.mxu0 %v1811_v6 }
 0x4af   : > { %5776 = vmatprep.subr.mxu0 %v4998_v53 }
 0x53a   : > { %v5796_v14 = vpop.f32.mrf.mxu1 }
 0x53c   : > { %v2263_v15 = vpop.f32.mrf.mxu1 }
 0x53e   : > { %v5799_v39 = vpop.f32.mrf.mxu1 }
 0x567   : > { %v5758_v34 = vpop.f32.mrf.mxu0 }
 0x568   : > { %v1940_v42 = vsel %vm7870_vm3, %v5758_v34, -3.4028235e+38 }
 0x569   : > { %v1920_v36 = vpop.f32.mrf.mxu0  ;;  %v1946_v47 = vsel %vm1201_vm7, %v1940_v42, -inf }
 0x56a   : > { %v1939_v22 = vsel %vm6821_vm11, %v1920_v36, -3.4028235e+38  ;;  %1947 = vmax.xlane.f32.xlu1 %v1946_v47 }
 0x56b   : > { %v5761_v23 = vpop.f32.mrf.mxu0  ;;  %v1943_v52 = vsel %vm1201_vm7, %v1939_v22, -inf }
 0x56c   : > { %v1942_v24 = vsel %vm6834_vm4, %v5761_v23, -3.4028235e+38  ;;  %1944 = vmax.xlane.f32.xlu0 %v1943_v52 }
 0x56d   : > { %v1930_v25 = vpop.f32.mrf.mxu0  ;;  %v1952_v57 = vsel %vm1201_vm7, %v1942_v24, -inf }
 0x56e   : > { %v1941_v26 = vsel %vm6843_vm14, %v1930_v25, -3.4028235e+38  ;;  %1953 = vmax.xlane.f32.xlu1 %v1952_v57 }
 0x56f   : > { %v1949_v61 = vsel %vm1201_vm7, %v1941_v26, -inf }
 0x570   : > { %1950 = vmax.xlane.f32.xlu0 %v1949_v61 }
 0x5f3   : > { %v1948_v62 = vpop.xlane.xlu1 %1947 }
 0x5f4   : > { %v1956_v27 = vsub.f32 %v1940_v42, %v1948_v62 }
 0x5f5   : > { %v1945_v28 = vpop.xlane.xlu0 %1944 }
 0x5f6   : > { %v1961_v29 = vmul.f32 1.442695, %v1956_v27  ;;  %v1955_v30 = vsub.f32 %v1939_v22, %v1945_v28 }
 0x5f7   : > { %v1954_v31 = vpop.xlane.xlu1 %1953 }
 0x5f8   : > { %6195 = vpow2.f32 %v1961_v29  ;;  %v1959_v32 = vmul.f32 1.442695, %v1955_v30  ;;  %v1958_v33 = vsub.f32 %v1942_v24, %v1954_v31  ;;  %v2273_v24 = vpop.f32.mrf.mxu1  ;;  %v2335_v30 = vld [vmem:[%s7846_s9 + $0x50] sm:$0xff]  ;;  %v2334_v31 = vld [vmem:[%s7846_s9 + $0x48] sm:$0xff] }
 0x5f9   : > { %v1951_v35 = vpop.xlane.xlu0 %1950 }
 0x5fa   : > { %6197 = vpow2.f32 %v1959_v32  ;;  %v1965_v37 = vmul.f32 1.442695, %v1958_v33  ;;  %v1957_v38 = vsub.f32 %v1941_v26, %v1951_v35  ;;  %v2333_v32 = vld [vmem:[%s7846_s9 + $0x40] sm:$0xff]  ;;  %v2332_v33 = vld [vmem:[%s7846_s9 + $0x38] sm:$0xff]  ;;  %v2331_v35 = vld [vmem:[%s7846_s9 + $0x30] sm:$0xff] }
 0x5fc   : > { %6199 = vpow2.f32 %v1965_v37  ;;  %v1963_v40 = vmul.f32 1.442695, %v1957_v38  ;;  %v2330_v37 = vld [vmem:[%s7846_s9 + $0x28] sm:$0xff]  ;;  %v2329_v38 = vld [vmem:[%s7846_s9 + $0x20] sm:$0xff] }
 0x5fe   : > { %6201 = vpow2.f32 %v1963_v40  ;;  %v2328_v40 = vld [vmem:[%s7846_s9 + $0x18] sm:$0xff] }
 0x605   : > { %v6196_v41 = vpop.eup %6195 }
 0x606   : > { %v1970_v43 = vsel %vm1201_vm7, %v6196_v41, 0.0 }
 0x607   : > { %v6198_v44 = vpop.eup %6197  ;;  %1971 = vadd.xlane.f32.xlu1 %v1970_v43  ;;  %v2326_v43 = vld [vmem:[%s7846_s9 + $0x8] sm:$0xff] }
 0x608   : > { %v1967_v45 = vsel %vm1201_vm7, %v6198_v44, 0.0 }
 0x609   : > { %v6200_v46 = vpop.eup %6199  ;;  %1968 = vadd.xlane.f32.xlu0 %v1967_v45  ;;  %v6368_v45 = vmov 0.0  }
 0x60a   : > { %v1976_v49 = vsel %vm1201_vm7, %v6200_v46, 0.0 }
 0x60b   : > { %v6202_v50 = vpop.eup %6201  ;;  %1977 = vadd.xlane.f32.xlu1 %v1976_v49 }
 0x60c   : > { %v1973_v51 = vsel %vm1201_vm7, %v6202_v50, 0.0 }
 0x60d   : > { %1974 = vadd.xlane.f32.xlu0 %v1973_v51 }
 0x690   : > { %v1972_v54 = vpop.xlane.xlu1 %1971 }
 0x691   : > { %6203 = vrcp.f32 %v1972_v54 }
 0x692   : > { %v1969_v55 = vpop.xlane.xlu0 %1968 }
 0x693   : > { %6205 = vrcp.f32 %v1969_v55 }
 0x694   : > { %v1978_v58 = vpop.xlane.xlu1 %1977 }
 0x695   : > { %6207 = vrcp.f32 %v1978_v58 }
 0x696   : > { %v1975_v59 = vpop.xlane.xlu0 %1974 }
 0x697   : > { %6209 = vrcp.f32 %v1975_v59 }
 0x69e   : > { %v6204_v60 = vpop.eup %6203 }
 0x69f   : > { %v1984_v1 = vmul.f32 %v6204_v60, %v6196_v41  ;;  %v2327_v41 = vld [vmem:[%s7846_s9 + $0x10] sm:$0xff] }
 0x6a0   : > { %v6206_v63 = vpop.eup %6205 }
 0x6a1   : > { %v1983_v0 = vmul.f32 %v6206_v63, %v6198_v44  ;;  %v2325_v44 = vld [vmem:[%s7846_s9] sm:$0xff] }
 0x6a2   : > { %v6208_v2 = vpop.eup %6207 }
 0x6a3   : > { %5770 = vmatprep.mubr.msk.f32.mxu0 %vm1201_vm7, %v1983_v0  ;;  %v1986_v8 = vmul.f32 %v6208_v2, %v6200_v46  ;;  %v5007_v0 = vld [vmem:[%s7845_s8] ss:$0 sm:$0xff] }
 0x6a4   : > { %v6210_v5 = vpop.eup %6209  ;;  %5771 = vmatmul.mubr.msk.f32.vlgmr.msra.gmra.mxu0 %vm1201_vm7, %v1984_v1 }
 0x6a5   : > { %v1985_v6 = vmul.f32 %v6210_v5, %v6202_v50  ;;  %5777 = vmatpush3.msra.mxu0 %v4998_v53 }
 0x6a6   : > { %5778 = vmatprep.subr.mxu0 %v4997_v4 }
 0x6a7   : > { %5773 = vmatprep.mubr.msk.f32.mxu0 %vm1201_vm7, %v1985_v6  ;;  %5779 = vmatpush3.msra.mxu0 %v4997_v4 }
 0x6a8   : > { %5774 = vmatmul.mubr.msk.f32.gmra.mxu0 %vm1201_vm7, %v1986_v8  ;;  %5780 = vmatprep.subr.mxu0 %v4996_v9 }
 0x6a9   : > { %5781 = vmatpush3.msra.mxu0 %v4996_v9 }
 0x764   : > { %v5772_v10 = vpop.f32.mrf.mxu0 }
 0x766   : > { %v2065_v20 = vpop.f32.mrf.mxu0 }
 0x767   : > { %5782 = vmatprep.mubr.msk.f32.mxu0 %vm7899_vm12, %v2065_v20  ;;  %vm7909_vm12 = vmmov %vm7902_vm1 }
 0x768   : > { %v5775_v12 = vpop.f32.mrf.mxu0  ;;  %5783 = vmatmul.mubr.msk.f32.vlgmr.msra.gmra.mxu0 %vm7900_vm13, %v5772_v10 }
 0x76a   : > { %v2075_v17 = vpop.f32.mrf.mxu0 }
 0x76b   : > { %5785 = vmatprep.mubr.msk.f32.mxu0 %vm7901_vm15, %v2075_v17  ;;  %v2564_v17 = vld [vmem:[%s7847_s10 + $0x70] sm:$0xff] }
 0x76c   : > { %5786 = vmatmul.mubr.msk.f32.gmra.mxu0 %vm7891_vm0, %v5775_v12  ;;  %v2565_v12 = vld [vmem:[%s7847_s10 + $0x78] sm:$0xff] }
 0x76d   : > { %2413 = vmatprep.mubr.f32.mxu0 %v6368_v45  ;;  %5800 = vmatprep.subr.mxu1 %v2565_v12 }
 0x76e   : > { %5801 = vmatpush3.msra.mxu1 %v2565_v12 }
 0x76f   : > { %5802 = vmatprep.subr.mxu1 %v2564_v17 }
 0x770   : > { %5803 = vmatpush3.msra.mxu1 %v2564_v17 }
 0x828   : > { %v5784_v21 = vpop.f32.mrf.mxu0 }
 0x829   : > { %v2269_v48 = vadd.f32 %v5796_v14, %v5784_v21  ;;  %v2563_v14 = vld [vmem:[%s7847_s10 + $0x68] sm:$0xff]  ;;  %v2561_v21 = vld [vmem:[%s7847_s10 + $0x58] sm:$0xff] }
 0x82a   : > { %v2166_v34 = vpop.f32.mrf.mxu0  ;;  %5804 = vmatprep.subr.mxu1 %v2563_v14 }
 0x82b   : > { %v6988_v42 = vadd.f32 %v2269_v48, %v6481_v18  ;;  %v2264_v36 = vadd.f32 %v2263_v15, %v2166_v34  ;;  %5805 = vmatpush3.msra.mxu1 %v2563_v14  ;;  %v2562_v15 = vld [vmem:[%s7847_s10 + $0x60] sm:$0xff]  ;;  %v2560_v48 = vld [vmem:[%s7847_s10 + $0x50] sm:$0xff] }
 0x82c   : > { %v5787_v47 = vpop.f32.mrf.mxu0  ;;  %5806 = vmatprep.subr.mxu1 %v2562_v15  ;;  %v2558_v34 = vld [vmem:[%s7847_s10 + $0x40] sm:$0xff] }
 0x82d   : > { %v6991_v22 = vadd.f32 %v2264_v36, %v6473_v13  ;;  %v2279_v23 = vadd.f32 %v5799_v39, %v5787_v47  ;;  %v2288_v52 = vmul.f32 %v6988_v42, %v6988_v42  ;;  %5807 = vmatpush3.msra.mxu1 %v2562_v15  ;;  %v2559_v39 = vld [vmem:[%s7847_s10 + $0x48] sm:$0xff]  ;;  %v2557_v36 = vld [vmem:[%s7847_s10 + $0x38] sm:$0xff]  ;;  %v2556_v47 = vld [vmem:[%s7847_s10 + $0x30] sm:$0xff] }
 0x82e   : > { %v2176_v25 = vpop.f32.mrf.mxu0  ;;  %5808 = vmatprep.subr.mxu1 %v2561_v21 }
 0x82f   : > { %v6996_v57 = vadd.f32 %v2279_v23, %v6483_v19  ;;  %v2274_v26 = vadd.f32 %v2273_v24, %v2176_v25  ;;  %v2294_v61 = vsel %vm7902_vm1, %v2288_v52, 0.0  ;;  %v2287_v18 = vmul.f32 %v6991_v22, %v6991_v22  ;;  %5809 = vmatpush3.msra.mxu1 %v2561_v21  ;;  %v2555_v23 = vld [vmem:[%s7847_s10 + $0x28] sm:$0xff]  ;;  %v2554_v52 = vld [vmem:[%s7847_s10 + $0x20] sm:$0xff]  ;;  %v2553_v24 = vld [vmem:[%s7847_s10 + $0x18] sm:$0xff] }
 0x830   : > { %2295 = vadd.xlane.f32.xlu1 %v2294_v61  ;;  %5810 = vmatprep.subr.mxu1 %v2560_v48  ;;  %v2552_v25 = vld [vmem:[%s7847_s10 + $0x10] sm:$0xff]  ;;  %v2550_v61 = vld [vmem:[%s7847_s10] sm:$0xff] }
 0x831   : > { %v7002_v62 = vadd.f32 %v2274_v26, %v6477_v16  ;;  %v2291_v13 = vsel %vm7903_vm5, %v2287_v18, 0.0  ;;  %v2290_v27 = vmul.f32 %v6996_v57, %v6996_v57  ;;  %v2336_v16 = vld [vmem:[%s7846_s9 + $0x58] sm:$0xff]  ;;  %5811 = vmatpush3.msra.mxu1 %v2560_v48  ;;  %v2551_v26 = vld [vmem:[%s7847_s10 + $0x8] sm:$0xff]  ;;  %vm7910_vm5 = vmmov %vm7906_vm2 }
 0x832   : > { %2292 = vadd.xlane.f32.xlu0 %v2291_v13  ;;  %2369 = vmatprep.subr.mxu0 %v2336_v16 }
 0x833   : > { %v2300_v28 = vsel %vm7904_vm8, %v2290_v27, 0.0  ;;  %v2289_v19 = vmul.f32 %v7002_v62, %v7002_v62  ;;  %2370 = vmatpush1.msra.mxu0 %v2335_v30  ;;  %5812 = vmatprep.subr.mxu1 %v2559_v39  ;;  %vm7911_vm8 = vmmov %vm7906_vm2 }
 0x834   : > { %2301 = vadd.xlane.f32.xlu1 %v2300_v28  ;;  %2371 = vmatprep.subr.mxu0 %v2334_v31 }
 0x835   : > { %v2297_v29 = vsel %vm7905_vm9, %v2289_v19, 0.0  ;;  %2372 = vmatpush1.msra.mxu0 %v2333_v32  ;;  %5813 = vmatpush3.msra.mxu1 %v2559_v39  ;;  %vm7912_vm9 = vmmov %vm7906_vm2 }
 0x836   : > { %2298 = vadd.xlane.f32.xlu0 %v2297_v29  ;;  %2373 = vmatprep.subr.mxu0 %v2332_v33 }
 0x837   : > { %2374 = vmatpush1.msra.mxu0 %v2331_v35  ;;  %5814 = vmatprep.subr.mxu1 %v2558_v34 }
 0x838   : > { %2375 = vmatprep.subr.mxu0 %v2330_v37  ;;  %5815 = vmatpush3.msra.mxu1 %v2558_v34 }
 0x839   : > { %2376 = vmatpush1.msra.mxu0 %v2329_v38  ;;  %5816 = vmatprep.subr.mxu1 %v2557_v36 }
 0x83a   : > { %2377 = vmatprep.subr.mxu0 %v2328_v40  ;;  %5817 = vmatpush3.msra.mxu1 %v2557_v36 }
 0x83b   : > { %2378 = vmatpush1.msra.mxu0 %v2327_v41  ;;  %5818 = vmatprep.subr.mxu1 %v2556_v47 }
 0x83c   : > { %2379 = vmatprep.subr.mxu0 %v2326_v43  ;;  %5819 = vmatpush3.msra.mxu1 %v2556_v47 }
 0x83d   : > { %2380 = vmatpush1.msra.mxu0 %v2325_v44  ;;  %5820 = vmatprep.subr.mxu1 %v2555_v23 }
 0x83e   : > { %5821 = vmatpush3.msra.mxu1 %v2555_v23 }
 0x83f   : > { %5822 = vmatprep.subr.mxu1 %v2554_v52 }
 0x840   : > { %5823 = vmatpush3.msra.mxu1 %v2554_v52 }
 0x841   : > { %5824 = vmatprep.subr.mxu1 %v2553_v24 }
 0x842   : > { %5825 = vmatpush3.msra.mxu1 %v2553_v24 }
 0x843   : > { %5826 = vmatprep.subr.mxu1 %v2552_v25 }
 0x844   : > { %5827 = vmatpush3.msra.mxu1 %v2552_v25 }
 0x845   : > { %5828 = vmatprep.subr.mxu1 %v2551_v26 }
 0x846   : > { %5829 = vmatpush3.msra.mxu1 %v2551_v26 }
 0x847   : > { %5830 = vmatprep.subr.mxu1 %v2550_v61 }
 0x848   : > { %5831 = vmatpush3.msra.mxu1 %v2550_v61 }
 0x8b9   : > { %v2296_v46 = vpop.xlane.xlu1 %2295 }
 0x8ba   : > { %v2304_v49 = vmax.f32 %v2296_v46, 1e-24 }
 0x8bb   : > { %v2293_v50 = vpop.xlane.xlu0 %2292 }
 0x8bc   : > { %v2303_v51 = vmax.f32 %v2293_v50, 1e-24  ;;  %6211 = vrsqrt.f32 %v2304_v49 }
 0x8bd   : > { %v2302_v53 = vpop.xlane.xlu1 %2301 }
 0x8be   : > { %6213 = vrsqrt.f32 %v2303_v51  ;;  %v2306_v58 = vmax.f32 %v2302_v53, 1e-24 }
 0x8bf   : > { %v2299_v54 = vpop.xlane.xlu0 %2298 }
 0x8c0   : > { %v2305_v55 = vmax.f32 %v2299_v54, 1e-24 }
 0x8c2   : > { %6215 = vrsqrt.f32 %v2305_v55 }
 0x8c3   : > { %6217 = vrsqrt.f32 %v2306_v58 }
 0x8c9   : > { %v6212_v59 = vpop.eup %6211 }
 0x8ca   : > { %v2312_v2 = vmul.f32 %v6212_v59, %v6988_v42 }
 0x8cb   : > { %v6214_v60 = vpop.eup %6213 }
 0x8cc   : > { %v2311_v63 = vmul.f32 %v6214_v60, %v6991_v22  ;;  %v2322_v5 = vmul.f32 %v5007_v0, %v2312_v2 }
 0x8ce   : > { %v2321_v1 = vmul.f32 %v5007_v0, %v2311_v63 }
 0x8cf   : > { %v6216_v4 = vpop.eup %6215 }
 0x8d0   : > { %5008 = vmatmul.mubr.msk.f32.vlgmr.msra.gmra.mxu0 %vm7906_vm2, %v2321_v1  ;;  %v2313_v6 = vmul.f32 %v6216_v4, %v7002_v62  ;;  %v6218_v8 = vpop.eup %6217 }
 0x8d1   : > { %2419 = vmatprep.mubr.f32.mxu0 %v6368_v45  ;;  %v2314_v10 = vmul.f32 %v6218_v8, %v6996_v57 }
 0x8d2   : > { %v2323_v9 = vmul.f32 %v5007_v0, %v2313_v6 }
 0x8d3   : > { %v2324_v20 = vmul.f32 %v5007_v0, %v2314_v10 }
 0x8d4   : > { %5009 = vmatmul.mubr.msk.f32.gmra.mxu0 %vm7907_vm6, %v2322_v5  ;;  %vm7913_vm6 = vmmov %vm7906_vm2 }
 0x8d5   : > { %2425 = vmatprep.mubr.f32.mxu0 %v6368_v45 }
 0x8d8   : > { %5010 = vmatmul.mubr.msk.f32.gmra.mxu0 %vm7908_vm10, %v2323_v9  ;;  %vm7914_vm10 = vmmov %vm7906_vm2 }
 0x8d9   : > { %2431 = vmatprep.mubr.f32.mxu0 %v6368_v45 }
 0x8dc   : > { %5011 = vmatmul.mubr.msk.f32.gmra.mxu0 %vm7909_vm12, %v2324_v20  ;;  %vm7915_vm12 = vmmov %vm7906_vm2 }
 0x990   : > { %v7110_v18 = vpop.f32.mrf.mxu0 }
 0x992   : > { %v7112_v13 = vpop.f32.mrf.mxu0 }
 0x993   : > { %v7115_v27 = vmul.f32 0.70710677, %v7112_v13 }
 0x994   : > { %v7117_v28 = vpop.f32.mrf.mxu0 }
 0x995   : > { %v2442_v19 = vand.u32 2147483647, %v7115_v27  ;;  %vm2522_vm13 = vcmp.ge.f32.partialorder %v7115_v27, 0.0 }
 0x996   : > { %v7120_v29 = vpop.f32.mrf.mxu0 }
 0x997   : > { %v2446_v16 = vmul.f32 0.3275911, %v2442_v19  ;;  %v7123_v30 = vmul.f32 0.70710677, %v7120_v29  ;;  %v2498_v49 = vsub.f32 0.0, %v2442_v19  ;;  %v2535_v27 = vmul.f32 0.5, %v7120_v29 }
 0x998   : > { %v7125_v31 = vpop.f32.mrf.mxu0 }
 0x999   : > { %v2450_v32 = vadd.f32 1.0, %v2446_v16  ;;  %v2443_v33 = vand.u32 2147483647, %v7123_v30  ;;  %v2502_v55 = vmul.f32 %v2498_v49, %v2442_v19  ;;  %vm2523_vm15 = vcmp.ge.f32.partialorder %v7123_v30, 0.0 }
 0x99a   : > { %v7128_v35 = vpop.f32.mrf.mxu0 }
 0x99b   : > { %6219 = vrcp.f32 %v2450_v32  ;;  %v2447_v37 = vmul.f32 0.3275911, %v2443_v33  ;;  %v7131_v38 = vmul.f32 0.70710677, %v7128_v35  ;;  %v2499_v58 = vsub.f32 0.0, %v2443_v33 }
 0x99c   : > { %v7133_v40 = vpop.f32.mrf.mxu0  ;;  %v2506_v63 = vmul.f32 1.442695, %v2502_v55 }
 0x99d   : > { %v2451_v41 = vadd.f32 1.0, %v2447_v37  ;;  %v2444_v43 = vand.u32 2147483647, %v7131_v38  ;;  %v2503_v1 = vmul.f32 %v2499_v58, %v2443_v33  ;;  %vm2524_vm0 = vcmp.ge.f32.partialorder %v7131_v38, 0.0 }
 0x99e   : > { %v7136_v44 = vpop.f32.mrf.mxu0 }
 0x99f   : > { %6221 = vrcp.f32 %v2451_v41  ;;  %v7139_v46 = vmul.f32 0.70710677, %v7136_v44  ;;  %v2448_v50 = vmul.f32 0.3275911, %v2444_v43  ;;  %v2500_v2 = vsub.f32 0.0, %v2444_v43 }
 0x9a0   : > { %v2508_v9 = vmul.f32 1.442695, %v2503_v1 }
 0x9a1   : > { %v2445_v51 = vand.u32 2147483647, %v7139_v46  ;;  %v2452_v53 = vadd.f32 1.0, %v2448_v50  ;;  %v2504_v20 = vmul.f32 %v2500_v2, %v2444_v43  ;;  %vm2525_vm1 = vcmp.ge.f32.partialorder %v7139_v46, 0.0 }
 0x9a3   : > { %v2449_v54 = vmul.f32 0.3275911, %v2445_v51  ;;  %6223 = vrcp.f32 %v2452_v53  ;;  %v2501_v10 = vsub.f32 0.0, %v2445_v51  ;;  %v2510_v34 = vmul.f32 1.442695, %v2504_v20 }
 0x9a5   : > { %v2453_v59 = vadd.f32 1.0, %v2449_v54  ;;  %v2505_v48 = vmul.f32 %v2501_v10, %v2445_v51 }
 0x9a7   : > { %6225 = vrcp.f32 %v2453_v59  ;;  %v2512_v61 = vmul.f32 1.442695, %v2505_v48 }
 0x9a8   : > { %v6220_v60 = vpop.eup %6219  ;;  %6227 = vpow2.f32 %v2506_v63 }
 0x9a9   : > { %v2462_v0 = vmul.f32 1.0614054, %v6220_v60  ;;  %6229 = vpow2.f32 %v2508_v9 }
 0x9aa   : > { %6231 = vpow2.f32 %v2510_v34 }
 0x9ab   : > { %v5012_v4 = vadd.f32 -1.4531521, %v2462_v0  ;;  %6233 = vpow2.f32 %v2512_v61 }
 0x9ac   : > { %v6222_v5 = vpop.eup %6221 }
 0x9ad   : > { %v2470_v6 = vmul.f32 %v6220_v60, %v5012_v4  ;;  %v2463_v8 = vmul.f32 1.0614054, %v6222_v5 }
 0x9af   : > { %v2474_v12 = vadd.f32 1.4214138, %v2470_v6  ;;  %v5013_v17 = vadd.f32 -1.4531521, %v2463_v8 }
 0x9b0   : > { %v6224_v14 = vpop.eup %6223 }
 0x9b1   : > { %v2478_v15 = vmul.f32 %v6220_v60, %v2474_v12  ;;  %v2471_v21 = vmul.f32 %v6222_v5, %v5013_v17  ;;  %v2464_v39 = vmul.f32 1.0614054, %v6224_v14  ;;  %v2534_v12 = vmul.f32 0.5, %v7112_v13 }
 0x9b3   : > { %v5016_v36 = vadd.f32 -0.28449672, %v2478_v15  ;;  %v2475_v47 = vadd.f32 1.4214138, %v2471_v21  ;;  %v5014_v52 = vadd.f32 -1.4531521, %v2464_v39 }
 0x9b4   : > { %v6226_v23 = vpop.eup %6225 }
 0x9b5   : > { %v2486_v24 = vmul.f32 %v6220_v60, %v5016_v36  ;;  %v2479_v25 = vmul.f32 %v6222_v5, %v2475_v47  ;;  %v2465_v26 = vmul.f32 1.0614054, %v6226_v23  ;;  %v2472_v19 = vmul.f32 %v6224_v14, %v5014_v52  ;;  %v6228_v41 = vpop.eup %6227 }
 0x9b6   : > { %v6230_v1 = vpop.eup %6229 }
 0x9b7   : > { %v2490_v16 = vadd.f32 0.2548296, %v2486_v24  ;;  %v5017_v32 = vadd.f32 -0.28449672, %v2479_v25  ;;  %v5015_v33 = vadd.f32 -1.4531521, %v2465_v26  ;;  %v6232_v21 = vpop.eup %6231 }
 0x9b8   : > { %v2476_v37 = vadd.f32 1.4214138, %v2472_v19  ;;  %v6234_v52 = vpop.eup %6233 }
 0x9b9   : > { %v2494_v43 = vmul.f32 %v6220_v60, %v2490_v16  ;;  %v2487_v49 = vmul.f32 %v6222_v5, %v5017_v32  ;;  %v2473_v50 = vmul.f32 %v6226_v23, %v5015_v33  ;;  %v2536_v32 = vmul.f32 0.5, %v7128_v35 }
 0x9ba   : > { %v2480_v51 = vmul.f32 %v6224_v14, %v2476_v37 }
 0x9bb   : > { %v2514_v53 = vmul.f32 %v6228_v41, %v2494_v43  ;;  %v2491_v54 = vadd.f32 0.2548296, %v2487_v49  ;;  %v2477_v55 = vadd.f32 1.4214138, %v2473_v50 }
 0x9bc   : > { %v5018_v58 = vadd.f32 -0.28449672, %v2480_v51 }
 0x9bd   : > { %v2518_v59 = vsub.f32 1.0, %v2514_v53  ;;  %v2495_v63 = vmul.f32 %v6222_v5, %v2491_v54  ;;  %v2481_v0 = vmul.f32 %v6226_v23, %v2477_v55 }
 0x9be   : > { %v2488_v2 = vmul.f32 %v6224_v14, %v5018_v58 }
 0x9bf   : > { %v2526_v4 = vsub.f32 0.0, %v2518_v59  ;;  %v2515_v6 = vmul.f32 %v6230_v1, %v2495_v63  ;;  %v5019_v8 = vadd.f32 -0.28449672, %v2481_v0  ;;  %v5026_v0 = vld [vmem:[%s7843_s6 + $0x200] sm:$0xff] }
 0x9c0   : > { %v2492_v9 = vadd.f32 0.2548296, %v2488_v2  ;;  %v5046_v1 = vld [vmem:[%s7843_s6 + $0x260] sm:$0xff]  ;;  %v5025_v2 = vld [vmem:[%s7843_s6 + $0x1f8] sm:$0xff] }
 0x9c1   : > { %v2530_v60 = vsel %vm2522_vm13, %v2518_v59, %v2526_v4  ;;  %v2519_v10 = vsub.f32 1.0, %v2515_v6  ;;  %v2489_v20 = vmul.f32 %v6226_v23, %v5019_v8  ;;  %v5045_v4 = vld [vmem:[%s7843_s6 + $0x258] sm:$0xff]  ;;  %v5024_v6 = vld [vmem:[%s7843_s6 + $0x1f0] sm:$0xff]  ;;  %vm7916_vm13 = vmmov %vm7906_vm2 }
 0x9c2   : > { %v2538_v17 = vadd.f32 1.0, %v2530_v60  ;;  %v2496_v15 = vmul.f32 %v6224_v14, %v2492_v9  ;;  %v5044_v8 = vld [vmem:[%s7843_s6 + $0x250] sm:$0xff]  ;;  %v5023_v9 = vld [vmem:[%s7843_s6 + $0x1e8] sm:$0xff] }
 0x9c3   : > { %v2527_v48 = vsub.f32 0.0, %v2519_v10  ;;  %v2493_v39 = vadd.f32 0.2548296, %v2489_v20  ;;  %v5043_v60 = vld [vmem:[%s7843_s6 + $0x248] sm:$0xff]  ;;  %v5042_v20 = vld [vmem:[%s7843_s6 + $0x240] sm:$0xff] }
 0x9c4   : > { %v2542_v5 = vmul.f32 %v2538_v17, %v2534_v12  ;;  %v2516_v34 = vmul.f32 %v6232_v21, %v2496_v15  ;;  %v5037_v12 = vld [vmem:[%s7843_s6 + $0x238] sm:$0xff]  ;;  %v5067_v17 = vld [vmem:[%s7843_s6 + $0x2c8] sm:$0xff] }
 0x9c5   : > { %v2531_v36 = vsel %vm2523_vm15, %v2519_v10, %v2527_v48  ;;  %v2497_v47 = vmul.f32 %v6226_v23, %v2493_v39  ;;  %v5022_v10 = vld [vmem:[%s7843_s6 + $0x1e0] sm:$0xff]  ;;  %vm7917_vm15 = vmmov %vm7906_vm2 }
 0x9c6   : > { %v2539_v24 = vadd.f32 1.0, %v2531_v36  ;;  %v2520_v25 = vsub.f32 1.0, %v2516_v34  ;;  %v2546_v26 = vmul.f32 %v2542_v5, %v7110_v18  ;;  %v2537_v18 = vmul.f32 0.5, %v7136_v44 }
 0x9c7   : > { %v2517_v61 = vmul.f32 %v6234_v52, %v2497_v47 }
 0x9c8   : > { %v2543_v13 = vmul.f32 %v2539_v24, %v2535_v27  ;;  %v2528_v19 = vsub.f32 0.0, %v2520_v25  ;;  %5832 = vmatprep.mubr.f32.mxu1 %v2546_v26 }
 0x9c9   : > { %v2521_v14 = vsub.f32 1.0, %v2517_v61 }
 0x9ca   : > { %v2547_v16 = vmul.f32 %v2543_v13, %v7117_v28  ;;  %v2532_v30 = vsel %vm2524_vm0, %v2520_v25, %v2528_v19  ;;  %v5021_v25 = vld [vmem:[%s7842_s5 + $0x1] ss:$0 sm:$0xff]  ;;  %v5036_v19 = vld [vmem:[%s7843_s6 + $0x230] sm:$0xff]  ;;  %vm7918_vm0 = vmmov %vm7906_vm2 }
 0x9cb   : > { %v2540_v23 = vadd.f32 1.0, %v2532_v30  ;;  %v2529_v33 = vsub.f32 0.0, %v2521_v14  ;;  %v5035_v30 = vld [vmem:[%s7843_s6 + $0x228] sm:$0xff] }
 0x9cc   : > { %5833 = vmatmul.mubr.f32.vlgmr.msra.gmra.mxu1 %v2547_v16 }
 0x9cd   : > { %v2544_v29 = vmul.f32 %v2540_v23, %v2536_v32  ;;  %v2533_v37 = vsel %vm2525_vm1, %v2521_v14, %v2529_v33  ;;  %v5066_v14 = vld [vmem:[%s7843_s6 + $0x2c0] sm:$0xff]  ;;  %v5065_v32 = vld [vmem:[%s7843_s6 + $0x2b8] sm:$0xff]  ;;  %vm7919_vm1 = vmmov %vm7918_vm0 }
 0x9ce   : > { %v2541_v41 = vadd.f32 1.0, %v2533_v37  ;;  %v5034_v37 = vld [vmem:[%s7843_s6 + $0x220] sm:$0xff] }
 0x9cf   : > { %v2548_v43 = vmul.f32 %v2544_v29, %v7125_v31 }
 0x9d0   : > { %v2545_v49 = vmul.f32 %v2541_v41, %v2537_v18  ;;  %v5064_v18 = vld [vmem:[%s7843_s6 + $0x2b0] sm:$0xff] }
 0x9d1   : > { %5835 = vmatprep.mubr.f32.mxu1 %v2548_v43  ;;  %v5033_v43 = vld [vmem:[%s7843_s6 + $0x218] sm:$0xff] }
 0x9d2   : > { %v2549_v38 = vmul.f32 %v2545_v49, %v7133_v40 }
 0x9d4   : > { %5836 = vmatmul.mubr.f32.gmra.mxu1 %v2549_v38  ;;  %v5063_v38 = vld [vmem:[%s7843_s6 + $0x2a8] sm:$0xff] }
 0xa8c   : > { %v5834_v28 = vpop.f32.mrf.mxu1 }
 0xa8d   : > { %v7155_v35 = vadd.f32 %v5834_v28, %v6988_v42  ;;  %v5032_v28 = vld [vmem:[%s7843_s6 + $0x210] sm:$0xff] }
 0xa8e   : > { %v2632_v50 = vpop.f32.mrf.mxu1 }
 0xa8f   : > { %v7158_v46 = vadd.f32 %v2632_v50, %v6991_v22  ;;  %v2658_v51 = vmul.f32 %v7155_v35, %v7155_v35  ;;  %v5062_v50 = vld [vmem:[%s7843_s6 + $0x2a0] sm:$0xff] }
 0xa91   : > { %v2664_v44 = vsel %vm7910_vm5, %v2658_v51, 0.0  ;;  %v2657_v31 = vmul.f32 %v7158_v46, %v7158_v46  ;;  %vm7920_vm5 = vmmov %vm7918_vm0  ;;  %v5057_v51 = vld [vmem:[%s7843_s6 + $0x298] sm:$0xff] }
 0xa92   : > { %2665 = vadd.xlane.f32.xlu1 %v2664_v44  ;;  %v5056_v44 = vld [vmem:[%s7843_s6 + $0x290] sm:$0xff] }
 0xa93   : > { %v2661_v40 = vsel %vm7911_vm8, %v2657_v31, 0.0  ;;  %vm7921_vm8 = vmmov %vm7918_vm0  ;;  %v5055_v31 = vld [vmem:[%s7843_s6 + $0x288] sm:$0xff] }
 0xa94   : > { %2662 = vadd.xlane.f32.xlu0 %v2661_v40  ;;  %v5837_v53 = vpop.f32.mrf.mxu1  ;;  %v5054_v40 = vld [vmem:[%s7843_s6 + $0x280] sm:$0xff] }
 0xa95   : > { %v7167_v42 = vadd.f32 %v5837_v53, %v6996_v57  ;;  %v5027_v57 = vld [vmem:[%s7843_s6 + $0x208] sm:$0xff]  ;;  %v5053_v53 = vld [vmem:[%s7843_s6 + $0x278] sm:$0xff] }
 0xa96   : > { %v2642_v54 = vpop.f32.mrf.mxu1  ;;  %5838 = vmatprep.subr.mxu0 %v5027_v57 }
 0xa97   : > { %v7170_v22 = vadd.f32 %v2642_v54, %v7002_v62  ;;  %v2660_v55 = vmul.f32 %v7167_v42, %v7167_v42  ;;  %v5047_v62 = vld [vmem:[%s7843_s6 + $0x268] sm:$0xff]  ;;  %5839 = vmatpush3.msra.mxu0 %v5027_v57  ;;  %v5052_v54 = vld [vmem:[%s7843_s6 + $0x270] sm:$0xff] }
 0xa98   : > { %5874 = vmatprep.subr.mxu1 %v5047_v62  ;;  %5840 = vmatprep.subr.mxu0 %v5026_v0 }
 0xa99   : > { %v2670_v58 = vsel %vm7912_vm9, %v2660_v55, 0.0  ;;  %v2659_v59 = vmul.f32 %v7170_v22, %v7170_v22  ;;  %5875 = vmatpush3.msra.mxu1 %v5047_v62  ;;  %5841 = vmatpush3.msra.mxu0 %v5026_v0  ;;  %vm7922_vm9 = vmmov %vm7918_vm0 }
 0xa9a   : > { %2671 = vadd.xlane.f32.xlu1 %v2670_v58  ;;  %5876 = vmatprep.subr.mxu1 %v5046_v1 }
 0xa9b   : > { %v2667_v63 = vsel %vm7906_vm2, %v2659_v59, 0.0  ;;  %5842 = vmatprep.subr.mxu0 %v5025_v2  ;;  %5877 = vmatpush3.msra.mxu1 %v5046_v1  ;;  %vm7923_vm2 = vmmov %vm7918_vm0 }
 0xa9c   : > { %2668 = vadd.xlane.f32.xlu0 %v2667_v63  ;;  %5843 = vmatpush3.msra.mxu0 %v5025_v2 }
 0xa9d   : > { %5878 = vmatprep.subr.mxu1 %v5045_v4  ;;  %5844 = vmatprep.subr.mxu0 %v5024_v6 }
 0xa9e   : > { %5879 = vmatpush3.msra.mxu1 %v5045_v4  ;;  %5845 = vmatpush3.msra.mxu0 %v5024_v6 }
 0xa9f   : > { %5880 = vmatprep.subr.mxu1 %v5044_v8  ;;  %5846 = vmatprep.subr.mxu0 %v5023_v9 }
 0xaa0   : > { %5881 = vmatpush3.msra.mxu1 %v5044_v8  ;;  %5847 = vmatpush3.msra.mxu0 %v5023_v9  ;;  %v7328_v8 = vld [vmem:[%s7840_s3] sm:$0xff] }
 0xaa1   : > { %5882 = vmatprep.subr.mxu1 %v5043_v60  ;;  %5848 = vmatprep.subr.mxu0 %v5022_v10 }
 0xaa2   : > { %5883 = vmatpush3.msra.mxu1 %v5043_v60  ;;  %5849 = vmatpush3.msra.mxu0 %v5022_v10  ;;  %v7334_v60 = vld [vmem:[%s7841_s4] sm:$0xff] }
 0xaa3   : > { %5884 = vmatprep.subr.mxu1 %v5042_v20  ;;  %5856 = vmatprep.subr.mxu0 %v5037_v12 }
 0xaa4   : > { %5885 = vmatpush3.msra.mxu1 %v5042_v20 }
 0xaa5   : > { %5910 = vmatprep.subr.mxu1 %v5067_v17 }
 0xb1b   : > { %v2666_v15 = vpop.xlane.xlu1 %2665 }
 0xb1c   : > { %v2674_v21 = vmax.f32 %v2666_v15, 1e-24 }
 0xb1d   : > { %v2663_v48 = vpop.xlane.xlu0 %2662 }
 0xb1e   : > { %6235 = vrsqrt.f32 %v2674_v21  ;;  %v2673_v39 = vmax.f32 %v2663_v48, 1e-24 }
 0xb20   : > { %6237 = vrsqrt.f32 %v2673_v39 }
 0xb23   : > { %v2672_v5 = vpop.xlane.xlu1 %2671 }
 0xb24   : > { %v2676_v34 = vmax.f32 %v2672_v5, 1e-24 }
 0xb25   : > { %v2669_v36 = vpop.xlane.xlu0 %2668 }
 0xb26   : > { %6239 = vrsqrt.f32 %v2676_v34  ;;  %v2675_v47 = vmax.f32 %v2669_v36, 1e-24  ;;  %v7341_v36 = vld [vmem:[%s7840_s3 + $0x18] sm:$0xff] }
 0xb28   : > { %6241 = vrsqrt.f32 %v2675_v47 }
 0xb2b   : > { %v6236_v52 = vpop.eup %6235 }
 0xb2c   : > { %v2682_v24 = vmul.f32 %v6236_v52, %v7155_v35  ;;  %v7347_v52 = vld [vmem:[%s7841_s4 + $0x18] sm:$0xff] }
 0xb2d   : > { %v6238_v27 = vpop.eup %6237 }
 0xb2e   : > { %v2681_v26 = vmul.f32 %v6238_v27, %v7158_v46  ;;  %v7227_v13 = vmul.f32 %v5021_v25, %v2682_v24 }
 0xb30   : > { %v7225_v61 = vmul.f32 %v5021_v25, %v2681_v26 }
 0xb32   : > { %5850 = vmatprep.mubr.msk.f32.mxu0 %vm7913_vm6, %v7225_v61  ;;  %5886 = vmatprep.mubr.msk.f32.mxu1 %vm7914_vm10, %v7225_v61  ;;  %vm7924_vm6 = vmmov %vm7918_vm0 }
 0xb33   : > { %v6240_v16 = vpop.eup %6239  ;;  %5851 = vmatmul.mubr.msk.f32.vlgmr.msra.gmra.mxu0 %vm7915_vm12, %v7227_v13  ;;  %5887 = vmatmul.mubr.msk.f32.vlgmr.msra.gmra.mxu1 %vm7916_vm13, %v7227_v13  ;;  %vm7925_vm10 = vmmov %vm7918_vm0 }
 0xb34   : > { %5857 = vmatpush3.msra.mxu0 %v5037_v12  ;;  %5911 = vmatpush3.msra.mxu1 %v5067_v17  ;;  %v2684_v33 = vmul.f32 %v6240_v16, %v7167_v42  ;;  %vm7926_vm12 = vmmov %vm7918_vm0 }
 0xb35   : > { %v6242_v23 = vpop.eup %6241  ;;  %5858 = vmatprep.subr.mxu0 %v5036_v19  ;;  %5912 = vmatprep.subr.mxu1 %v5066_v14  ;;  %vm7927_vm13 = vmmov %vm7918_vm0 }
 0xb36   : > { %v2683_v29 = vmul.f32 %v6242_v23, %v7170_v22  ;;  %5859 = vmatpush3.msra.mxu0 %v5036_v19  ;;  %5913 = vmatpush3.msra.mxu1 %v5066_v14  ;;  %v7262_v49 = vmul.f32 %v5021_v25, %v2684_v33  ;;  %v7359_v14 = vld [vmem:[%s7841_s4 + $0x10] sm:$0xff]  ;;  %v7373_v33 = vld [vmem:[%s7840_s3 + $0x8] sm:$0xff] }
 0xb37   : > { %5860 = vmatprep.subr.mxu0 %v5035_v30  ;;  %5914 = vmatprep.subr.mxu1 %v5065_v32 }
 0xb38   : > { %v7257_v41 = vmul.f32 %v5021_v25, %v2683_v29  ;;  %5861 = vmatpush3.msra.mxu0 %v5035_v30  ;;  %5915 = vmatpush3.msra.mxu1 %v5065_v32  ;;  %v7353_v25 = vld [vmem:[%s7840_s3 + $0x10] sm:$0xff]  ;;  %v7365_v30 = vld [vmem:[%s7841_s4 + $0x8] sm:$0xff] }
 0xb39   : > { %5862 = vmatprep.subr.mxu0 %v5034_v37  ;;  %5916 = vmatprep.subr.mxu1 %v5064_v18 }
 0xb3a   : > { %5863 = vmatpush3.msra.mxu0 %v5034_v37  ;;  %5853 = vmatprep.mubr.msk.f32.mxu0 %vm7917_vm15, %v7257_v41  ;;  %vm7928_vm15 = vmmov %vm7918_vm0 }
 0xb3b   : > { %5864 = vmatprep.subr.mxu0 %v5033_v43  ;;  %5889 = vmatprep.mubr.msk.f32.mxu1 %vm7918_vm0, %v7257_v41 }
 0xb3c   : > { %5917 = vmatpush3.msra.mxu1 %v5064_v18  ;;  %5854 = vmatmul.mubr.msk.f32.gmra.mxu0 %vm7919_vm1, %v7262_v49  ;;  %vm7929_vm1 = vmmov %vm7918_vm0 }
 0xb3d   : > { %5865 = vmatpush3.msra.mxu0 %v5033_v43  ;;  %5890 = vmatmul.mubr.msk.f32.gmra.mxu1 %vm7920_vm5, %v7262_v49  ;;  %vm7930_vm5 = vmmov %vm7918_vm0 }
 0xb3e   : > { %5918 = vmatprep.subr.mxu1 %v5063_v38  ;;  %5866 = vmatprep.subr.mxu0 %v5032_v28 }
 0xb3f   : > { %5868 = vmatprep.mubr.msk.f32.mxu0 %vm7921_vm8, %v7225_v61  ;;  %5919 = vmatpush3.msra.mxu1 %v5063_v38  ;;  %vm7931_vm8 = vmmov %vm7918_vm0 }
 0xb40   : > { %5922 = vmatprep.mubr.msk.f32.mxu1 %vm7922_vm9, %v7225_v61  ;;  %5867 = vmatpush3.msra.mxu0 %v5032_v28  ;;  %vm7932_vm9 = vcmask 195584  }
 0xb41   : > { %5920 = vmatprep.subr.mxu1 %v5062_v50  ;;  %5892 = vmatprep.subr.mxu0 %v5057_v51 }
 0xb42   : > { %5921 = vmatpush3.msra.mxu1 %v5062_v50  ;;  %5869 = vmatmul.mubr.msk.f32.vlgmr.msra.gmra.mxu0 %vm7923_vm2, %v7227_v13  ;;  %vm7933_vm2 = vmmov %vm7932_vm9 }
 0xb43   : > { %5893 = vmatpush3.msra.mxu0 %v5057_v51  ;;  %5923 = vmatmul.mubr.msk.f32.vlgmr.msra.gmra.mxu1 %vm7924_vm6, %v7227_v13  ;;  %vm7934_vm6 = vmmov %vm7933_vm2  ;;  %v5102_v51 = vld [vmem:[%s7843_s6 + $0x328] sm:$0xff] }
 0xb44   : > { %5871 = vmatprep.mubr.msk.f32.mxu0 %vm7925_vm10, %v7257_v41  ;;  %5894 = vmatprep.subr.mxu0 %v5056_v44  ;;  %vm7935_vm10 = vmmov %vm7933_vm2 }
 0xb45   : > { %5925 = vmatprep.mubr.msk.f32.mxu1 %vm7926_vm12, %v7257_v41  ;;  %5895 = vmatpush3.msra.mxu0 %v5056_v44  ;;  %vm7936_vm12 = vmmov %vm7933_vm2 }
 0xb46   : > { %5896 = vmatprep.subr.mxu0 %v5055_v31  ;;  %5872 = vmatmul.mubr.msk.f32.gmra.mxu0 %vm7927_vm13, %v7262_v49  ;;  %vm7937_vm13 = vmmov %vm7933_vm2 }
 0xb47   : > { %5897 = vmatpush3.msra.mxu0 %v5055_v31  ;;  %5926 = vmatmul.mubr.msk.f32.gmra.mxu1 %vm7928_vm15, %v7262_v49  ;;  %vm7938_vm15 = vmmov %vm7933_vm2 }
 0xb48   : > { %5898 = vmatprep.subr.mxu0 %v5054_v40  ;;  %5904 = vmatprep.mubr.msk.f32.mxu0 %vm7918_vm0, %v7225_v61  ;;  %vm7939_vm0 = vmmov %vm7933_vm2 }
 0xb49   : > { %5899 = vmatpush3.msra.mxu0 %v5054_v40 }
 0xb4a   : > { %5900 = vmatprep.subr.mxu0 %v5053_v53 }
 0xb4b   : > { %5901 = vmatpush3.msra.mxu0 %v5053_v53 }
 0xb4c   : > { %5902 = vmatprep.subr.mxu0 %v5052_v54 }
 0xb4d   : > { %5903 = vmatpush3.msra.mxu0 %v5052_v54 }
 0xb4e   : > { %5905 = vmatmul.mubr.msk.f32.vlgmr.msra.gmra.mxu0 %vm7929_vm1, %v7227_v13  ;;  %vm7940_vm1 = vmmov %vm7939_vm0 }
 0xb4f   : > { %5907 = vmatprep.mubr.msk.f32.mxu0 %vm7930_vm5, %v7257_v41  ;;  %vm7941_vm5 = vmmov %vm7939_vm0 }
 0xb52   : > { %5908 = vmatmul.mubr.msk.f32.gmra.mxu0 %vm7931_vm8, %v7262_v49  ;;  %vm7942_vm8 = vmmov %vm7939_vm0 }
 0xbf3   : > { %v5852_v55 = vpop.f32.mrf.mxu0  ;;  %v5888_v58 = vpop.f32.mrf.mxu1 }
 0xbf4   : > { %v2996_v29 = vmul.f32 %v7373_v33, %v5888_v58  ;;  %v2800_v44 = vmul.f32 %v7373_v33, %v5852_v55  ;;  %v5101_v58 = vld [vmem:[%s7843_s6 + $0x320] sm:$0xff]  ;;  %v5100_v55 = vld [vmem:[%s7843_s6 + $0x318] sm:$0xff] }
 0xbf5   : > { %v2780_v59 = vpop.f32.mrf.mxu0  ;;  %v2976_v63 = vpop.f32.mrf.mxu1 }
 0xbf6   : > { %v2799_v9 = vmul.f32 %v7328_v8, %v2780_v59  ;;  %v2995_v43 = vmul.f32 %v7328_v8, %v2976_v63 }
 0xbfc   : > { %v7323_v57 = vpop.f32.mrf.mxu0 }
 0xbfd   : > { %v5891_v62 = vpop.f32.mrf.mxu1  ;;  %v2802_v59 = vmul.f32 %v7341_v36, %v7323_v57  ;;  %v5098_v57 = vld [vmem:[%s7843_s6 + $0x308] sm:$0xff] }
 0xbfe   : > { %v2790_v0 = vpop.f32.mrf.mxu0  ;;  %v2998_v47 = vmul.f32 %v7341_v36, %v5891_v62  ;;  %v5099_v62 = vld [vmem:[%s7843_s6 + $0x310] sm:$0xff] }
 0xbff   : > { %v2986_v1 = vpop.f32.mrf.mxu1  ;;  %v2801_v31 = vmul.f32 %v7353_v25, %v2790_v0  ;;  %v5097_v0 = vld [vmem:[%s7843_s6 + $0x300] sm:$0xff] }
 0xc00   : > { %v2997_v26 = vmul.f32 %v7353_v25, %v2986_v1  ;;  %v5122_v1 = vld [vmem:[%s7843_s6 + $0x388] sm:$0xff] }
 0xc02   : > { %v5870_v2 = vpop.f32.mrf.mxu0 }
 0xc03   : > { %v5924_v4 = vpop.f32.mrf.mxu1  ;;  %v2896_v28 = vmul.f32 %v7365_v30, %v5870_v2  ;;  %v5121_v2 = vld [vmem:[%s7843_s6 + $0x380] sm:$0xff] }
 0xc04   : > { %v2876_v6 = vpop.f32.mrf.mxu0 }
 0xc05   : > { %v2895_v10 = vmul.f32 %v7334_v60, %v2876_v6  ;;  %v3172_v20 = vpop.f32.mrf.mxu1  ;;  %v2900_v40 = vadd.f32 %v2896_v28, %v2800_v44  ;;  %v5119_v6 = vld [vmem:[%s7843_s6 + $0x370] sm:$0xff] }
 0xc06   : > { %v5873_v15 = vpop.f32.mrf.mxu0 }
 0xc07   : > { %v2899_v12 = vadd.f32 %v2895_v10, %v2799_v9  ;;  %v5927_v17 = vpop.f32.mrf.mxu1  ;;  %v2898_v53 = vmul.f32 %v7347_v52, %v5873_v15  ;;  %v5118_v9 = vld [vmem:[%s7843_s6 + $0x368] sm:$0xff]  ;;  %v5117_v10 = vld [vmem:[%s7843_s6 + $0x360] sm:$0xff] }
 0xc08   : > { %5942 = vmatprep.subr.mxu1 %v5927_v17  ;;  %v2886_v48 = vpop.f32.mrf.mxu0 }
 0xc09   : > { %v3182_v21 = vpop.f32.mrf.mxu1  ;;  %5943 = vmatpush3.msra.mxu1 %v5927_v17  ;;  %5936 = vmatprep.mubr.msk.f32.mxu0 %vm7932_vm9, %v2899_v12  ;;  %v2897_v50 = vmul.f32 %v7359_v14, %v2886_v48  ;;  %v2902_v63 = vadd.f32 %v2898_v53, %v2802_v59  ;;  %vm7943_vm9 = vmmov %vm7939_vm0 }
 0xc0a   : > { %5944 = vmatprep.subr.mxu1 %v3182_v21 }
 0xc0b   : > { %5945 = vmatpush3.msra.mxu1 %v3182_v21  ;;  %v2901_v54 = vadd.f32 %v2897_v50, %v2801_v31 }
 0xc0c   : > { %5946 = vmatprep.subr.mxu1 %v5924_v4 }
 0xc0d   : > { %5947 = vmatpush3.msra.mxu1 %v5924_v4  ;;  %v5120_v4 = vld [vmem:[%s7843_s6 + $0x378] sm:$0xff] }
 0xc0e   : > { %v5906_v39 = vpop.f32.mrf.mxu0  ;;  %5948 = vmatprep.subr.mxu1 %v3172_v20 }
 0xc0f   : > { %5949 = vmatpush3.msra.mxu1 %v3172_v20  ;;  %v3092_v32 = vmul.f32 %v7365_v30, %v5906_v39 }
 0xc10   : > { %v3072_v5 = vpop.f32.mrf.mxu0 }
 0xc11   : > { %v3096_v37 = vadd.f32 %v3092_v32, %v2996_v29  ;;  %v3091_v18 = vmul.f32 %v7334_v60, %v3072_v5 }
 0xc12   : > { %v5909_v34 = vpop.f32.mrf.mxu0 }
 0xc13   : > { %v3094_v27 = vmul.f32 %v7347_v52, %v5909_v34  ;;  %v3095_v38 = vadd.f32 %v3091_v18, %v2995_v43 }
 0xc14   : > { %v3082_v24 = vpop.f32.mrf.mxu0 }
 0xc15   : > { %v3098_v19 = vadd.f32 %v3094_v27, %v2998_v47  ;;  %v3093_v16 = vmul.f32 %v7359_v14, %v3082_v24 }
 0xc17   : > { %v3097_v23 = vadd.f32 %v3093_v16, %v2997_v26  ;;  %5928 = vmatprep.subr.msk.mxu0 %vm7933_vm2, %v3098_v19  ;;  %vm7944_vm2 = vcmask 392192  }
 0xc18   : > { %5929 = vmatpush3.xpose.msk.msra.mxu0 %vm7934_vm6, %v3098_v19  ;;  %vm7945_vm6 = vmmov %vm7944_vm2 }
 0xc19   : > { %5930 = vmatprep.subr.msk.mxu0 %vm7935_vm10, %v3097_v23  ;;  %vm7946_vm10 = vmmov %vm7944_vm2 }
 0xc1c   : > { %5931 = vmatpush3.xpose.msk.msra.mxu0 %vm7936_vm12, %v3097_v23  ;;  %vm7947_vm12 = vmmov %vm7944_vm2 }
 0xc1d   : > { %5932 = vmatprep.subr.msk.mxu0 %vm7937_vm13, %v3096_v37  ;;  %vm7948_vm13 = vmmov %vm7944_vm2 }
 0xc20   : > { %5933 = vmatpush3.xpose.msk.msra.mxu0 %vm7938_vm15, %v3096_v37  ;;  %vm7949_vm15 = vmmov %vm7944_vm2 }
 0xc21   : > { %5934 = vmatprep.subr.msk.mxu0 %vm7939_vm0, %v3095_v38  ;;  %vm7950_vm0 = vmmov %vm7944_vm2 }
 0xc24   : > { %5935 = vmatpush3.xpose.msk.msra.mxu0 %vm7940_vm1, %v3095_v38  ;;  %vm7951_vm1 = vmmov %vm7950_vm0 }
 0xc25   : > { %5974 = vmatprep.subr.mxu0 %v5102_v51 }
 0xc27   : > { %5937 = vmatmul.mubr.msk.f32.vlgmr.msra.gmra.mxu0 %vm7941_vm5, %v2900_v40  ;;  %vm7952_vm5 = vmmov %vm7950_vm0 }
 0xc28   : > { %5939 = vmatprep.mubr.msk.f32.mxu0 %vm7942_vm8, %v2901_v54  ;;  %5975 = vmatpush3.msra.mxu0 %v5102_v51  ;;  %vm7953_vm8 = vmmov %vm7950_vm0 }
 0xc29   : > { %5976 = vmatprep.subr.mxu0 %v5101_v58 }
 0xc2a   : > { %5977 = vmatpush3.msra.mxu0 %v5101_v58 }
 0xc2b   : > { %5940 = vmatmul.mubr.msk.f32.gmra.mxu0 %vm7943_vm9, %v2902_v63  ;;  %5978 = vmatprep.subr.mxu0 %v5100_v55  ;;  %vm7954_vm9 = vmmov %vm7950_vm0 }
 0xc2c   : > { %5979 = vmatpush3.msra.mxu0 %v5100_v55  ;;  %5986 = vmatprep.mubr.msk.f32.mxu0 %vm7944_vm2, %v7225_v61  ;;  %v5092_v55 = vld [vmem:[%s7843_s6 + $0x2f8] sm:$0xff]  ;;  %vm7955_vm2 = vmmov %vm7950_vm0 }
 0xc2d   : > { %5980 = vmatprep.subr.mxu0 %v5099_v62  ;;  %5956 = vmatprep.subr.mxu1 %v5092_v55 }
 0xc2e   : > { %5981 = vmatpush3.msra.mxu0 %v5099_v62 }
 0xc2f   : > { %5982 = vmatprep.subr.mxu0 %v5098_v57 }
 0xc30   : > { %5983 = vmatpush3.msra.mxu0 %v5098_v57 }
 0xc31   : > { %5984 = vmatprep.subr.mxu0 %v5097_v0 }
 0xc32   : > { %5985 = vmatpush3.msra.mxu0 %v5097_v0 }
 0xc33   : > { %5987 = vmatmul.mubr.msk.f32.vlgmr.msra.gmra.mxu0 %vm7945_vm6, %v7227_v13  ;;  %6010 = vmatprep.subr.mxu0 %v5122_v1  ;;  %vm7956_vm6 = vmmov %vm7950_vm0 }
 0xc34   : > { %5989 = vmatprep.mubr.msk.f32.mxu0 %vm7946_vm10, %v7257_v41  ;;  %6011 = vmatpush3.msra.mxu0 %v5122_v1  ;;  %vm7957_vm10 = vmmov %vm7950_vm0 }
 0xc35   : > { %6012 = vmatprep.subr.mxu0 %v5121_v2 }
 0xc36   : > { %6013 = vmatpush3.msra.mxu0 %v5121_v2 }
 0xc37   : > { %5990 = vmatmul.mubr.msk.f32.gmra.mxu0 %vm7947_vm12, %v7262_v49  ;;  %6014 = vmatprep.subr.mxu0 %v5120_v4  ;;  %vm7958_vm12 = vmmov %vm7950_vm0 }
 0xc38   : > { %6015 = vmatpush3.msra.mxu0 %v5120_v4  ;;  %6022 = vmatprep.mubr.msk.f32.mxu0 %vm7948_vm13, %v7225_v61  ;;  %vm7959_vm13 = vmmov %vm7950_vm0 }
 0xc39   : > { %6016 = vmatprep.subr.mxu0 %v5119_v6 }
 0xc3a   : > { %6017 = vmatpush3.msra.mxu0 %v5119_v6 }
 0xc3b   : > { %6018 = vmatprep.subr.mxu0 %v5118_v9 }
 0xc3c   : > { %6019 = vmatpush3.msra.mxu0 %v5118_v9 }
 0xc3d   : > { %6020 = vmatprep.subr.mxu0 %v5117_v10 }
 0xc3e   : > { %6021 = vmatpush3.msra.mxu0 %v5117_v10  ;;  %v5091_v10 = vld [vmem:[%s7843_s6 + $0x2f0] sm:$0xff] }
 0xc3f   : > { %6023 = vmatmul.mubr.msk.f32.vlgmr.msra.gmra.mxu0 %vm7949_vm15, %v7227_v13  ;;  %vm7960_vm15 = vmmov %vm7950_vm0 }
 0xc40   : > { %6025 = vmatprep.mubr.msk.f32.mxu0 %vm7950_vm0, %v7257_v41 }
 0xc43   : > { %6026 = vmatmul.mubr.msk.f32.gmra.mxu0 %vm7951_vm1, %v7262_v49  ;;  %vm7961_vm1 = vmmov %vm7950_vm0 }
 0xce7   : > { %v5938_v20 = vpop.f32.mrf.mxu0 }
 0xce8   : > { %v3301_v12 = vsel %vm7870_vm3, %v5938_v20, -3.4028235e+38 }
 0xce9   : > { %v3281_v17 = vpop.f32.mrf.mxu0  ;;  %v3307_v15 = vsel %vm1201_vm7, %v3301_v12, -inf }
 0xcea   : > { %v3300_v21 = vsel %vm6821_vm11, %v3281_v17, -3.4028235e+38  ;;  %3308 = vmax.xlane.f32.xlu1 %v3307_v15  ;;  %v5090_v17 = vld [vmem:[%s7843_s6 + $0x2e8] sm:$0xff] }
 0xceb   : > { %v5941_v48 = vpop.f32.mrf.mxu0  ;;  %v3304_v39 = vsel %vm1201_vm7, %v3300_v21, -inf }
 0xcec   : > { %v3303_v5 = vsel %vm6834_vm4, %v5941_v48, -3.4028235e+38  ;;  %3305 = vmax.xlane.f32.xlu0 %v3304_v39  ;;  %v5088_v48 = vld [vmem:[%s7843_s6 + $0x2d8] sm:$0xff]  ;;  %v5087_v39 = vld [vmem:[%s7843_s6 + $0x2d0] sm:$0xff] }
 0xced   : > { %v3291_v34 = vpop.f32.mrf.mxu0  ;;  %v3313_v47 = vsel %vm1201_vm7, %v3303_v5, -inf }
 0xcee   : > { %v3302_v27 = vsel %vm6843_vm14, %v3291_v34, -3.4028235e+38  ;;  %3314 = vmax.xlane.f32.xlu1 %v3313_v47  ;;  %v5111_v34 = vld [vmem:[%s7843_s6 + $0x350] sm:$0xff]  ;;  %v5110_v47 = vld [vmem:[%s7843_s6 + $0x348] sm:$0xff] }
 0xcef   : > { %v3310_v24 = vsel %vm1201_vm7, %v3302_v27, -inf }
 0xcf0   : > { %3311 = vmax.xlane.f32.xlu0 %v3310_v24  ;;  %v5108_v24 = vld [vmem:[%s7843_s6 + $0x338] sm:$0xff] }
 0xd73   : > { %v3309_v26 = vpop.xlane.xlu1 %3308 }
 0xd74   : > { %v3317_v19 = vsub.f32 %v3301_v12, %v3309_v26  ;;  %v5107_v26 = vld [vmem:[%s7843_s6 + $0x330] sm:$0xff] }
 0xd75   : > { %v3306_v16 = vpop.xlane.xlu0 %3305 }
 0xd76   : > { %v3322_v32 = vmul.f32 1.442695, %v3317_v19  ;;  %v3316_v23 = vsub.f32 %v3300_v21, %v3306_v16  ;;  %v5089_v21 = vld [vmem:[%s7843_s6 + $0x2e0] sm:$0xff]  ;;  %v5132_v19 = vld [vmem:[%s7843_s6 + $0x3b8] sm:$0xff]  ;;  %v5131_v16 = vld [vmem:[%s7843_s6 + $0x3b0] sm:$0xff] }
 0xd77   : > { %v3315_v29 = vpop.xlane.xlu1 %3314 }
 0xd78   : > { %6243 = vpow2.f32 %v3322_v32  ;;  %v3320_v37 = vmul.f32 1.442695, %v3316_v23  ;;  %v3319_v18 = vsub.f32 %v3303_v5, %v3315_v29  ;;  %v5112_v5 = vld [vmem:[%s7843_s6 + $0x358] sm:$0xff]  ;;  %v5130_v32 = vld [vmem:[%s7843_s6 + $0x3a8] sm:$0xff]  ;;  %v5129_v23 = vld [vmem:[%s7843_s6 + $0x3a0] sm:$0xff] }
 0xd79   : > { %v3312_v43 = vpop.xlane.xlu0 %3311  ;;  %v5128_v29 = vld [vmem:[%s7843_s6 + $0x398] sm:$0xff] }
 0xd7a   : > { %6245 = vpow2.f32 %v3320_v37  ;;  %v3326_v38 = vmul.f32 1.442695, %v3319_v18  ;;  %v3318_v28 = vsub.f32 %v3302_v27, %v3312_v43  ;;  %v5109_v27 = vld [vmem:[%s7843_s6 + $0x340] sm:$0xff]  ;;  %v5127_v37 = vld [vmem:[%s7843_s6 + $0x390] sm:$0xff]  ;;  %v5988_v18 = vpop.f32.mrf.mxu0 }
 0xd7c   : > { %6247 = vpow2.f32 %v3326_v38  ;;  %v3324_v50 = vmul.f32 1.442695, %v3318_v28  ;;  %v3618_v38 = vpop.f32.mrf.mxu0 }
 0xd7e   : > { %6249 = vpow2.f32 %v3324_v50  ;;  %v5991_v50 = vpop.f32.mrf.mxu0 }
 0xd85   : > { %v6244_v51 = vpop.eup %6243 }
 0xd86   : > { %v3331_v44 = vsel %vm1201_vm7, %v6244_v51, 0.0 }
 0xd87   : > { %v6246_v31 = vpop.eup %6245  ;;  %3332 = vadd.xlane.f32.xlu1 %v3331_v44 }
 0xd88   : > { %v3328_v40 = vsel %vm1201_vm7, %v6246_v31, 0.0 }
 0xd89   : > { %v6248_v53 = vpop.eup %6247  ;;  %3329 = vadd.xlane.f32.xlu0 %v3328_v40  ;;  %v3637_v40 = vmul.f32 %v7334_v60, %v3618_v38 }
 0xd8a   : > { %v3337_v54 = vsel %vm1201_vm7, %v6248_v53, 0.0 }
 0xd8b   : > { %v6250_v58 = vpop.eup %6249  ;;  %3338 = vadd.xlane.f32.xlu1 %v3337_v54 }
 0xd8c   : > { %v3334_v59 = vsel %vm1201_vm7, %v6250_v58, 0.0 }
 0xd8d   : > { %3335 = vadd.xlane.f32.xlu0 %v3334_v59 }
 0xe10   : > { %v3333_v63 = vpop.xlane.xlu1 %3332 }
 0xe11   : > { %6251 = vrcp.f32 %v3333_v63 }
 0xe12   : > { %v3330_v62 = vpop.xlane.xlu0 %3329 }
 0xe13   : > { %6253 = vrcp.f32 %v3330_v62 }
 0xe14   : > { %v3339_v57 = vpop.xlane.xlu1 %3338 }
 0xe15   : > { %6255 = vrcp.f32 %v3339_v57 }
 0xe16   : > { %v3336_v0 = vpop.xlane.xlu0 %3335 }
 0xe17   : > { %6257 = vrcp.f32 %v3336_v0 }
 0xe1e   : > { %v6252_v1 = vpop.eup %6251 }
 0xe1f   : > { %v3345_v6 = vmul.f32 %v6252_v1, %v6244_v51 }
 0xe20   : > { %v6254_v2 = vpop.eup %6253 }
 0xe21   : > { %v3344_v4 = vmul.f32 %v6254_v2, %v6246_v31  ;;  %v3628_v31 = vpop.f32.mrf.mxu0 }
 0xe22   : > { %v6256_v9 = vpop.eup %6255 }
 0xe23   : > { %5950 = vmatprep.mubr.msk.f32.mxu1 %vm1201_vm7, %v3344_v4  ;;  %v3347_v15 = vmul.f32 %v6256_v9, %v6248_v53  ;;  %v6024_v53 = vpop.f32.mrf.mxu0 }
 0xe24   : > { %v6258_v20 = vpop.eup %6257  ;;  %5951 = vmatmul.mubr.msk.f32.vlgmr.msra.gmra.mxu1 %vm1201_vm7, %v3345_v6 }
 0xe25   : > { %5957 = vmatpush3.msra.mxu1 %v5092_v55  ;;  %v3346_v12 = vmul.f32 %v6258_v20, %v6250_v58  ;;  %v3814_v58 = vpop.f32.mrf.mxu0 }
 0xe26   : > { %5958 = vmatprep.subr.mxu1 %v5091_v10 }
 0xe27   : > { %5959 = vmatpush3.msra.mxu1 %v5091_v10  ;;  %5953 = vmatprep.mubr.msk.f32.mxu1 %vm1201_vm7, %v3346_v12  ;;  %v6027_v55 = vpop.f32.mrf.mxu0 }
 0xe28   : > { %5960 = vmatprep.subr.mxu1 %v5090_v17  ;;  %5954 = vmatmul.mubr.msk.f32.gmra.mxu1 %vm1201_vm7, %v3347_v15  ;;  %v3836_v1 = vmul.f32 %v7347_v52, %v6027_v55 }
 0xe29   : > { %5961 = vmatpush3.msra.mxu1 %v5090_v17  ;;  %5968 = vmatprep.mubr.msk.f32.mxu1 %vm7952_vm5, %v7225_v61  ;;  %vm7962_vm5 = vmmov %vm7950_vm0  ;;  %v3824_v57 = vpop.f32.mrf.mxu0  ;;  %v3834_v17 = vmul.f32 %v7365_v30, %v6024_v53 }
 0xe2a   : > { %5962 = vmatprep.subr.mxu1 %v5089_v21  ;;  %v3835_v6 = vmul.f32 %v7359_v14, %v3824_v57 }
 0xe2b   : > { %5963 = vmatpush3.msra.mxu1 %v5089_v21 }
 0xe2c   : > { %5964 = vmatprep.subr.mxu1 %v5088_v48 }
 0xe2d   : > { %5965 = vmatpush3.msra.mxu1 %v5088_v48 }
 0xe2e   : > { %5966 = vmatprep.subr.mxu1 %v5087_v39 }
 0xe2f   : > { %5967 = vmatpush3.msra.mxu1 %v5087_v39 }
 0xe30   : > { %5969 = vmatmul.mubr.msk.f32.vlgmr.msra.gmra.mxu1 %vm7953_vm8, %v7227_v13  ;;  %5992 = vmatprep.subr.mxu1 %v5112_v5  ;;  %vm7963_vm8 = vcmask 195584  }
 0xe31   : > { %5971 = vmatprep.mubr.msk.f32.mxu1 %vm7954_vm9, %v7257_v41  ;;  %5993 = vmatpush3.msra.mxu1 %v5112_v5  ;;  %vm7964_vm9 = vmmov %vm7963_vm8  ;;  %v3833_v5 = vmul.f32 %v7334_v60, %v3814_v58  ;;  %v3639_v60 = vmul.f32 %v7359_v14, %v3628_v31 }
 0xe32   : > { %5994 = vmatprep.subr.mxu1 %v5111_v34 }
 0xe33   : > { %5995 = vmatpush3.msra.mxu1 %v5111_v34 }
 0xe34   : > { %5972 = vmatmul.mubr.msk.f32.gmra.mxu1 %vm7955_vm2, %v7262_v49  ;;  %5996 = vmatprep.subr.mxu1 %v5110_v47  ;;  %vm7965_vm2 = vmmov %vm7963_vm8 }
 0xe35   : > { %5997 = vmatpush3.msra.mxu1 %v5110_v47  ;;  %6004 = vmatprep.mubr.msk.f32.mxu1 %vm7956_vm6, %v7225_v61  ;;  %vm7966_vm6 = vmmov %vm7965_vm2 }
 0xe36   : > { %5998 = vmatprep.subr.mxu1 %v5109_v27 }
 0xe37   : > { %5999 = vmatpush3.msra.mxu1 %v5109_v27 }
 0xe38   : > { %6000 = vmatprep.subr.mxu1 %v5108_v24 }
 0xe39   : > { %6001 = vmatpush3.msra.mxu1 %v5108_v24 }
 0xe3a   : > { %6002 = vmatprep.subr.mxu1 %v5107_v26 }
 0xe3b   : > { %6003 = vmatpush3.msra.mxu1 %v5107_v26  ;;  %v3638_v26 = vmul.f32 %v7365_v30, %v5988_v18 }
 0xe3c   : > { %6005 = vmatmul.mubr.msk.f32.vlgmr.msra.gmra.mxu1 %vm7957_vm10, %v7227_v13  ;;  %6028 = vmatprep.subr.mxu1 %v5132_v19  ;;  %vm7967_vm10 = vmmov %vm7965_vm2 }
 0xe3d   : > { %6007 = vmatprep.mubr.msk.f32.mxu1 %vm7958_vm12, %v7257_v41  ;;  %6029 = vmatpush3.msra.mxu1 %v5132_v19  ;;  %vm7968_vm12 = vmmov %vm7965_vm2 }
 0xe3e   : > { %6030 = vmatprep.subr.mxu1 %v5131_v16 }
 0xe3f   : > { %6031 = vmatpush3.msra.mxu1 %v5131_v16 }
 0xe40   : > { %6008 = vmatmul.mubr.msk.f32.gmra.mxu1 %vm7959_vm13, %v7262_v49  ;;  %6032 = vmatprep.subr.mxu1 %v5130_v32  ;;  %vm7969_vm13 = vmmov %vm7965_vm2 }
 0xe41   : > { %6033 = vmatpush3.msra.mxu1 %v5130_v32  ;;  %6040 = vmatprep.mubr.msk.f32.mxu1 %vm7960_vm15, %v7225_v61  ;;  %vm7970_vm15 = vmmov %vm7965_vm2 }
 0xe42   : > { %6034 = vmatprep.subr.mxu1 %v5129_v23 }
 0xe43   : > { %6035 = vmatpush3.msra.mxu1 %v5129_v23 }
 0xe44   : > { %6036 = vmatprep.subr.mxu1 %v5128_v29 }
 0xe45   : > { %6037 = vmatpush3.msra.mxu1 %v5128_v29 }
 0xe46   : > { %6038 = vmatprep.subr.mxu1 %v5127_v37 }
 0xe47   : > { %6039 = vmatpush3.msra.mxu1 %v5127_v37 }
 0xe48   : > { %6041 = vmatmul.mubr.msk.f32.vlgmr.msra.gmra.mxu1 %vm7950_vm0, %v7227_v13  ;;  %vm7971_vm0 = vmmov %vm7965_vm2 }
 0xe49   : > { %6043 = vmatprep.mubr.msk.f32.mxu1 %vm7961_vm1, %v7257_v41  ;;  %vm7972_vm1 = vmmov %vm7971_vm0 }
 0xe4c   : > { %6044 = vmatmul.mubr.msk.f32.gmra.mxu1 %vm7962_vm5, %v7262_v49  ;;  %vm7973_vm5 = vmmov %vm7971_vm0 }
 0xee4   : > { %v7544_v61 = vpop.f32.mrf.mxu1 }
 0xee6   : > { %v7546_v43 = vpop.f32.mrf.mxu1 }
 0xee8   : > { %v7548_v28 = vpop.f32.mrf.mxu1 }
 0xeea   : > { %v7550_v51 = vpop.f32.mrf.mxu1 }
 0xef0   : > { %v5970_v44 = vpop.f32.mrf.mxu1 }
 0xef1   : > { %v3542_v24 = vmul.f32 %v7373_v33, %v5970_v44 }
 0xef2   : > { %v3522_v13 = vpop.f32.mrf.mxu1 }
 0xef3   : > { %v3541_v41 = vmul.f32 %v7328_v8, %v3522_v13  ;;  %v3642_v19 = vadd.f32 %v3638_v26, %v3542_v24 }
 0xef4   : > { %v5973_v54 = vpop.f32.mrf.mxu1 }
 0xef5   : > { %v3641_v49 = vadd.f32 %v3637_v40, %v3541_v41  ;;  %v3544_v16 = vmul.f32 %v7341_v36, %v5973_v54 }
 0xef6   : > { %v3532_v59 = vpop.f32.mrf.mxu1 }
 0xef7   : > { %6054 = vmatprep.mubr.msk.f32.mxu0 %vm7963_vm8, %v3641_v49  ;;  %vm7974_vm8 = vmmov %vm7971_vm0 }
 0xefc   : > { %v6006_v63 = vpop.f32.mrf.mxu1 }
 0xefd   : > { %v3738_v20 = vmul.f32 %v7373_v33, %v6006_v63  ;;  %v3640_v33 = vmul.f32 %v7347_v52, %v5991_v50 }
 0xefe   : > { %v3718_v62 = vpop.f32.mrf.mxu1 }
 0xeff   : > { %v3838_v21 = vadd.f32 %v3834_v17, %v3738_v20  ;;  %v3737_v48 = vmul.f32 %v7328_v8, %v3718_v62  ;;  %v3543_v8 = vmul.f32 %v7353_v25, %v3532_v59 }
 0xf00   : > { %v6009_v0 = vpop.f32.mrf.mxu1 }
 0xf01   : > { %v3740_v2 = vmul.f32 %v7341_v36, %v6009_v0  ;;  %v3837_v47 = vadd.f32 %v3833_v5, %v3737_v48  ;;  %v3643_v32 = vadd.f32 %v3639_v60, %v3543_v8  ;;  %v5084_v8 = vld [vmem:[%s7844_s7 + $0x30] sm:$0xff]  ;;  %v5149_v60 = vld [vmem:[%s7844_s7 + $0x48] sm:$0xff] }
 0xf02   : > { %v3728_v4 = vpop.f32.mrf.mxu1 }
 0xf03   : > { %v3840_v9 = vadd.f32 %v3836_v1, %v3740_v2  ;;  %v3739_v10 = vmul.f32 %v7353_v25, %v3728_v4  ;;  %v3644_v25 = vadd.f32 %v3640_v33, %v3544_v16 }
 0xf05   : > { %v3839_v12 = vadd.f32 %v3835_v6, %v3739_v10  ;;  %6046 = vmatprep.subr.msk.mxu0 %vm7964_vm9, %v3840_v9  ;;  %v5086_v6 = vld [vmem:[%s7844_s7 + $0x40] sm:$0xff]  ;;  %v5150_v10 = vld [vmem:[%s7844_s7 + $0x50] sm:$0xff]  ;;  %vm7980_vm9 = vmmov %vm7971_vm0 }
 0xf06   : > { %6047 = vmatpush3.xpose.msk.msra.mxu0 %vm7965_vm2, %v3840_v9  ;;  %v5151_v9 = vld [vmem:[%s7844_s7 + $0x58] sm:$0xff]  ;;  %vm7981_vm2 = vmmov %vm7971_vm0 }
 0xf07   : > { %6048 = vmatprep.subr.msk.mxu0 %vm7966_vm6, %v3839_v12  ;;  %vm7982_vm6 = vmmov %vm7971_vm0 }
 0xf08   : > { %v6042_v15 = vpop.f32.mrf.mxu1 }
 0xf0a   : > { %v3914_v39 = vpop.f32.mrf.mxu1  ;;  %6049 = vmatpush3.xpose.msk.msra.mxu0 %vm7967_vm10, %v3839_v12  ;;  %vm7983_vm10 = vcmask 392192  }
 0xf0b   : > { %6050 = vmatprep.subr.msk.mxu0 %vm7968_vm12, %v3838_v21  ;;  %vm7984_vm12 = vmmov %vm7983_vm10 }
 0xf0c   : > { %v6045_v34 = vpop.f32.mrf.mxu1 }
 0xf0d   : > { %6060 = vmatprep.subr.mxu1 %v6045_v34 }
 0xf0e   : > { %v3924_v27 = vpop.f32.mrf.mxu1  ;;  %6051 = vmatpush3.xpose.msk.msra.mxu0 %vm7969_vm13, %v3838_v21  ;;  %6061 = vmatpush3.msra.mxu1 %v6045_v34  ;;  %vm7985_vm13 = vmmov %vm7983_vm10 }
 0xf0f   : > { %6052 = vmatprep.subr.msk.mxu0 %vm7970_vm15, %v3837_v47  ;;  %6062 = vmatprep.subr.mxu1 %v3924_v27  ;;  %vm7986_vm15 = vmmov %vm7983_vm10 }
 0xf10   : > { %6063 = vmatpush3.msra.mxu1 %v3924_v27 }
 0xf11   : > { %6064 = vmatprep.subr.mxu1 %v6042_v15 }
 0xf12   : > { %6053 = vmatpush3.xpose.msk.msra.mxu0 %vm7971_vm0, %v3837_v47  ;;  %6065 = vmatpush3.msra.mxu1 %v6042_v15  ;;  %v5085_v47 = vld [vmem:[%s7844_s7 + $0x38] sm:$0xff] }
 0xf13   : > { %6066 = vmatprep.subr.mxu1 %v3914_v39  ;;  %6074 = vmatprep.subr.mxu0 %v5151_v9 }
 0xf14   : > { %6067 = vmatpush3.msra.mxu1 %v3914_v39 }
 0xf15   : > { %6055 = vmatmul.mubr.msk.f32.vlgmr.msra.gmra.mxu0 %vm7972_vm1, %v3642_v19  ;;  %6086 = vmatprep.subr.mxu1 %v5086_v6 }
 0xf16   : > { %6057 = vmatprep.mubr.msk.f32.mxu0 %vm7973_vm5, %v3643_v32  ;;  %6075 = vmatpush3.msra.mxu0 %v5151_v9 }
 0xf17   : > { %6076 = vmatprep.subr.mxu0 %v5150_v10 }
 0xf18   : > { %6077 = vmatpush3.msra.mxu0 %v5150_v10 }
 0xf19   : > { %6058 = vmatmul.mubr.msk.f32.gmra.mxu0 %vm7974_vm8, %v3644_v25  ;;  %6078 = vmatprep.subr.mxu0 %v5149_v60 }
 0xf1a   : > { %6079 = vmatpush3.msra.mxu0 %v5149_v60  ;;  %v5200_v60 = vld [vmem:[%s7847_s10 + $0xf0] sm:$0xff] }
 0xfd5   : > { %v6056_v30 = vpop.f32.mrf.mxu0 }
 0xfd6   : > { %v4043_v14 = vsel %vm7870_vm3, %v6056_v30, -3.4028235e+38  ;;  %vm7976_vm3 = vmmov %vm7971_vm0 }
 0xfd7   : > { %v4023_v23 = vpop.f32.mrf.mxu0  ;;  %v4049_v29 = vsel %vm1201_vm7, %v4043_v14, -inf }
 0xfd8   : > { %v4042_v36 = vsel %vm6821_vm11, %v4023_v23, -3.4028235e+38  ;;  %4050 = vmax.xlane.f32.xlu1 %v4049_v29  ;;  %vm7975_vm11 = vmmov %vm7971_vm0 }
 0xfd9   : > { %v6059_v37 = vpop.f32.mrf.mxu0  ;;  %v4046_v52 = vsel %vm1201_vm7, %v4042_v36, -inf }
 0xfda   : > { %v4045_v18 = vsel %vm6834_vm4, %v6059_v37, -3.4028235e+38  ;;  %4047 = vmax.xlane.f32.xlu0 %v4046_v52  ;;  %vm7977_vm4 = vmmov %vm7971_vm0 }
 0xfdb   : > { %v4033_v38 = vpop.f32.mrf.mxu0  ;;  %v4055_v50 = vsel %vm1201_vm7, %v4045_v18, -inf }
 0xfdc   : > { %v4044_v56 = vsel %vm6843_vm14, %v4033_v38, -3.4028235e+38  ;;  %4056 = vmax.xlane.f32.xlu1 %v4055_v50  ;;  %vm7978_vm14 = vmmov %vm7971_vm0 }
 0xfdd   : > { %v4052_v44 = vsel %vm1201_vm7, %v4044_v56, -inf }
 0xfde   : > { %4053 = vmax.xlane.f32.xlu0 %v4052_v44 }
0x1061   : > { %v4051_v3 = vpop.xlane.xlu1 %4050 }
0x1062   : > { %v4059_v31 = vsub.f32 %v4043_v14, %v4051_v3 }
0x1063   : > { %v4048_v13 = vpop.xlane.xlu0 %4047 }
0x1064   : > { %v4064_v40 = vmul.f32 1.442695, %v4059_v31  ;;  %v4058_v41 = vsub.f32 %v4042_v36, %v4048_v13 }
0x1065   : > { %v4057_v53 = vpop.xlane.xlu1 %4056 }
0x1066   : > { %6259 = vpow2.f32 %v4064_v40  ;;  %v4062_v7 = vmul.f32 1.442695, %v4058_v41  ;;  %v4061_v49 = vsub.f32 %v4045_v18, %v4057_v53  ;;  %v5172_v41 = vld [vmem:[%s7846_s9 + $0xb0] sm:$0xff]  ;;  %v5171_v53 = vld [vmem:[%s7846_s9 + $0xa8] sm:$0xff] }
0x1067   : > { %v4054_v54 = vpop.xlane.xlu0 %4053 }
0x1068   : > { %6261 = vpow2.f32 %v4062_v7  ;;  %v4068_v58 = vmul.f32 1.442695, %v4061_v49  ;;  %v4060_v59 = vsub.f32 %v4044_v56, %v4054_v54  ;;  %v5170_v7 = vld [vmem:[%s7846_s9 + $0xa0] sm:$0xff]  ;;  %v5169_v49 = vld [vmem:[%s7846_s9 + $0x98] sm:$0xff]  ;;  %v5168_v54 = vld [vmem:[%s7846_s9 + $0x90] sm:$0xff] }
0x106a   : > { %6263 = vpow2.f32 %v4068_v58  ;;  %v4066_v11 = vmul.f32 1.442695, %v4060_v59  ;;  %v5167_v58 = vld [vmem:[%s7846_s9 + $0x88] sm:$0xff]  ;;  %v5166_v59 = vld [vmem:[%s7846_s9 + $0x80] sm:$0xff] }
0x106c   : > { %6265 = vpow2.f32 %v4066_v11  ;;  %v5165_v11 = vld [vmem:[%s7846_s9 + $0x78] sm:$0xff] }
0x1073   : > { %v6260_v55 = vpop.eup %6259 }
0x1074   : > { %v4073_v63 = vsel %vm1201_vm7, %v6260_v55, 0.0 }
0x1075   : > { %v6262_v62 = vpop.eup %6261  ;;  %4074 = vadd.xlane.f32.xlu1 %v4073_v63  ;;  %v5163_v63 = vld [vmem:[%s7846_s9 + $0x68] sm:$0xff] }
0x1076   : > { %v4070_v57 = vsel %vm1201_vm7, %v6262_v62, 0.0 }
0x1077   : > { %v6264_v0 = vpop.eup %6263  ;;  %4071 = vadd.xlane.f32.xlu0 %v4070_v57 }
0x1078   : > { %v4079_v1 = vsel %vm1201_vm7, %v6264_v0, 0.0 }
0x1079   : > { %v6266_v2 = vpop.eup %6265  ;;  %4080 = vadd.xlane.f32.xlu1 %v4079_v1 }
0x107a   : > { %v4076_v4 = vsel %vm1201_vm7, %v6266_v2, 0.0 }
0x107b   : > { %4077 = vadd.xlane.f32.xlu0 %v4076_v4 }
0x10fe   : > { %v4075_v20 = vpop.xlane.xlu1 %4074 }
0x10ff   : > { %6267 = vrcp.f32 %v4075_v20 }
0x1100   : > { %v4072_v12 = vpop.xlane.xlu0 %4071 }
0x1101   : > { %6269 = vrcp.f32 %v4072_v12 }
0x1102   : > { %v4081_v17 = vpop.xlane.xlu1 %4080 }
0x1103   : > { %6271 = vrcp.f32 %v4081_v17 }
0x1104   : > { %v4078_v15 = vpop.xlane.xlu0 %4077 }
0x1105   : > { %6273 = vrcp.f32 %v4078_v15  ;;  %v5161_v15 = vld [vmem:[%s7845_s8 + $0x1] ss:$0 sm:$0xff] }
0x110c   : > { %v6268_v21 = vpop.eup %6267 }
0x110d   : > { %v4087_v5 = vmul.f32 %v6268_v21, %v6260_v55  ;;  %v5164_v55 = vld [vmem:[%s7846_s9 + $0x70] sm:$0xff] }
0x110e   : > { %v6270_v48 = vpop.eup %6269 }
0x110f   : > { %v4086_v39 = vmul.f32 %v6270_v48, %v6262_v62  ;;  %v5162_v62 = vld [vmem:[%s7846_s9 + $0x60] sm:$0xff] }
0x1110   : > { %v6272_v34 = vpop.eup %6271 }
0x1111   : > { %6068 = vmatprep.mubr.msk.f32.mxu1 %vm1201_vm7, %v4086_v39  ;;  %v4089_v26 = vmul.f32 %v6272_v34, %v6264_v0 }
0x1112   : > { %v6274_v27 = vpop.eup %6273  ;;  %6069 = vmatmul.mubr.msk.f32.vlgmr.msra.gmra.mxu1 %vm1201_vm7, %v4087_v5 }
0x1113   : > { %v4088_v24 = vmul.f32 %v6274_v27, %v6266_v2  ;;  %6087 = vmatpush3.msra.mxu1 %v5086_v6 }
0x1114   : > { %6088 = vmatprep.subr.mxu1 %v5085_v47 }
0x1115   : > { %6071 = vmatprep.mubr.msk.f32.mxu1 %vm1201_vm7, %v4088_v24  ;;  %6089 = vmatpush3.msra.mxu1 %v5085_v47 }
0x1116   : > { %6072 = vmatmul.mubr.msk.f32.gmra.mxu1 %vm1201_vm7, %v4089_v26  ;;  %6090 = vmatprep.subr.mxu1 %v5084_v8  ;;  %vm7979_vm7 = vmmov %vm7971_vm0  ;;  %v5201_v26 = vld [vmem:[%s7847_s10 + $0xf8] sm:$0xff] }
0x1117   : > { %6092 = vmatprep.mubr.msk.f32.mxu1 %vm7975_vm11, %v7546_v43  ;;  %6091 = vmatpush3.msra.mxu1 %v5084_v8  ;;  %vm7987_vm0 = vmmov %vm7983_vm10 }
0x1118   : > { %vm7988_vm1 = vmmov %vm7987_vm0  ;;  %6098 = vmatprep.subr.mxu1 %v5201_v26 }
0x1119   : > { %vm7989_vm5 = vmmov %vm7987_vm0 }
0x111a   : > { %6093 = vmatmul.mubr.msk.f32.vlgmr.msra.gmra.mxu1 %vm7976_vm3, %v7544_v61  ;;  %vm7990_vm8 = vmmov %vm7987_vm0 }
0x111b   : > { %6095 = vmatprep.mubr.msk.f32.mxu1 %vm7977_vm4, %v7550_v51  ;;  %6099 = vmatpush3.msra.mxu1 %v5201_v26 }
0x111c   : > { %6100 = vmatprep.subr.mxu1 %v5200_v60 }
0x111d   : > { %6101 = vmatpush3.msra.mxu1 %v5200_v60 }
0x111e   : > { %6096 = vmatmul.mubr.msk.f32.gmra.mxu1 %vm7978_vm14, %v7548_v28 }
0x11d2   : > { %v6070_v19 = vpop.f32.mrf.mxu1 }
0x11d4   : > { %v4168_v16 = vpop.f32.mrf.mxu1 }
0x11d5   : > { %6080 = vmatprep.mubr.msk.f32.mxu0 %vm7979_vm7, %v4168_v16  ;;  %v5197_v16 = vld [vmem:[%s7847_s10 + $0xd8] sm:$0xff]  ;;  %vm4761_vm7 = vcmask 392196  }
0x11d6   : > { %v6073_v43 = vpop.f32.mrf.mxu1  ;;  %6081 = vmatmul.mubr.msk.f32.vlgmr.msra.gmra.mxu0 %vm7980_vm9, %v6070_v19  ;;  %v5199_v19 = vld [vmem:[%s7847_s10 + $0xe8] sm:$0xff] }
0x11d7   : > { %6102 = vmatprep.subr.mxu1 %v5199_v19 }
0x11d8   : > { %v4178_v61 = vpop.f32.mrf.mxu1  ;;  %6103 = vmatpush3.msra.mxu1 %v5199_v19 }
0x11d9   : > { %6083 = vmatprep.mubr.msk.f32.mxu0 %vm7981_vm2, %v4178_v61  ;;  %v5195_v61 = vld [vmem:[%s7847_s10 + $0xc8] sm:$0xff] }
0x11da   : > { %6084 = vmatmul.mubr.msk.f32.gmra.mxu0 %vm7982_vm6, %v6073_v43  ;;  %v6094_v28 = vpop.f32.mrf.mxu1  ;;  %v5196_v43 = vld [vmem:[%s7847_s10 + $0xd0] sm:$0xff] }
0x11db   : > { %4518 = vmatprep.mubr.f32.mxu0 %v6368_v45 }
0x11dc   : > { %v4366_v51 = vpop.f32.mrf.mxu1 }
0x11de   : > { %v6097_v25 = vpop.f32.mrf.mxu1 }
0x11e0   : > { %v4376_v18 = vpop.f32.mrf.mxu1 }
0x1296   : > { %v6082_v32 = vpop.f32.mrf.mxu0 }
0x1297   : > { %v4372_v33 = vadd.f32 %v6094_v28, %v6082_v32  ;;  %v5194_v28 = vld [vmem:[%s7847_s10 + $0xc0] sm:$0xff]  ;;  %v5192_v32 = vld [vmem:[%s7847_s10 + $0xb0] sm:$0xff] }
0x1298   : > { %v4269_v30 = vpop.f32.mrf.mxu0 }
0x1299   : > { %v7632_v14 = vadd.f32 %v4372_v33, %v7155_v35  ;;  %v4367_v23 = vadd.f32 %v4366_v51, %v4269_v30  ;;  %v5193_v51 = vld [vmem:[%s7847_s10 + $0xb8] sm:$0xff]  ;;  %v5191_v33 = vld [vmem:[%s7847_s10 + $0xa8] sm:$0xff] }
0x129a   : > { %v6085_v29 = vpop.f32.mrf.mxu0  ;;  %v5189_v30 = vld [vmem:[%s7847_s10 + $0x98] sm:$0xff] }
0x129b   : > { %v7635_v36 = vadd.f32 %v4367_v23, %v7158_v46  ;;  %v4382_v37 = vadd.f32 %v6097_v25, %v6085_v29  ;;  %v4392_v52 = vmul.f32 %v7632_v14, %v7632_v14  ;;  %v5190_v25 = vld [vmem:[%s7847_s10 + $0xa0] sm:$0xff]  ;;  %v5188_v23 = vld [vmem:[%s7847_s10 + $0x90] sm:$0xff]  ;;  %v5187_v29 = vld [vmem:[%s7847_s10 + $0x88] sm:$0xff] }
0x129c   : > { %v4279_v38 = vpop.f32.mrf.mxu0 }
0x129d   : > { %v7640_v50 = vadd.f32 %v4382_v37, %v7167_v42  ;;  %v4377_v56 = vadd.f32 %v4376_v18, %v4279_v38  ;;  %v4398_v44 = vsel %vm7983_vm10, %v4392_v52, 0.0  ;;  %v4391_v35 = vmul.f32 %v7635_v36, %v7635_v36  ;;  %v5186_v37 = vld [vmem:[%s7847_s10 + $0x80] sm:$0xff] }
0x129e   : > { %4399 = vadd.xlane.f32.xlu1 %v4398_v44 }
0x129f   : > { %v7646_v3 = vadd.f32 %v4377_v56, %v7170_v22  ;;  %v4395_v46 = vsel %vm7984_vm12, %v4391_v35, 0.0  ;;  %v4394_v31 = vmul.f32 %v7640_v50, %v7640_v50  ;;  %v5173_v22 = vld [vmem:[%s7846_s9 + $0xb8] sm:$0xff] }
0x12a0   : > { %4396 = vadd.xlane.f32.xlu0 %v4395_v46  ;;  %4474 = vmatprep.subr.mxu0 %v5173_v22 }
0x12a1   : > { %v4404_v13 = vsel %vm7985_vm13, %v4394_v31, 0.0  ;;  %v4393_v42 = vmul.f32 %v7646_v3, %v7646_v3  ;;  %4475 = vmatpush1.msra.mxu0 %v5172_v41 }
0x12a2   : > { %4405 = vadd.xlane.f32.xlu1 %v4404_v13  ;;  %4476 = vmatprep.subr.mxu0 %v5171_v53 }
0x12a3   : > { %v4401_v40 = vsel %vm7986_vm15, %v4393_v42, 0.0  ;;  %4477 = vmatpush1.msra.mxu0 %v5170_v7 }
0x12a4   : > { %4402 = vadd.xlane.f32.xlu0 %v4401_v40  ;;  %4478 = vmatprep.subr.mxu0 %v5169_v49 }
0x12a5   : > { %4479 = vmatpush1.msra.mxu0 %v5168_v54 }
0x12a6   : > { %4480 = vmatprep.subr.mxu0 %v5167_v58 }
0x12a7   : > { %4481 = vmatpush1.msra.mxu0 %v5166_v59 }
0x12a8   : > { %4482 = vmatprep.subr.mxu0 %v5165_v11 }
0x12a9   : > { %4483 = vmatpush1.msra.mxu0 %v5164_v55 }
0x12aa   : > { %4484 = vmatprep.subr.mxu0 %v5163_v63 }
0x12ab   : > { %4485 = vmatpush1.msra.mxu0 %v5162_v62 }
0x1327   : > { %v4400_v57 = vpop.xlane.xlu1 %4399 }
0x1328   : > { %v4408_v0 = vmax.f32 %v4400_v57, 1e-24 }
0x1329   : > { %v4397_v1 = vpop.xlane.xlu0 %4396 }
0x132a   : > { %v4407_v2 = vmax.f32 %v4397_v1, 1e-24  ;;  %6275 = vrsqrt.f32 %v4408_v0 }
0x132b   : > { %v4406_v4 = vpop.xlane.xlu1 %4405 }
0x132c   : > { %6277 = vrsqrt.f32 %v4407_v2  ;;  %v4410_v10 = vmax.f32 %v4406_v4, 1e-24 }
0x132d   : > { %v4403_v6 = vpop.xlane.xlu0 %4402 }
0x132e   : > { %v4409_v9 = vmax.f32 %v4403_v6, 1e-24 }
0x1330   : > { %6279 = vrsqrt.f32 %v4409_v9 }
0x1331   : > { %6281 = vrsqrt.f32 %v4410_v10 }
0x1337   : > { %v6276_v20 = vpop.eup %6275 }
0x1338   : > { %v4416_v48 = vmul.f32 %v6276_v20, %v7632_v14 }
0x1339   : > { %v6278_v12 = vpop.eup %6277 }
0x133a   : > { %v4415_v17 = vmul.f32 %v6278_v12, %v7635_v36  ;;  %v4426_v5 = vmul.f32 %v5161_v15, %v4416_v48 }
0x133c   : > { %v4425_v21 = vmul.f32 %v5161_v15, %v4415_v17 }
0x133d   : > { %v6280_v39 = vpop.eup %6279 }
0x133e   : > { %5174 = vmatmul.mubr.msk.f32.vlgmr.msra.gmra.mxu0 %vm7987_vm0, %v4425_v21  ;;  %v4417_v34 = vmul.f32 %v6280_v39, %v7646_v3  ;;  %v6282_v47 = vpop.eup %6281 }
0x133f   : > { %4524 = vmatprep.mubr.f32.mxu0 %v6368_v45  ;;  %v4418_v24 = vmul.f32 %v6282_v47, %v7640_v50 }
0x1340   : > { %v4427_v27 = vmul.f32 %v5161_v15, %v4417_v34 }
0x1341   : > { %v4428_v8 = vmul.f32 %v5161_v15, %v4418_v24 }
0x1342   : > { %5175 = vmatmul.mubr.msk.f32.gmra.mxu0 %vm7988_vm1, %v4426_v5 }
0x1343   : > { %4530 = vmatprep.mubr.f32.mxu0 %v6368_v45 }
0x1346   : > { %5176 = vmatmul.mubr.msk.f32.gmra.mxu0 %vm7989_vm5, %v4427_v27 }
0x1347   : > { %4536 = vmatprep.mubr.f32.mxu0 %v6368_v45  ;;  %v5198_v45 = vld [vmem:[%s7847_s10 + $0xe0] sm:$0xff] }
0x1348   : > { %6104 = vmatprep.subr.mxu1 %v5198_v45 }
0x1349   : > { %6105 = vmatpush3.msra.mxu1 %v5198_v45 }
0x134a   : > { %5177 = vmatmul.mubr.msk.f32.gmra.mxu0 %vm7990_vm8, %v4428_v8  ;;  %6106 = vmatprep.subr.mxu1 %v5197_v16 }
0x134b   : > { %6107 = vmatpush3.msra.mxu1 %v5197_v16 }
0x134c   : > { %6108 = vmatprep.subr.mxu1 %v5196_v43 }
0x134d   : > { %6109 = vmatpush3.msra.mxu1 %v5196_v43 }
0x134e   : > { %6110 = vmatprep.subr.mxu1 %v5195_v61 }
0x134f   : > { %6111 = vmatpush3.msra.mxu1 %v5195_v61 }
0x1350   : > { %6112 = vmatprep.subr.mxu1 %v5194_v28 }
0x1351   : > { %6113 = vmatpush3.msra.mxu1 %v5194_v28 }
0x1352   : > { %6114 = vmatprep.subr.mxu1 %v5193_v51 }
0x1353   : > { %6115 = vmatpush3.msra.mxu1 %v5193_v51 }
0x1354   : > { %6116 = vmatprep.subr.mxu1 %v5192_v32 }
0x1355   : > { %6117 = vmatpush3.msra.mxu1 %v5192_v32 }
0x1356   : > { %6118 = vmatprep.subr.mxu1 %v5191_v33 }
0x1357   : > { %6119 = vmatpush3.msra.mxu1 %v5191_v33 }
0x1358   : > { %6120 = vmatprep.subr.mxu1 %v5190_v25 }
0x1359   : > { %6121 = vmatpush3.msra.mxu1 %v5190_v25 }
0x135a   : > { %6122 = vmatprep.subr.mxu1 %v5189_v30 }
0x135b   : > { %6123 = vmatpush3.msra.mxu1 %v5189_v30 }
0x135c   : > { %6124 = vmatprep.subr.mxu1 %v5188_v23 }
0x135d   : > { %6125 = vmatpush3.msra.mxu1 %v5188_v23 }
0x135e   : > { %6126 = vmatprep.subr.mxu1 %v5187_v29 }
0x135f   : > { %6127 = vmatpush3.msra.mxu1 %v5187_v29 }
0x1360   : > { %6128 = vmatprep.subr.mxu1 %v5186_v37 }
0x1361   : > { %6129 = vmatpush3.msra.mxu1 %v5186_v37 }
0x13fe   : > { %v7753_v52 = vpop.f32.mrf.mxu0 }
0x1400   : > { %v7755_v18 = vpop.f32.mrf.mxu0 }
0x1401   : > { %v7758_v38 = vmul.f32 0.70710677, %v7755_v18 }
0x1402   : > { %v7760_v56 = vpop.f32.mrf.mxu0 }
0x1403   : > { %v4547_v44 = vand.u32 2147483647, %v7758_v38  ;;  %vm4627_vm11 = vcmp.ge.f32.partialorder %v7758_v38, 0.0 }
0x1404   : > { %v7763_v35 = vpop.f32.mrf.mxu0 }
0x1405   : > { %v4551_v46 = vmul.f32 0.3275911, %v4547_v44  ;;  %v7766_v31 = vmul.f32 0.70710677, %v7763_v35  ;;  %v4603_v11 = vsub.f32 0.0, %v4547_v44  ;;  %v4640_v38 = vmul.f32 0.5, %v7763_v35 }
0x1406   : > { %v7768_v13 = vpop.f32.mrf.mxu0 }
0x1407   : > { %v4555_v42 = vadd.f32 1.0, %v4551_v46  ;;  %v4548_v40 = vand.u32 2147483647, %v7766_v31  ;;  %v4607_v0 = vmul.f32 %v4603_v11, %v4547_v44  ;;  %vm4628_vm3 = vcmp.ge.f32.partialorder %v7766_v31, 0.0 }
0x1408   : > { %v7771_v22 = vpop.f32.mrf.mxu0 }
0x1409   : > { %6283 = vrcp.f32 %v4555_v42  ;;  %v4552_v41 = vmul.f32 0.3275911, %v4548_v40  ;;  %v7774_v53 = vmul.f32 0.70710677, %v7771_v22  ;;  %v4604_v1 = vsub.f32 0.0, %v4548_v40 }
0x140a   : > { %v7776_v7 = vpop.f32.mrf.mxu0  ;;  %v4611_v6 = vmul.f32 1.442695, %v4607_v0 }
0x140b   : > { %v4556_v49 = vadd.f32 1.0, %v4552_v41  ;;  %v4549_v54 = vand.u32 2147483647, %v7774_v53  ;;  %v4608_v10 = vmul.f32 %v4604_v1, %v4548_v40  ;;  %vm4629_vm4 = vcmp.ge.f32.partialorder %v7774_v53, 0.0 }
0x140c   : > { %v7779_v58 = vpop.f32.mrf.mxu0 }
0x140d   : > { %6285 = vrcp.f32 %v4556_v49  ;;  %v7782_v59 = vmul.f32 0.70710677, %v7779_v58  ;;  %v4553_v55 = vmul.f32 0.3275911, %v4549_v54  ;;  %v4605_v20 = vsub.f32 0.0, %v4549_v54 }
0x140e   : > { %v4613_v48 = vmul.f32 1.442695, %v4608_v10 }
0x140f   : > { %v4550_v63 = vand.u32 2147483647, %v7782_v59  ;;  %v4557_v62 = vadd.f32 1.0, %v4553_v55  ;;  %v4609_v5 = vmul.f32 %v4605_v20, %v4549_v54  ;;  %vm4630_vm14 = vcmp.ge.f32.partialorder %v7782_v59, 0.0 }
0x1411   : > { %v4554_v57 = vmul.f32 0.3275911, %v4550_v63  ;;  %6287 = vrcp.f32 %v4557_v62  ;;  %v4606_v39 = vsub.f32 0.0, %v4550_v63  ;;  %v4615_v19 = vmul.f32 1.442695, %v4609_v5 }
0x1413   : > { %v4558_v2 = vadd.f32 1.0, %v4554_v57  ;;  %v4610_v26 = vmul.f32 %v4606_v39, %v4550_v63 }
0x1415   : > { %6289 = vrcp.f32 %v4558_v2  ;;  %v4617_v33 = vmul.f32 1.442695, %v4610_v26 }
0x1416   : > { %v6284_v4 = vpop.eup %6283  ;;  %6291 = vpow2.f32 %v4611_v6 }
0x1417   : > { %v4567_v9 = vmul.f32 1.0614054, %v6284_v4  ;;  %6293 = vpow2.f32 %v4613_v48 }
0x1418   : > { %6295 = vpow2.f32 %v4615_v19 }
0x1419   : > { %v5178_v12 = vadd.f32 -1.4531521, %v4567_v9  ;;  %6297 = vpow2.f32 %v4617_v33 }
0x141a   : > { %v6286_v17 = vpop.eup %6285 }
0x141b   : > { %v4575_v15 = vmul.f32 %v6284_v4, %v5178_v12  ;;  %v4568_v21 = vmul.f32 1.0614054, %v6286_v17 }
0x141d   : > { %v4579_v34 = vadd.f32 1.4214138, %v4575_v15  ;;  %v5179_v47 = vadd.f32 -1.4531521, %v4568_v21  ;;  %v4639_v15 = vmul.f32 0.5, %v7755_v18 }
0x141e   : > { %v6288_v27 = vpop.eup %6287 }
0x141f   : > { %v4583_v24 = vmul.f32 %v6284_v4, %v4579_v34  ;;  %v4576_v8 = vmul.f32 %v6286_v17, %v5179_v47  ;;  %v4569_v60 = vmul.f32 1.0614054, %v6288_v27 }
0x1421   : > { %v5182_v45 = vadd.f32 -0.28449672, %v4583_v24  ;;  %v4580_v16 = vadd.f32 1.4214138, %v4576_v8  ;;  %v5180_v61 = vadd.f32 -1.4531521, %v4569_v60 }
0x1422   : > { %v6290_v43 = vpop.eup %6289 }
0x1423   : > { %v4591_v28 = vmul.f32 %v6284_v4, %v5182_v45  ;;  %v4584_v51 = vmul.f32 %v6286_v17, %v4580_v16  ;;  %v4570_v32 = vmul.f32 1.0614054, %v6290_v43  ;;  %v4577_v25 = vmul.f32 %v6288_v27, %v5180_v61  ;;  %v6292_v44 = vpop.eup %6291 }
0x1424   : > { %v6294_v0 = vpop.eup %6293 }
0x1425   : > { %v4595_v30 = vadd.f32 0.2548296, %v4591_v28  ;;  %v5183_v23 = vadd.f32 -0.28449672, %v4584_v51  ;;  %v5181_v29 = vadd.f32 -1.4531521, %v4570_v32  ;;  %v6296_v39 = vpop.eup %6295 }
0x1426   : > { %v4581_v37 = vadd.f32 1.4214138, %v4577_v25  ;;  %v6298_v26 = vpop.eup %6297  ;;  %v4641_v51 = vmul.f32 0.5, %v7771_v22 }
0x1427   : > { %v4599_v46 = vmul.f32 %v6284_v4, %v4595_v30  ;;  %v4592_v42 = vmul.f32 %v6286_v17, %v5183_v23  ;;  %v4578_v40 = vmul.f32 %v6290_v43, %v5181_v29 }
0x1428   : > { %v4585_v41 = vmul.f32 %v6288_v27, %v4581_v37 }
0x1429   : > { %v4619_v49 = vmul.f32 %v6292_v44, %v4599_v46  ;;  %v4596_v54 = vadd.f32 0.2548296, %v4592_v42  ;;  %v4582_v11 = vadd.f32 1.4214138, %v4578_v40 }
0x142a   : > { %v5184_v55 = vadd.f32 -0.28449672, %v4585_v41 }
0x142b   : > { %v4623_v63 = vsub.f32 1.0, %v4619_v49  ;;  %v4600_v62 = vmul.f32 %v6286_v17, %v4596_v54  ;;  %v4586_v57 = vmul.f32 %v6290_v43, %v4582_v11 }
0x142c   : > { %v4593_v1 = vmul.f32 %v6288_v27, %v5184_v55 }
0x142d   : > { %v4631_v2 = vsub.f32 0.0, %v4623_v63  ;;  %v4620_v6 = vmul.f32 %v6294_v0, %v4600_v62  ;;  %v5185_v9 = vadd.f32 -0.28449672, %v4586_v57 }
0x142e   : > { %v4597_v10 = vadd.f32 0.2548296, %v4593_v1 }
0x142f   : > { %v4635_v4 = vsel %vm4627_vm11, %v4623_v63, %v4631_v2  ;;  %v4624_v20 = vsub.f32 1.0, %v4620_v6  ;;  %v4594_v12 = vmul.f32 %v6290_v43, %v5185_v9 }
0x1430   : > { %v4643_v21 = vadd.f32 1.0, %v4635_v4  ;;  %v4601_v48 = vmul.f32 %v6288_v27, %v4597_v10 }
0x1431   : > { %v4632_v5 = vsub.f32 0.0, %v4624_v20  ;;  %v4598_v34 = vadd.f32 0.2548296, %v4594_v12 }
0x1432   : > { %v4647_v17 = vmul.f32 %v4643_v21, %v4639_v15  ;;  %v4621_v47 = vmul.f32 %v6296_v39, %v4601_v48 }
0x1433   : > { %v4636_v24 = vsel %vm4628_vm3, %v4624_v20, %v4632_v5  ;;  %v4602_v8 = vmul.f32 %v6290_v43, %v4598_v34 }
0x1434   : > { %v4644_v60 = vadd.f32 1.0, %v4636_v24  ;;  %v4625_v19 = vsub.f32 1.0, %v4621_v47  ;;  %v4651_v45 = vmul.f32 %v4647_v17, %v7753_v52  ;;  %v4642_v52 = vmul.f32 0.5, %v7779_v58 }
0x1435   : > { %v4622_v16 = vmul.f32 %v6298_v26, %v4602_v8 }
0x1436   : > { %v4648_v18 = vmul.f32 %v4644_v60, %v4640_v38  ;;  %v4633_v61 = vsub.f32 0.0, %v4625_v19  ;;  %6130 = vmatprep.mubr.f32.mxu1 %v4651_v45 }
0x1437   : > { %v4626_v27 = vsub.f32 1.0, %v4622_v16 }
0x1438   : > { %v4652_v28 = vmul.f32 %v4648_v18, %v7760_v56  ;;  %v4637_v31 = vsel %vm4629_vm4, %v4625_v19, %v4633_v61 }
0x1439   : > { %v4645_v43 = vadd.f32 1.0, %v4637_v31  ;;  %v4634_v32 = vsub.f32 0.0, %v4626_v27 }
0x143a   : > { %6131 = vmatmul.mubr.f32.vlgmr.msra.gmra.mxu1 %v4652_v28 }
0x143b   : > { %v4649_v35 = vmul.f32 %v4645_v43, %v4641_v51  ;;  %v4638_v33 = vsel %vm4630_vm14, %v4626_v27, %v4634_v32 }
0x143c   : > { %v4646_v25 = vadd.f32 1.0, %v4638_v33 }
0x143d   : > { %v4653_v30 = vmul.f32 %v4649_v35, %v7768_v13 }
0x143e   : > { %v4650_v23 = vmul.f32 %v4646_v25, %v4642_v52 }
0x143f   : > { %6133 = vmatprep.mubr.f32.mxu1 %v4653_v30 }
0x1440   : > { %v4654_v53 = vmul.f32 %v4650_v23, %v7776_v7 }
0x1442   : > { %6134 = vmatmul.mubr.f32.gmra.mxu1 %v4654_v53 }
0x14fa   : > { %v6132_v56 = vpop.f32.mrf.mxu1 }
0x14fb   : > { %v4758_v22 = vadd.f32 %v6132_v56, %v7632_v14 }
0x14fc   : > { %v4738_v29 = vpop.f32.mrf.mxu1 }
0x14fd   : > { %4762 = vst.msk [vmem:[#allocation2 - $0x4] sm:$0xf0] %vm4761_vm7, %v4758_v22  ;;  %v4757_v59 = vadd.f32 %v4738_v29, %v7635_v36 }
0x1501   : > { %4767 = sbr.rel (%p5202_p10) target bundleno = 5550 (0x15ae), region = 114 }
0x1502   : > { %v6135_v37 = vpop.f32.mrf.mxu1 }
0x1503   : > { %v4760_v58 = vadd.f32 %v6135_v37, %v7640_v50 }
0x1504   : > { %v4748_v44 = vpop.f32.mrf.mxu1 }
0x1505   : > { %4763 = vst.msk [vmem:[#allocation2] sm:$0xf0] %vm4761_vm7, %v4760_v58  ;;  %v4759_v13 = vadd.f32 %v4748_v44, %v7646_v3 }
0x1506   : > { %v4769_v46 = vmul.f32 %v4757_v59, %v4757_v59  ;;  %v4795_v42 = vmul.f32 %v4760_v58, %v4760_v58  ;;  %vm4774_vm9 = vcmask 388096   ;;  %v4770_v14 = vmul.f32 %v4758_v22, %v4758_v22  ;;  %v5203_v1 = vld [vmem:[%s7848_s11] ss:$0 sm:$0xff] }
0x1507   : > { %v4794_v7 = vmul.f32 %v4759_v13, %v4759_v13 }
0x1508   : > { %v4771_v36 = vsel %vm4761_vm7, %v4769_v46, 0.0  ;;  %v4799_v50 = vsel %vm4774_vm9, %v4795_v42, 0.0  ;;  %v4775_v41 = vsel %vm4774_vm9, %v4770_v14, 0.0 }
0x1509   : > { %v4796_v40 = vsel %vm4761_vm7, %v4794_v7, 0.0  ;;  %4772 = vadd.xlane.f32.xlu0 %v4771_v36 }
0x150a   : > { %4797 = vadd.xlane.f32.xlu1 %v4796_v40 }
0x150d   : > { %4776 = vadd.xlane.f32.xlu0 %v4775_v41 }
0x150e   : > { %4800 = vadd.xlane.f32.xlu1 %v4799_v50 }
0x1592   : > { %v4773_v49 = vpop.xlane.xlu0 %4772 }
0x1593   : > { %v4798_v3 = vpop.xlane.xlu1 %4797  ;;  %v4778_v11 = vmax.f32 %v4773_v49, 1e-24 }
0x1594   : > { %v4802_v54 = vmax.f32 %v4798_v3, 1e-24 }
0x1596   : > { %6307 = vrsqrt.f32 %v4802_v54  ;;  %v4777_v63 = vpop.xlane.xlu0 %4776 }
0x1597   : > { %6309 = vrsqrt.f32 %v4778_v11  ;;  %v4801_v55 = vpop.xlane.xlu1 %4800  ;;  %v4779_v57 = vmax.f32 %v4777_v63, 1e-24 }
0x1598   : > { %v4803_v62 = vmax.f32 %v4801_v55, 1e-24 }
0x159a   : > { %6311 = vrsqrt.f32 %v4803_v62 }
0x159b   : > { %6313 = vrsqrt.f32 %v4779_v57 }
0x15a3   : > { %v6308_v0 = vpop.eup %6307 }
0x15a4   : > { %v6310_v2 = vpop.eup %6309  ;;  %v4806_v6 = vmul.f32 %v6308_v0, %v4759_v13 }
0x15a5   : > { %v4782_v9 = vmul.f32 %v6310_v2, %v4757_v59 }
0x15a6   : > { %v4808_v10 = vmul.f32 %v5203_v1, %v4806_v6 }
0x15a7   : > { %v6312_v4 = vpop.eup %6311  ;;  %v4790_v20 = vmul.f32 %v5203_v1, %v4782_v9 }
0x15a8   : > { %v6314_v12 = vpop.eup %6313  ;;  %4811 = vst.msk [vmem:[#allocation4 + $0x4] sm:$0xf0] %vm4761_vm7, %v4808_v10  ;;  %v4807_v15 = vmul.f32 %v6312_v4, %v4760_v58 }
0x15a9   : > { %4792 = vst.msk [vmem:[#allocation4 - $0x4] sm:$0xf0] %vm4761_vm7, %v4790_v20  ;;  %v4783_v21 = vmul.f32 %v6314_v12, %v4758_v22 }
0x15aa   : > { %v4809_v48 = vmul.f32 %v5203_v1, %v4807_v15 }
0x15ab   : > { %v4791_v39 = vmul.f32 %v5203_v1, %v4783_v21 }
0x15ac   : > { %4812 = vst.msk [vmem:[#allocation4 + $0xc] sm:$0xf] %vm4774_vm9, %v4809_v48 }
0x15ad   : > { %4793 = vst.msk [vmem:[#allocation4 + $0x4] sm:$0xf] %vm4774_vm9, %v4791_v39 }
0x15ae PF: > { %p6140_p11 = scmp.eq.s32.totalorder %s6450_s24, 1  ;;  %s6369_s23 = smov [#allocation4]  }
0x15af   : > { %s4819_s29 = sshll.u32 %s6369_s23, 4  ;;  %s4820_s29 = int_to_ptr.vmem [resolvable:$true] %s4819_s29 }
0x15b0   : > { %s6315_s30 = scalar_lea.vmem %s4820_s29, 256  ;;  %p6322_p1 = scmp.lt.s32.totalorder %s4820_s29, %s4820_s29 }
0x15b1   : > { %p6316_p12 = scmp.ne.s32.totalorder %s4820_s29, %s6315_s30  ;;  %p6323_p2 = scmp.lt.s32.totalorder %s6315_s30, %s6315_s30 }
0x15b3   : > { %p6317_p13 = pnand %p6316_p12, %p6140_p11  ;;  %p6324_p3 = por %p6323_p2, %p6322_p1 }
0x15b5   : > { %p6318_p0 = pneg %p6317_p13 }
0x15b7   : > { %p6325_p4 = pnand %p6324_p3, %p6318_p0 }
0x15b9   : > { %6328 = shalt.err (!%p6325_p4)
}
0x15ba   : > { %s6370_s13 = smov 128   ;;  %s6371_s14 = smov 8  }
0x15bb   : > { %6137 = dma.vmem_to_hbm [thread:$0]  (%p6140_p11), %s4820_s29, 256, %s7849_s12, [#allocation5], %s6370_s13, %s6370_s13, %s6371_s14  }
0x15bc   : > { %6352 = dma.done.wait (%p6140_p11), [#allocation5], 256  }
0x15bd   : > { %6354 = vsyncadd (%p6140_p11), [#allocation5], 4294967040 }
0x15be PF: > { %p20_p5 = scmp.ge.s32.totalorder %s6452_s25, 4   ;;  %s7991_s21 = smov %s6361_s22 }
0x15bf   : > { %s7992_s22 = smov %s6459_s28  ;;  %s7993_s23 = smov %s6452_s25 }
0x15c0   :  { %22 = sbr.rel (!%p20_p5) target bundleno = 2 (0x2), region = 175 }
0x15c5   :  { %4835 = vsyncpa [#allocation5], 1 }
0x15c6   :  { %4837 = vsyncpa [#allocation5 + $0x1], 1 }

</bundles_post_ra>
